<compile_context>
chip_gen: v7x
topology: tpu7x:2x2x1
jax: 0.10.0
libtpu: 0.0.40
codegen_flags: <defaults>
</compile_context>

<pallas_src>
import jax
import jax.numpy as jnp
from jax import lax
from jax.experimental import pallas as pl
from jax.experimental.pallas import tpu as pltpu

EPS = 1e-6
LEAKY_SLOPE = 0.2  # act_fun("leaky_relu") -> nn.LeakyReLU(0.2)


# ----------------------------------------------------------------------------
# Fused Pallas kernel
# ----------------------------------------------------------------------------
def _make_fused_kernel(Lin, geom, pools):
    """geom: per-layer (K, Cin, Cout, Lconv, Lpool); pools: per-layer pool len."""
    n_layers = len(geom)

    def pool_ln_act(acc, scr, g_ref, bt_ref, pool, Lp):
        # F.max_pool1d(kernel=stride=pool): sublane-strided reads from scratch.
        scr[...] = acc
        pooled = scr[pl.ds(0, Lp, stride=pool), :]
        for p in range(1, pool):
            pooled = jnp.maximum(pooled, scr[pl.ds(p, Lp, stride=pool), :])
        # SincNet LayerNorm over time (unbiased std, EPS added to std):
        # divide replaced by a 1-row reciprocal + broadcast multiply.
        mean = jnp.mean(pooled, axis=0, keepdims=True)
        centered = pooled - mean
        var = jnp.sum(centered * centered, axis=0, keepdims=True) / (Lp - 1)
        inv = pl.reciprocal(jnp.sqrt(var) + EPS, approx=True)   # (1, C) row, EUP
        y = g_ref[...] * (centered * inv) + bt_ref[...]
        # LeakyReLU(0.2) == max(y, 0.2*y); dropout p=0 (eval) -> identity.
        return jnp.maximum(y, LEAKY_SLOPE * y)

    def kernel(*refs):
        x_ref, xp_ref, g0p_ref, b0p_ref = refs[:4]
        lrefs = refs[4:4 + 4 * n_layers]
        o_ref = refs[4 + 4 * n_layers]
        scrs = refs[4 + 4 * n_layers + 1:]

        # ---- input LayerNorm (ln0) statistics, time on lanes (XLU reduce)
        x = x_ref[0]                                            # (1, Lin)
        m0 = jnp.mean(x, axis=1, keepdims=True)                 # (1, 1)
        c0 = x - m0
        v0 = jnp.sum(c0 * c0, axis=1, keepdims=True) / (Lin - 1)
        inv0 = pl.reciprocal(jnp.sqrt(v0) + EPS, approx=True)   # (1, 1)

        h = None
        for i, (K, Cin, Cout, Lc, Lp) in enumerate(geom):
            w_ref, b_ref, g_ref, bt_ref = lrefs[4 * i:4 * i + 4]
            if i == 0:
                # Sinc conv (Cin=1) as ONE im2col MXU matmul.  ln0 is applied
                # to the pre-built patches (gamma0/beta0 were patch-ified in
                # the wrapper; stats m0/inv0 come from the full waveform).
                xn = g0p_ref[...] * ((xp_ref[0] - m0) * inv0) + b0p_ref[...]
                acc = jnp.dot(xn, w_ref[...],
                              preferred_element_type=jnp.float32)
                acc = jnp.abs(acc + b_ref[...])                 # torch.abs(sinc_conv)
            else:
                # K shifted MXU matmuls on the VMEM-resident activation.
                acc = jnp.zeros((Lc, Cout), jnp.float32)
                for k in range(K):
                    acc = acc + jnp.dot(h[k:k + Lc, :], w_ref[k],
                                        preferred_element_type=jnp.float32)
                acc = acc + b_ref[...]
            h = pool_ln_act(acc, scrs[i], g_ref, bt_ref, pools[i], Lp)

        o_ref[0] = h.astype(o_ref.dtype)

    return kernel


def sincnet_forward(x, params, pool_lens):
    """x: (B, Lin) waveform.  Returns (B, C_last * Lpool_last), torch view(B,-1) order."""
    B, Lin = x.shape
    layers = params["layers"]

    # per-layer geometry (K, Cin, Cout, Lconv, Lpool)
    geom = []
    cur = Lin
    for i, lp in enumerate(layers):
        Cout, Cin, K = lp["w"].shape
        Lc = cur - K + 1
        Lp = Lc // pool_lens[i]
        geom.append((K, Cin, Cout, Lc, Lp))
        cur = Lp

    K0, _, _, Lc0, _ = geom[0]
    # wrapper-side im2col of the raw waveform and of ln0's per-position affine
    idx = jnp.arange(Lc0)[:, None] + jnp.arange(K0)[None, :]       # (Lc0, K0)
    xp = x[:, idx]                                                 # (B, Lc0, K0)
    g0p = params["gamma0"][idx]
    b0p = params["beta0"][idx]
    x3 = x[:, None, :]                                             # (B, 1, Lin)

    args = [x3, xp, g0p, b0p]
    in_specs = [
        pl.BlockSpec((1, 1, Lin), lambda b: (b, 0, 0)),            # waveform (lane-major)
        pl.BlockSpec((1, Lc0, K0), lambda b: (b, 0, 0)),           # im2col patches
        pl.BlockSpec((Lc0, K0), lambda b: (0, 0)),                 # ln0 gamma (patched)
        pl.BlockSpec((Lc0, K0), lambda b: (0, 0)),                 # ln0 beta  (patched)
    ]
    scratch_shapes = []
    for i, lp in enumerate(layers):
        K, Cin, Cout, Lc, Lp = geom[i]
        if i == 0:
            w = jnp.transpose(lp["w"], (2, 1, 0)).reshape(K, Cout)  # (K, Cout)
            w_spec = pl.BlockSpec((K, Cout), lambda b: (0, 0))
        else:
            w = jnp.transpose(lp["w"], (2, 1, 0))                   # (K, Cin, Cout)
            w_spec = pl.BlockSpec((K, Cin, Cout), lambda b: (0, 0, 0))
        args += [w, lp["b"][None, :], lp["gamma"].T, lp["beta"].T]
        in_specs += [
            w_spec,
            pl.BlockSpec((1, Cout), lambda b: (0, 0)),             # conv bias
            pl.BlockSpec((Lp, Cout), lambda b: (0, 0)),            # LN gamma (L, C)
            pl.BlockSpec((Lp, Cout), lambda b: (0, 0)),            # LN beta  (L, C)
        ]
        scratch_shapes.append(pltpu.VMEM((Lc, Cout), jnp.float32))

    _, _, C_last, _, Lp_last = geom[-1]
    kernel = _make_fused_kernel(Lin, tuple(geom), tuple(pool_lens))

    out = pl.pallas_call(
        kernel,
        out_shape=jax.ShapeDtypeStruct((B, Lp_last, C_last), jnp.float32),
        grid=(B,),
        in_specs=in_specs,
        out_specs=pl.BlockSpec((1, Lp_last, C_last), lambda b: (b, 0, 0)),
        scratch_shapes=scratch_shapes,
        compiler_params=pltpu.CompilerParams(
            dimension_semantics=("parallel",)),
    )(*args)

    # flatten like torch x.view(B, -1) applied to the (B, C, L) activation
    return jnp.transpose(out, (0, 2, 1)).reshape(B, -1)


# ----------------------------------------------------------------------------
# Parameter construction (glue, plain JAX) — SincConv filter bank (SincConv_fast)
# ----------------------------------------------------------------------------
def make_sinc_filters(out_channels, kernel_size, sample_rate,
                      min_low_hz=50.0, min_band_hz=50.0):
    assert kernel_size % 2 == 1, "SincConv kernel size must be odd"

    def to_mel(hz):
        return 2595.0 * jnp.log10(1.0 + hz / 700.0)

    def to_hz(mel):
        return 700.0 * (10.0 ** (mel / 2595.0) - 1.0)

    low_hz = 30.0
    high_hz = sample_rate / 2.0 - (min_low_hz + min_band_hz)
    mel = jnp.linspace(to_mel(low_hz), to_mel(high_hz), out_channels + 1)
    hz = to_hz(mel)
    low_hz_ = hz[:-1][:, None]
    band_hz_ = jnp.diff(hz)[:, None]

    n_lin = jnp.linspace(0.0, kernel_size / 2.0 - 1.0, num=kernel_size // 2)
    window = 0.54 - 0.46 * jnp.cos(2.0 * jnp.pi * n_lin / kernel_size)
    n_half = (kernel_size - 1) / 2.0
    n_ = 2.0 * jnp.pi * jnp.arange(-n_half, 0.0)[None, :] / sample_rate

    low = min_low_hz + jnp.abs(low_hz_)
    high = jnp.clip(low + min_band_hz + jnp.abs(band_hz_), min_low_hz, sample_rate / 2.0)
    band = (high - low)[:, 0]

    f_low = low @ n_
    f_high = high @ n_
    bp_left = ((jnp.sin(f_high) - jnp.sin(f_low)) / (n_ / 2.0)) * window[None, :]
    bp_center = 2.0 * band[:, None]
    bp_right = bp_left[:, ::-1]
    bp = jnp.concatenate([bp_left, bp_center, bp_right], axis=1)
    bp = bp / (2.0 * band[:, None])
    return bp.reshape(out_channels, 1, kernel_size).astype(jnp.float32)  # (O, I=1, K)


# ----------------------------------------------------------------------------
# Pure-JAX reference (same math as the PyTorch module, NCL layout)
# ----------------------------------------------------------------------------
def sincnet_reference(x, params, pool_lens):
    def ln(v, gamma, beta):
        mean = jnp.mean(v, axis=-1, keepdims=True)
        var = jnp.sum((v - mean) ** 2, axis=-1, keepdims=True) / (v.shape[-1] - 1)
        return gamma * (v - mean) / (jnp.sqrt(var) + EPS) + beta

    B, _ = x.shape
    h = ln(x, params["gamma0"], params["beta0"])
    h = h[:, None, :]                                   # (B, 1, L) torch NCL
    for i, lp in enumerate(params["layers"]):
        out = lax.conv_general_dilated(h, lp["w"], window_strides=(1,),
                                       padding="VALID",
                                       dimension_numbers=("NCH", "OIH", "NCH"))
        out = out + lp["b"][None, :, None]
        if i == 0:
            out = jnp.abs(out)
        pool = pool_lens[i]
        out = lax.reduce_window(out, -jnp.inf, lax.max,
                                (1, 1, pool), (1, 1, pool), "VALID")
        out = ln(out, lp["gamma"], lp["beta"])
        h = jnp.where(out >= 0, out, LEAKY_SLOPE * out)
    return h.reshape(B, -1)


# ----------------------------------------------------------------------------
if __name__ == "__main__":
    # small, default-SincNet-style config: laynorm everywhere, leaky_relu, flatten
    B, L = 2, 256
    sample_rate = 16000
    cnn_N_filt = [16, 16, 16]
    cnn_len_filt = [31, 5, 5]
    cnn_max_pool_len = [2, 2, 2]

    key = jax.random.PRNGKey(0)
    kx, kw1, kb1, kw2, kb2, kg0, kb0, kl = jax.random.split(key, 8)
    gkeys = jax.random.split(kl, 6)
    x = jax.random.normal(kx, (B, L), dtype=jnp.float32)

    # deterministic parameters (shapes follow the torch module __init__)
    layers = []
    cur = L
    wkeys = [(None, None), (kw1, kb1), (kw2, kb2)]
    for i in range(3):
        Cout = cnn_N_filt[i]
        Cin = 1 if i == 0 else cnn_N_filt[i - 1]
        K = cnn_len_filt[i]
        Lp = (cur - K + 1) // cnn_max_pool_len[i]
        if i == 0:
            w = make_sinc_filters(Cout, K, sample_rate)
            b = jnp.zeros((Cout,), jnp.float32)         # SincConv has no bias
        else:
            kw, kb = wkeys[i]
            w = 0.1 * jax.random.normal(kw, (Cout, Cin, K), dtype=jnp.float32)
            b = 0.1 * jax.random.normal(kb, (Cout,), dtype=jnp.float32)
        gamma = 1.0 + 0.05 * jax.random.normal(gkeys[2 * i], (Cout, Lp), dtype=jnp.float32)
        beta = 0.05 * jax.random.normal(gkeys[2 * i + 1], (Cout, Lp), dtype=jnp.float32)
        layers.append(dict(w=w, b=b, gamma=gamma, beta=beta))
        cur = Lp

    params = dict(
        layers=layers,
        gamma0=1.0 + 0.05 * jax.random.normal(kg0, (L,), dtype=jnp.float32),
        beta0=0.05 * jax.random.normal(kb0, (L,), dtype=jnp.float32),
    )

    out = sincnet_forward(x, params, cnn_max_pool_len)
    out = jax.block_until_ready(out)

    ref = sincnet_reference(x, params, cnn_max_pool_len)
    assert out.shape == (B, cur * cnn_N_filt[-1]), out.shape
    assert bool(jnp.allclose(out, ref, rtol=1e-2, atol=1e-2))

    print("KERNEL_OK")
</pallas_src>

<mosaic_0001>
module attributes {stable_mosaic.version = 11 : i64} {
  func.func @kernel(%arg0: i32, %arg1: memref<1x1x256xf32, #tpu.memory_space<vmem>>, %arg2: memref<1x226x31xf32, #tpu.memory_space<vmem>>, %arg3: memref<226x31xf32, #tpu.memory_space<vmem>>, %arg4: memref<226x31xf32, #tpu.memory_space<vmem>>, %arg5: memref<31x16xf32, #tpu.memory_space<vmem>>, %arg6: memref<1x16xf32, #tpu.memory_space<vmem>>, %arg7: memref<113x16xf32, #tpu.memory_space<vmem>>, %arg8: memref<113x16xf32, #tpu.memory_space<vmem>>, %arg9: memref<5x16x16xf32, #tpu.memory_space<vmem>>, %arg10: memref<1x16xf32, #tpu.memory_space<vmem>>, %arg11: memref<54x16xf32, #tpu.memory_space<vmem>>, %arg12: memref<54x16xf32, #tpu.memory_space<vmem>>, %arg13: memref<5x16x16xf32, #tpu.memory_space<vmem>>, %arg14: memref<1x16xf32, #tpu.memory_space<vmem>>, %arg15: memref<25x16xf32, #tpu.memory_space<vmem>>, %arg16: memref<25x16xf32, #tpu.memory_space<vmem>>, %arg17: memref<1x25x16xf32, #tpu.memory_space<vmem>>, %arg18: memref<226x16xf32, #tpu.memory_space<vmem>>, %arg19: memref<109x16xf32, #tpu.memory_space<vmem>>, %arg20: memref<50x16xf32, #tpu.memory_space<vmem>>) attributes {dimension_semantics = [#tpu.dimension_semantics<parallel>], iteration_bounds = array<i64: 2>, scalar_prefetch = 0 : i64, scratch_operands = 3 : i64, tpu.core_type = #tpu.core_type<tc>, window_params = [{transform_indices = @transform_0, window_bounds = array<i64: 1, 1, 256>}, {transform_indices = @transform_1, window_bounds = array<i64: 1, 226, 31>}, {pipeline_mode = #tpu.pipeline_mode<synchronous>, transform_indices = @transform_2, window_bounds = array<i64: 226, 31>}, {pipeline_mode = #tpu.pipeline_mode<synchronous>, transform_indices = @transform_3, window_bounds = array<i64: 226, 31>}, {pipeline_mode = #tpu.pipeline_mode<synchronous>, transform_indices = @transform_4, window_bounds = array<i64: 31, 16>}, {pipeline_mode = #tpu.pipeline_mode<synchronous>, transform_indices = @transform_5, window_bounds = array<i64: 1, 16>}, {pipeline_mode = #tpu.pipeline_mode<synchronous>, transform_indices = @transform_6, window_bounds = array<i64: 113, 16>}, {pipeline_mode = #tpu.pipeline_mode<synchronous>, transform_indices = @transform_7, window_bounds = array<i64: 113, 16>}, {pipeline_mode = #tpu.pipeline_mode<synchronous>, transform_indices = @transform_8, window_bounds = array<i64: 5, 16, 16>}, {pipeline_mode = #tpu.pipeline_mode<synchronous>, transform_indices = @transform_9, window_bounds = array<i64: 1, 16>}, {pipeline_mode = #tpu.pipeline_mode<synchronous>, transform_indices = @transform_10, window_bounds = array<i64: 54, 16>}, {pipeline_mode = #tpu.pipeline_mode<synchronous>, transform_indices = @transform_11, window_bounds = array<i64: 54, 16>}, {pipeline_mode = #tpu.pipeline_mode<synchronous>, transform_indices = @transform_12, window_bounds = array<i64: 5, 16, 16>}, {pipeline_mode = #tpu.pipeline_mode<synchronous>, transform_indices = @transform_13, window_bounds = array<i64: 1, 16>}, {pipeline_mode = #tpu.pipeline_mode<synchronous>, transform_indices = @transform_14, window_bounds = array<i64: 25, 16>}, {pipeline_mode = #tpu.pipeline_mode<synchronous>, transform_indices = @transform_15, window_bounds = array<i64: 25, 16>}, {transform_indices = @transform_16, window_bounds = array<i64: 1, 25, 16>}]} {
    %c0 = arith.constant 0 : index
    %c0_0 = arith.constant 0 : index
    %c0_1 = arith.constant 0 : index
    %0 = vector.load %arg1[%c0, %c0_0, %c0_1] : memref<1x1x256xf32, #tpu.memory_space<vmem>>, vector<1x1x256xf32>
    %1 = vector.shape_cast %0 : vector<1x1x256xf32> to vector<1x256xf32>
    %cst = arith.constant dense<0.000000e+00> : vector<1xf32>
    %2 = vector.multi_reduction <add>, %1, %cst [1] : vector<1x256xf32> to vector<1xf32>
    %3 = vector.shape_cast %2 : vector<1xf32> to vector<1x1xf32>
    %cst_2 = arith.constant 2.560000e+02 : f32
    %4 = vector.broadcast %cst_2 : f32 to vector<1x1xf32>
    %5 = arith.divf %3, %4 : vector<1x1xf32>
    %6 = vector.broadcast %5 : vector<1x1xf32> to vector<1x256xf32>
    %7 = arith.subf %1, %6 : vector<1x256xf32>
    %8 = arith.mulf %7, %7 : vector<1x256xf32>
    %cst_3 = arith.constant dense<0.000000e+00> : vector<1xf32>
    %9 = vector.multi_reduction <add>, %8, %cst_3 [1] : vector<1x256xf32> to vector<1xf32>
    %10 = vector.shape_cast %9 : vector<1xf32> to vector<1x1xf32>
    %cst_4 = arith.constant 2.550000e+02 : f32
    %11 = vector.broadcast %cst_4 : f32 to vector<1x1xf32>
    %12 = arith.divf %10, %11 : vector<1x1xf32>
    %13 = math.sqrt %12 : vector<1x1xf32>
    %cst_5 = arith.constant 9.99999997E-7 : f32
    %14 = vector.broadcast %cst_5 : f32 to vector<1x1xf32>
    %15 = arith.addf %13, %14 : vector<1x1xf32>
    %16 = tpu.reciprocal %15 {approx = true} : vector<1x1xf32> -> vector<1x1xf32>
    %c0_6 = arith.constant 0 : index
    %c0_7 = arith.constant 0 : index
    %17 = vector.load %arg3[%c0_6, %c0_7] : memref<226x31xf32, #tpu.memory_space<vmem>>, vector<226x31xf32>
    %c0_8 = arith.constant 0 : index
    %c0_9 = arith.constant 0 : index
    %c0_10 = arith.constant 0 : index
    %18 = vector.load %arg2[%c0_8, %c0_9, %c0_10] : memref<1x226x31xf32, #tpu.memory_space<vmem>>, vector<1x226x31xf32>
    %19 = vector.shape_cast %18 : vector<1x226x31xf32> to vector<226x31xf32>
    %20 = vector.broadcast %5 : vector<1x1xf32> to vector<226x31xf32>
    %21 = arith.subf %19, %20 : vector<226x31xf32>
    %22 = vector.broadcast %16 : vector<1x1xf32> to vector<226x31xf32>
    %23 = arith.mulf %21, %22 : vector<226x31xf32>
    %24 = arith.mulf %17, %23 : vector<226x31xf32>
    %c0_11 = arith.constant 0 : index
    %c0_12 = arith.constant 0 : index
    %25 = vector.load %arg4[%c0_11, %c0_12] : memref<226x31xf32, #tpu.memory_space<vmem>>, vector<226x31xf32>
    %26 = arith.addf %24, %25 : vector<226x31xf32>
    %c0_13 = arith.constant 0 : index
    %c0_14 = arith.constant 0 : index
    %27 = vector.load %arg5[%c0_13, %c0_14] : memref<31x16xf32, #tpu.memory_space<vmem>>, vector<31x16xf32>
    %cst_15 = arith.constant dense<0.000000e+00> : vector<226x16xf32>
    %28 = tpu.matmul %26, %27, %cst_15 {dimension_numbers = #tpu.dot_dimension_numbers<[1], [0], [0], [1], [0, 0, 1, 1], [], []>} : vector<226x31xf32>, vector<31x16xf32>, vector<226x16xf32> -> vector<226x16xf32>
    %c0_16 = arith.constant 0 : index
    %c0_17 = arith.constant 0 : index
    %29 = vector.load %arg6[%c0_16, %c0_17] : memref<1x16xf32, #tpu.memory_space<vmem>>, vector<1x16xf32>
    %30 = vector.broadcast %29 : vector<1x16xf32> to vector<226x16xf32>
    %31 = arith.addf %28, %30 : vector<226x16xf32>
    %32 = math.absf %31 : vector<226x16xf32>
    %c0_18 = arith.constant 0 : index
    %c0_19 = arith.constant 0 : index
    %33 = vector.load %arg18[%c0_18, %c0_19] : memref<226x16xf32, #tpu.memory_space<vmem>>, vector<226x16xf32>
    tpu.vector_store %arg18[%c0_18, %c0_19], %32 {strides = array<i32>} : memref<226x16xf32, #tpu.memory_space<vmem>>, vector<226x16xf32>,
    %c0_20 = arith.constant 0 : index
    %c0_21 = arith.constant 0 : index
    %34 = tpu.strided_load %arg18[%c0_20, %c0_21] {strides = array<i32: 2, 1>} : memref<226x16xf32, #tpu.memory_space<vmem>>, vector<113x16xf32>
    %c1 = arith.constant 1 : index
    %c0_22 = arith.constant 0 : index
    %35 = tpu.strided_load %arg18[%c1, %c0_22] {strides = array<i32: 2, 1>} : memref<226x16xf32, #tpu.memory_space<vmem>>, vector<113x16xf32>
    %36 = arith.maximumf %34, %35 : vector<113x16xf32>
    %cst_23 = arith.constant dense<0.000000e+00> : vector<16xf32>
    %37 = vector.multi_reduction <add>, %36, %cst_23 [0] : vector<113x16xf32> to vector<16xf32>
    %38 = vector.shape_cast %37 : vector<16xf32> to vector<1x16xf32>
    %cst_24 = arith.constant 1.130000e+02 : f32
    %39 = vector.broadcast %cst_24 : f32 to vector<1x16xf32>
    %40 = arith.divf %38, %39 : vector<1x16xf32>
    %41 = vector.broadcast %40 : vector<1x16xf32> to vector<113x16xf32>
    %42 = arith.subf %36, %41 : vector<113x16xf32>
    %43 = arith.mulf %42, %42 : vector<113x16xf32>
    %cst_25 = arith.constant dense<0.000000e+00> : vector<16xf32>
    %44 = vector.multi_reduction <add>, %43, %cst_25 [0] : vector<113x16xf32> to vector<16xf32>
    %45 = vector.shape_cast %44 : vector<16xf32> to vector<1x16xf32>
    %cst_26 = arith.constant 1.120000e+02 : f32
    %46 = vector.broadcast %cst_26 : f32 to vector<1x16xf32>
    %47 = arith.divf %45, %46 : vector<1x16xf32>
    %48 = math.sqrt %47 : vector<1x16xf32>
    %cst_27 = arith.constant 9.99999997E-7 : f32
    %49 = vector.broadcast %cst_27 : f32 to vector<1x16xf32>
    %50 = arith.addf %48, %49 : vector<1x16xf32>
    %51 = tpu.reciprocal %50 {approx = true} : vector<1x16xf32> -> vector<1x16xf32>
    %c0_28 = arith.constant 0 : index
    %c0_29 = arith.constant 0 : index
    %52 = vector.load %arg7[%c0_28, %c0_29] : memref<113x16xf32, #tpu.memory_space<vmem>>, vector<113x16xf32>
    %53 = vector.broadcast %51 : vector<1x16xf32> to vector<113x16xf32>
    %54 = arith.mulf %42, %53 : vector<113x16xf32>
    %55 = arith.mulf %52, %54 : vector<113x16xf32>
    %c0_30 = arith.constant 0 : index
    %c0_31 = arith.constant 0 : index
    %56 = vector.load %arg8[%c0_30, %c0_31] : memref<113x16xf32, #tpu.memory_space<vmem>>, vector<113x16xf32>
    %57 = arith.addf %55, %56 : vector<113x16xf32>
    %cst_32 = arith.constant 2.000000e-01 : f32
    %58 = vector.broadcast %cst_32 : f32 to vector<113x16xf32>
    %59 = arith.mulf %58, %57 : vector<113x16xf32>
    %60 = arith.maximumf %57, %59 : vector<113x16xf32>
    %cst_33 = arith.constant 0.000000e+00 : f32
    %61 = vector.broadcast %cst_33 : f32 to vector<109x16xf32>
    %62 = vector.extract_strided_slice %60 {offsets = [0, 0], sizes = [109, 16], strides = [1, 1]} : vector<113x16xf32> to vector<109x16xf32>
    %c0_34 = arith.constant 0 : index
    %c0_35 = arith.constant 0 : index
    %c0_36 = arith.constant 0 : index
    %63 = vector.load %arg9[%c0_34, %c0_35, %c0_36] : memref<5x16x16xf32, #tpu.memory_space<vmem>>, vector<1x16x16xf32>
    %64 = vector.shape_cast %63 : vector<1x16x16xf32> to vector<16x16xf32>
    %cst_37 = arith.constant dense<0.000000e+00> : vector<109x16xf32>
    %65 = tpu.matmul %62, %64, %cst_37 {dimension_numbers = #tpu.dot_dimension_numbers<[1], [0], [0], [1], [0, 0, 1, 1], [], []>} : vector<109x16xf32>, vector<16x16xf32>, vector<109x16xf32> -> vector<109x16xf32>
    %66 = arith.addf %61, %65 : vector<109x16xf32>
    %67 = vector.extract_strided_slice %60 {offsets = [1, 0], sizes = [109, 16], strides = [1, 1]} : vector<113x16xf32> to vector<109x16xf32>
    %c1_38 = arith.constant 1 : index
    %c0_39 = arith.constant 0 : index
    %c0_40 = arith.constant 0 : index
    %68 = vector.load %arg9[%c1_38, %c0_39, %c0_40] : memref<5x16x16xf32, #tpu.memory_space<vmem>>, vector<1x16x16xf32>
    %69 = vector.shape_cast %68 : vector<1x16x16xf32> to vector<16x16xf32>
    %cst_41 = arith.constant dense<0.000000e+00> : vector<109x16xf32>
    %70 = tpu.matmul %67, %69, %cst_41 {dimension_numbers = #tpu.dot_dimension_numbers<[1], [0], [0], [1], [0, 0, 1, 1], [], []>} : vector<109x16xf32>, vector<16x16xf32>, vector<109x16xf32> -> vector<109x16xf32>
    %71 = arith.addf %66, %70 : vector<109x16xf32>
    %72 = vector.extract_strided_slice %60 {offsets = [2, 0], sizes = [109, 16], strides = [1, 1]} : vector<113x16xf32> to vector<109x16xf32>
    %c2 = arith.constant 2 : index
    %c0_42 = arith.constant 0 : index
    %c0_43 = arith.constant 0 : index
    %73 = vector.load %arg9[%c2, %c0_42, %c0_43] : memref<5x16x16xf32, #tpu.memory_space<vmem>>, vector<1x16x16xf32>
    %74 = vector.shape_cast %73 : vector<1x16x16xf32> to vector<16x16xf32>
    %cst_44 = arith.constant dense<0.000000e+00> : vector<109x16xf32>
    %75 = tpu.matmul %72, %74, %cst_44 {dimension_numbers = #tpu.dot_dimension_numbers<[1], [0], [0], [1], [0, 0, 1, 1], [], []>} : vector<109x16xf32>, vector<16x16xf32>, vector<109x16xf32> -> vector<109x16xf32>
    %76 = arith.addf %71, %75 : vector<109x16xf32>
    %77 = vector.extract_strided_slice %60 {offsets = [3, 0], sizes = [109, 16], strides = [1, 1]} : vector<113x16xf32> to vector<109x16xf32>
    %c3 = arith.constant 3 : index
    %c0_45 = arith.constant 0 : index
    %c0_46 = arith.constant 0 : index
    %78 = vector.load %arg9[%c3, %c0_45, %c0_46] : memref<5x16x16xf32, #tpu.memory_space<vmem>>, vector<1x16x16xf32>
    %79 = vector.shape_cast %78 : vector<1x16x16xf32> to vector<16x16xf32>
    %cst_47 = arith.constant dense<0.000000e+00> : vector<109x16xf32>
    %80 = tpu.matmul %77, %79, %cst_47 {dimension_numbers = #tpu.dot_dimension_numbers<[1], [0], [0], [1], [0, 0, 1, 1], [], []>} : vector<109x16xf32>, vector<16x16xf32>, vector<109x16xf32> -> vector<109x16xf32>
    %81 = arith.addf %76, %80 : vector<109x16xf32>
    %82 = vector.extract_strided_slice %60 {offsets = [4, 0], sizes = [109, 16], strides = [1, 1]} : vector<113x16xf32> to vector<109x16xf32>
    %c4 = arith.constant 4 : index
    %c0_48 = arith.constant 0 : index
    %c0_49 = arith.constant 0 : index
    %83 = vector.load %arg9[%c4, %c0_48, %c0_49] : memref<5x16x16xf32, #tpu.memory_space<vmem>>, vector<1x16x16xf32>
    %84 = vector.shape_cast %83 : vector<1x16x16xf32> to vector<16x16xf32>
    %cst_50 = arith.constant dense<0.000000e+00> : vector<109x16xf32>
    %85 = tpu.matmul %82, %84, %cst_50 {dimension_numbers = #tpu.dot_dimension_numbers<[1], [0], [0], [1], [0, 0, 1, 1], [], []>} : vector<109x16xf32>, vector<16x16xf32>, vector<109x16xf32> -> vector<109x16xf32>
    %86 = arith.addf %81, %85 : vector<109x16xf32>
    %c0_51 = arith.constant 0 : index
    %c0_52 = arith.constant 0 : index
    %87 = vector.load %arg10[%c0_51, %c0_52] : memref<1x16xf32, #tpu.memory_space<vmem>>, vector<1x16xf32>
    %88 = vector.broadcast %87 : vector<1x16xf32> to vector<109x16xf32>
    %89 = arith.addf %86, %88 : vector<109x16xf32>
    %c0_53 = arith.constant 0 : index
    %c0_54 = arith.constant 0 : index
    %90 = vector.load %arg19[%c0_53, %c0_54] : memref<109x16xf32, #tpu.memory_space<vmem>>, vector<109x16xf32>
    tpu.vector_store %arg19[%c0_53, %c0_54], %89 {strides = array<i32>} : memref<109x16xf32, #tpu.memory_space<vmem>>, vector<109x16xf32>,
    %c0_55 = arith.constant 0 : index
    %c0_56 = arith.constant 0 : index
    %91 = tpu.strided_load %arg19[%c0_55, %c0_56] {strides = array<i32: 2, 1>} : memref<109x16xf32, #tpu.memory_space<vmem>>, vector<54x16xf32>
    %c1_57 = arith.constant 1 : index
    %c0_58 = arith.constant 0 : index
    %92 = tpu.strided_load %arg19[%c1_57, %c0_58] {strides = array<i32: 2, 1>} : memref<109x16xf32, #tpu.memory_space<vmem>>, vector<54x16xf32>
    %93 = arith.maximumf %91, %92 : vector<54x16xf32>
    %cst_59 = arith.constant dense<0.000000e+00> : vector<16xf32>
    %94 = vector.multi_reduction <add>, %93, %cst_59 [0] : vector<54x16xf32> to vector<16xf32>
    %95 = vector.shape_cast %94 : vector<16xf32> to vector<1x16xf32>
    %cst_60 = arith.constant 5.400000e+01 : f32
    %96 = vector.broadcast %cst_60 : f32 to vector<1x16xf32>
    %97 = arith.divf %95, %96 : vector<1x16xf32>
    %98 = vector.broadcast %97 : vector<1x16xf32> to vector<54x16xf32>
    %99 = arith.subf %93, %98 : vector<54x16xf32>
    %100 = arith.mulf %99, %99 : vector<54x16xf32>
    %cst_61 = arith.constant dense<0.000000e+00> : vector<16xf32>
    %101 = vector.multi_reduction <add>, %100, %cst_61 [0] : vector<54x16xf32> to vector<16xf32>
    %102 = vector.shape_cast %101 : vector<16xf32> to vector<1x16xf32>
    %cst_62 = arith.constant 5.300000e+01 : f32
    %103 = vector.broadcast %cst_62 : f32 to vector<1x16xf32>
    %104 = arith.divf %102, %103 : vector<1x16xf32>
    %105 = math.sqrt %104 : vector<1x16xf32>
    %cst_63 = arith.constant 9.99999997E-7 : f32
    %106 = vector.broadcast %cst_63 : f32 to vector<1x16xf32>
    %107 = arith.addf %105, %106 : vector<1x16xf32>
    %108 = tpu.reciprocal %107 {approx = true} : vector<1x16xf32> -> vector<1x16xf32>
    %c0_64 = arith.constant 0 : index
    %c0_65 = arith.constant 0 : index
    %109 = vector.load %arg11[%c0_64, %c0_65] : memref<54x16xf32, #tpu.memory_space<vmem>>, vector<54x16xf32>
    %110 = vector.broadcast %108 : vector<1x16xf32> to vector<54x16xf32>
    %111 = arith.mulf %99, %110 : vector<54x16xf32>
    %112 = arith.mulf %109, %111 : vector<54x16xf32>
    %c0_66 = arith.constant 0 : index
    %c0_67 = arith.constant 0 : index
    %113 = vector.load %arg12[%c0_66, %c0_67] : memref<54x16xf32, #tpu.memory_space<vmem>>, vector<54x16xf32>
    %114 = arith.addf %112, %113 : vector<54x16xf32>
    %cst_68 = arith.constant 2.000000e-01 : f32
    %115 = vector.broadcast %cst_68 : f32 to vector<54x16xf32>
    %116 = arith.mulf %115, %114 : vector<54x16xf32>
    %117 = arith.maximumf %114, %116 : vector<54x16xf32>
    %cst_69 = arith.constant 0.000000e+00 : f32
    %118 = vector.broadcast %cst_69 : f32 to vector<50x16xf32>
    %119 = vector.extract_strided_slice %117 {offsets = [0, 0], sizes = [50, 16], strides = [1, 1]} : vector<54x16xf32> to vector<50x16xf32>
    %c0_70 = arith.constant 0 : index
    %c0_71 = arith.constant 0 : index
    %c0_72 = arith.constant 0 : index
    %120 = vector.load %arg13[%c0_70, %c0_71, %c0_72] : memref<5x16x16xf32, #tpu.memory_space<vmem>>, vector<1x16x16xf32>
    %121 = vector.shape_cast %120 : vector<1x16x16xf32> to vector<16x16xf32>
    %cst_73 = arith.constant dense<0.000000e+00> : vector<50x16xf32>
    %122 = tpu.matmul %119, %121, %cst_73 {dimension_numbers = #tpu.dot_dimension_numbers<[1], [0], [0], [1], [0, 0, 1, 1], [], []>} : vector<50x16xf32>, vector<16x16xf32>, vector<50x16xf32> -> vector<50x16xf32>
    %123 = arith.addf %118, %122 : vector<50x16xf32>
    %124 = vector.extract_strided_slice %117 {offsets = [1, 0], sizes = [50, 16], strides = [1, 1]} : vector<54x16xf32> to vector<50x16xf32>
    %c1_74 = arith.constant 1 : index
    %c0_75 = arith.constant 0 : index
    %c0_76 = arith.constant 0 : index
    %125 = vector.load %arg13[%c1_74, %c0_75, %c0_76] : memref<5x16x16xf32, #tpu.memory_space<vmem>>, vector<1x16x16xf32>
    %126 = vector.shape_cast %125 : vector<1x16x16xf32> to vector<16x16xf32>
    %cst_77 = arith.constant dense<0.000000e+00> : vector<50x16xf32>
    %127 = tpu.matmul %124, %126, %cst_77 {dimension_numbers = #tpu.dot_dimension_numbers<[1], [0], [0], [1], [0, 0, 1, 1], [], []>} : vector<50x16xf32>, vector<16x16xf32>, vector<50x16xf32> -> vector<50x16xf32>
    %128 = arith.addf %123, %127 : vector<50x16xf32>
    %129 = vector.extract_strided_slice %117 {offsets = [2, 0], sizes = [50, 16], strides = [1, 1]} : vector<54x16xf32> to vector<50x16xf32>
    %c2_78 = arith.constant 2 : index
    %c0_79 = arith.constant 0 : index
    %c0_80 = arith.constant 0 : index
    %130 = vector.load %arg13[%c2_78, %c0_79, %c0_80] : memref<5x16x16xf32, #tpu.memory_space<vmem>>, vector<1x16x16xf32>
    %131 = vector.shape_cast %130 : vector<1x16x16xf32> to vector<16x16xf32>
    %cst_81 = arith.constant dense<0.000000e+00> : vector<50x16xf32>
    %132 = tpu.matmul %129, %131, %cst_81 {dimension_numbers = #tpu.dot_dimension_numbers<[1], [0], [0], [1], [0, 0, 1, 1], [], []>} : vector<50x16xf32>, vector<16x16xf32>, vector<50x16xf32> -> vector<50x16xf32>
    %133 = arith.addf %128, %132 : vector<50x16xf32>
    %134 = vector.extract_strided_slice %117 {offsets = [3, 0], sizes = [50, 16], strides = [1, 1]} : vector<54x16xf32> to vector<50x16xf32>
    %c3_82 = arith.constant 3 : index
    %c0_83 = arith.constant 0 : index
    %c0_84 = arith.constant 0 : index
    %135 = vector.load %arg13[%c3_82, %c0_83, %c0_84] : memref<5x16x16xf32, #tpu.memory_space<vmem>>, vector<1x16x16xf32>
    %136 = vector.shape_cast %135 : vector<1x16x16xf32> to vector<16x16xf32>
    %cst_85 = arith.constant dense<0.000000e+00> : vector<50x16xf32>
    %137 = tpu.matmul %134, %136, %cst_85 {dimension_numbers = #tpu.dot_dimension_numbers<[1], [0], [0], [1], [0, 0, 1, 1], [], []>} : vector<50x16xf32>, vector<16x16xf32>, vector<50x16xf32> -> vector<50x16xf32>
    %138 = arith.addf %133, %137 : vector<50x16xf32>
    %139 = vector.extract_strided_slice %117 {offsets = [4, 0], sizes = [50, 16], strides = [1, 1]} : vector<54x16xf32> to vector<50x16xf32>
    %c4_86 = arith.constant 4 : index
    %c0_87 = arith.constant 0 : index
    %c0_88 = arith.constant 0 : index
    %140 = vector.load %arg13[%c4_86, %c0_87, %c0_88] : memref<5x16x16xf32, #tpu.memory_space<vmem>>, vector<1x16x16xf32>
    %141 = vector.shape_cast %140 : vector<1x16x16xf32> to vector<16x16xf32>
    %cst_89 = arith.constant dense<0.000000e+00> : vector<50x16xf32>
    %142 = tpu.matmul %139, %141, %cst_89 {dimension_numbers = #tpu.dot_dimension_numbers<[1], [0], [0], [1], [0, 0, 1, 1], [], []>} : vector<50x16xf32>, vector<16x16xf32>, vector<50x16xf32> -> vector<50x16xf32>
    %143 = arith.addf %138, %142 : vector<50x16xf32>
    %c0_90 = arith.constant 0 : index
    %c0_91 = arith.constant 0 : index
    %144 = vector.load %arg14[%c0_90, %c0_91] : memref<1x16xf32, #tpu.memory_space<vmem>>, vector<1x16xf32>
    %145 = vector.broadcast %144 : vector<1x16xf32> to vector<50x16xf32>
    %146 = arith.addf %143, %145 : vector<50x16xf32>
    %c0_92 = arith.constant 0 : index
    %c0_93 = arith.constant 0 : index
    %147 = vector.load %arg20[%c0_92, %c0_93] : memref<50x16xf32, #tpu.memory_space<vmem>>, vector<50x16xf32>
    tpu.vector_store %arg20[%c0_92, %c0_93], %146 {strides = array<i32>} : memref<50x16xf32, #tpu.memory_space<vmem>>, vector<50x16xf32>,
    %c0_94 = arith.constant 0 : index
    %c0_95 = arith.constant 0 : index
    %148 = tpu.strided_load %arg20[%c0_94, %c0_95] {strides = array<i32: 2, 1>} : memref<50x16xf32, #tpu.memory_space<vmem>>, vector<25x16xf32>
    %c1_96 = arith.constant 1 : index
    %c0_97 = arith.constant 0 : index
    %149 = tpu.strided_load %arg20[%c1_96, %c0_97] {strides = array<i32: 2, 1>} : memref<50x16xf32, #tpu.memory_space<vmem>>, vector<25x16xf32>
    %150 = arith.maximumf %148, %149 : vector<25x16xf32>
    %cst_98 = arith.constant dense<0.000000e+00> : vector<16xf32>
    %151 = vector.multi_reduction <add>, %150, %cst_98 [0] : vector<25x16xf32> to vector<16xf32>
    %152 = vector.shape_cast %151 : vector<16xf32> to vector<1x16xf32>
    %cst_99 = arith.constant 2.500000e+01 : f32
    %153 = vector.broadcast %cst_99 : f32 to vector<1x16xf32>
    %154 = arith.divf %152, %153 : vector<1x16xf32>
    %155 = vector.broadcast %154 : vector<1x16xf32> to vector<25x16xf32>
    %156 = arith.subf %150, %155 : vector<25x16xf32>
    %157 = arith.mulf %156, %156 : vector<25x16xf32>
    %cst_100 = arith.constant dense<0.000000e+00> : vector<16xf32>
    %158 = vector.multi_reduction <add>, %157, %cst_100 [0] : vector<25x16xf32> to vector<16xf32>
    %159 = vector.shape_cast %158 : vector<16xf32> to vector<1x16xf32>
    %cst_101 = arith.constant 2.400000e+01 : f32
    %160 = vector.broadcast %cst_101 : f32 to vector<1x16xf32>
    %161 = arith.divf %159, %160 : vector<1x16xf32>
    %162 = math.sqrt %161 : vector<1x16xf32>
    %cst_102 = arith.constant 9.99999997E-7 : f32
    %163 = vector.broadcast %cst_102 : f32 to vector<1x16xf32>
    %164 = arith.addf %162, %163 : vector<1x16xf32>
    %165 = tpu.reciprocal %164 {approx = true} : vector<1x16xf32> -> vector<1x16xf32>
    %c0_103 = arith.constant 0 : index
    %c0_104 = arith.constant 0 : index
    %166 = vector.load %arg15[%c0_103, %c0_104] : memref<25x16xf32, #tpu.memory_space<vmem>>, vector<25x16xf32>
    %167 = vector.broadcast %165 : vector<1x16xf32> to vector<25x16xf32>
    %168 = arith.mulf %156, %167 : vector<25x16xf32>
    %169 = arith.mulf %166, %168 : vector<25x16xf32>
    %c0_105 = arith.constant 0 : index
    %c0_106 = arith.constant 0 : index
    %170 = vector.load %arg16[%c0_105, %c0_106] : memref<25x16xf32, #tpu.memory_space<vmem>>, vector<25x16xf32>
    %171 = arith.addf %169, %170 : vector<25x16xf32>
    %cst_107 = arith.constant 2.000000e-01 : f32
    %172 = vector.broadcast %cst_107 : f32 to vector<25x16xf32>
    %173 = arith.mulf %172, %171 : vector<25x16xf32>
    %174 = arith.maximumf %171, %173 : vector<25x16xf32>
    %c0_108 = arith.constant 0 : index
    %c0_109 = arith.constant 0 : index
    %c0_110 = arith.constant 0 : index
    %175 = vector.load %arg17[%c0_108, %c0_109, %c0_110] : memref<1x25x16xf32, #tpu.memory_space<vmem>>, vector<1x25x16xf32>
    %176 = vector.shape_cast %175 : vector<1x25x16xf32> to vector<25x16xf32>
    %177 = vector.shape_cast %174 : vector<25x16xf32> to vector<1x25x16xf32>
    tpu.vector_store %arg17[%c0_108, %c0_109, %c0_110], %177 {strides = array<i32>} : memref<1x25x16xf32, #tpu.memory_space<vmem>>, vector<1x25x16xf32>,
    return
  }
  func.func @transform_0(%arg0: i32) -> (i32, i32, i32) {
    %c0_i32 = arith.constant 0 : i32
    %c0_i32_0 = arith.constant 0 : i32
    %c0_i32_1 = arith.constant 0 : i32
    return %arg0, %c0_i32, %c0_i32_0 : i32, i32, i32
  }
  func.func @transform_1(%arg0: i32) -> (i32, i32, i32) {
    %c0_i32 = arith.constant 0 : i32
    %c0_i32_0 = arith.constant 0 : i32
    %c0_i32_1 = arith.constant 0 : i32
    return %arg0, %c0_i32, %c0_i32_0 : i32, i32, i32
  }
  func.func @transform_2(%arg0: i32) -> (i32, i32) {
    %c0_i32 = arith.constant 0 : i32
    %c0_i32_0 = arith.constant 0 : i32
    %c0_i32_1 = arith.constant 0 : i32
    return %c0_i32, %c0_i32_0 : i32, i32
  }
  func.func @transform_3(%arg0: i32) -> (i32, i32) {
    %c0_i32 = arith.constant 0 : i32
    %c0_i32_0 = arith.constant 0 : i32
    %c0_i32_1 = arith.constant 0 : i32
    return %c0_i32, %c0_i32_0 : i32, i32
  }
  func.func @transform_4(%arg0: i32) -> (i32, i32) {
    %c0_i32 = arith.constant 0 : i32
    %c0_i32_0 = arith.constant 0 : i32
    %c0_i32_1 = arith.constant 0 : i32
    return %c0_i32, %c0_i32_0 : i32, i32
  }
  func.func @transform_5(%arg0: i32) -> (i32, i32) {
    %c0_i32 = arith.constant 0 : i32
    %c0_i32_0 = arith.constant 0 : i32
    %c0_i32_1 = arith.constant 0 : i32
    return %c0_i32, %c0_i32_0 : i32, i32
  }
  func.func @transform_6(%arg0: i32) -> (i32, i32) {
    %c0_i32 = arith.constant 0 : i32
    %c0_i32_0 = arith.constant 0 : i32
    %c0_i32_1 = arith.constant 0 : i32
    return %c0_i32, %c0_i32_0 : i32, i32
  }
  func.func @transform_7(%arg0: i32) -> (i32, i32) {
    %c0_i32 = arith.constant 0 : i32
    %c0_i32_0 = arith.constant 0 : i32
    %c0_i32_1 = arith.constant 0 : i32
    return %c0_i32, %c0_i32_0 : i32, i32
  }
  func.func @transform_8(%arg0: i32) -> (i32, i32, i32) {
    %c0_i32 = arith.constant 0 : i32
    %c0_i32_0 = arith.constant 0 : i32
    %c0_i32_1 = arith.constant 0 : i32
    %c0_i32_2 = arith.constant 0 : i32
    return %c0_i32, %c0_i32_0, %c0_i32_1 : i32, i32, i32
  }
  func.func @transform_9(%arg0: i32) -> (i32, i32) {
    %c0_i32 = arith.constant 0 : i32
    %c0_i32_0 = arith.constant 0 : i32
    %c0_i32_1 = arith.constant 0 : i32
    return %c0_i32, %c0_i32_0 : i32, i32
  }
  func.func @transform_10(%arg0: i32) -> (i32, i32) {
    %c0_i32 = arith.constant 0 : i32
    %c0_i32_0 = arith.constant 0 : i32
    %c0_i32_1 = arith.constant 0 : i32
    return %c0_i32, %c0_i32_0 : i32, i32
  }
  func.func @transform_11(%arg0: i32) -> (i32, i32) {
    %c0_i32 = arith.constant 0 : i32
    %c0_i32_0 = arith.constant 0 : i32
    %c0_i32_1 = arith.constant 0 : i32
    return %c0_i32, %c0_i32_0 : i32, i32
  }
  func.func @transform_12(%arg0: i32) -> (i32, i32, i32) {
    %c0_i32 = arith.constant 0 : i32
    %c0_i32_0 = arith.constant 0 : i32
    %c0_i32_1 = arith.constant 0 : i32
    %c0_i32_2 = arith.constant 0 : i32
    return %c0_i32, %c0_i32_0, %c0_i32_1 : i32, i32, i32
  }
  func.func @transform_13(%arg0: i32) -> (i32, i32) {
    %c0_i32 = arith.constant 0 : i32
    %c0_i32_0 = arith.constant 0 : i32
    %c0_i32_1 = arith.constant 0 : i32
    return %c0_i32, %c0_i32_0 : i32, i32
  }
  func.func @transform_14(%arg0: i32) -> (i32, i32) {
    %c0_i32 = arith.constant 0 : i32
    %c0_i32_0 = arith.constant 0 : i32
    %c0_i32_1 = arith.constant 0 : i32
    return %c0_i32, %c0_i32_0 : i32, i32
  }
  func.func @transform_15(%arg0: i32) -> (i32, i32) {
    %c0_i32 = arith.constant 0 : i32
    %c0_i32_0 = arith.constant 0 : i32
    %c0_i32_1 = arith.constant 0 : i32
    return %c0_i32, %c0_i32_0 : i32, i32
  }
  func.func @transform_16(%arg0: i32) -> (i32, i32, i32) {
    %c0_i32 = arith.constant 0 : i32
    %c0_i32_0 = arith.constant 0 : i32
    %c0_i32_1 = arith.constant 0 : i32
    return %arg0, %c0_i32, %c0_i32_0 : i32, i32, i32
  }
}

</mosaic_0001>

<bundles_post_ra>
// kernel: tpu_custom_call.1
= control target key start
LH: loop header
LB: loop body
LE: loop exit
PB: predicated region body
PF: predicated region fallthrough
CT: control target
= control target key end

     0   :  { %s4400_s21 = smov 0   ;;  %s6061_s0 = inlined_call_operand.vmem [shape: f32[2,1,256], index: 0, kind: input, shape index: {}]   ;;  %s6062_s1 = inlined_call_operand.vmem [shape: f32[2,226,31], index: 1, kind: input, shape index: {}]   ;;  %s6063_s2 = inlined_call_operand.vmem [shape: f32[226,31], index: 2, kind: input, shape index: {}]   ;;  %s6064_s3 = inlined_call_operand.vmem [shape: f32[226,31], index: 3, kind: input, shape index: {}]   ;;  %s6065_s4 = inlined_call_operand.vmem [shape: f32[31,16], index: 4, kind: input, shape index: {}]   ;;  %s6066_s5 = inlined_call_operand.vmem [shape: f32[1,16], index: 5, kind: input, shape index: {}]   ;;  %s6067_s6 = inlined_call_operand.vmem [shape: f32[113,16], index: 6, kind: input, shape index: {}]   ;;  %s6068_s7 = inlined_call_operand.vmem [shape: f32[113,16], index: 7, kind: input, shape index: {}]   ;;  %s6069_s8 = inlined_call_operand.vmem [shape: f32[5,16,16], index: 8, kind: input, shape index: {}]   ;;  %s6070_s9 = inlined_call_operand.vmem [shape: f32[1,16], index: 9, kind: input, shape index: {}]   ;;  %s6071_s10 = inlined_call_operand.vmem [shape: f32[54,16], index: 10, kind: input, shape index: {}]   ;;  %s6072_s11 = inlined_call_operand.vmem [shape: f32[54,16], index: 11, kind: input, shape index: {}]   ;;  %s6073_s12 = inlined_call_operand.vmem [shape: f32[5,16,16], index: 12, kind: input, shape index: {}]   ;;  %s6074_s13 = inlined_call_operand.vmem [shape: f32[1,16], index: 13, kind: input, shape index: {}]   ;;  %s6075_s14 = inlined_call_operand.vmem [shape: f32[25,16], index: 14, kind: input, shape index: {}]   ;;  %s6076_s15 = inlined_call_operand.vmem [shape: f32[25,16], index: 15, kind: input, shape index: {}]   ;;  %s6077_s16 = inlined_call_operand.vmem [shape: f32[2,25,16], index: 16, kind: output, shape index: {}]  }
   0x1   :  { %6078 = sst [smem:[#allocation5_spill]] %s6061_s0 }
   0x2 LB: > { %s3505_s22 = sadd.s32 4294967295, %s4309_s21   ;;  %p3509_p0 = scmp.ge.s32.totalorder %s4309_s21, 1  ;;  %s4309_s21 = sphi %s4400_s21, %s26_s21  }
   0x3   : > { %p471_p1 = scmp.lt.s32.totalorder %s4309_s21, 3 }
   0x5   : > { %p472_p2 = pnand %p3509_p0, %p471_p1 }
   0x6   : > { %p525_p3 = scmp.lt.s32.totalorder (!%p472_p2), %s3505_s22, 1  ;;  %v541_v0 = vlaneseq (!%p472_p2)  ;;  %s6079_s26 = sld [smem:[#allocation5_spill]] (!%p472_p2)  ;;  %vm551_vm0 = vcmask (!%p472_p2), 1040384   ;;  %v4311_v55 = vmov (!%p472_p2), 0.0|0.0   ;;  %v807_v54 = vld [vmem:[%s6065_s4 + $0x10] sm:$0xff] (!%p472_p2)  ;;  %vm904_vm1 = vcmask (!%p472_p2), 1046528  }
   0x7   : > { %475 = sbr.rel (%p472_p2) target bundleno = 1637 (0x665), region = 84  ;;  %4174 = vmatprep.subr.bf16.mxu0 (!%p472_p2), %v4311_v55  ;;  %vm4312_vm2 = vmmov (!%p472_p2), 1   ;;  %vm4313_vm4 = vmmov (!%p472_p2), 0   ;;  %vm816_vm7 = vcmask (!%p472_p2), 252928   ;;  %vm1147_vm8 = vcmask (!%p472_p2), 130048  }
   0x8   : > { %v542_v1 = vshrl.u32 (!%p472_p2), %v541_v0, 7  ;;  %vm4179_vm3 = vmpackc.low (!%p472_p2), %vm904_vm1, %vm4312_vm2  ;;  %vm1176_vm9 = vcmask (!%p472_p2), 123904   ;;  %vm1279_vm10 = vcmask (!%p472_p2), 122880   ;;  %vm2054_vm13 = vcmask (!%p472_p2), 1044480  }
   0x9   : > { %vm2263_vm14 = vcmask (!%p472_p2), 1043456   ;;  %vm1846_vm15 = vcmask (!%p472_p2), 1045504   ;;  %vm2551_vm2 = vcmask (!%p472_p2), 128000  }
   0xa   : > { %v4411_v2 = vsub.s32 (!%p472_p2), 0, %v542_v1  ;;  %v547_v3 = vsub.s32 (!%p472_p2), 1, %v542_v1 }
   0xe   : > { %s6090_s22 = smov (!%p525_p3, %s3505_s22), 1 }
   0xf   : > { %s3510_s23 = sshll.u32 %s6090_s22, 1  ;;  %s4274_s28 = smul.u32 232, %s6090_s22 }
  0x10   : > { %s528_s27 = scalar_lea.vmem %s6079_s26, %s3510_s23  ;;  %s3670_s18 = sshll.u32 %s6090_s22, 5 }
  0x11   : > { %v539_v4 = vld [vmem:[%s528_s27] sm:$0x3]  ;;  %s4423_s0 = scalar_lea.vmem %s6062_s1, %s4274_s28  ;;  %s538_s23 = scalar_lea.vmem %s6077_s16, %s3670_s18 }
  0x12   : > { %v544_v5 = vrot.slane %v539_v4, %v4411_v2  ;;  %v548_v6 = vrot.slane %v539_v4, %v547_v3  ;;  %v4426_v12 = vld [vmem:[%s4423_s0] sm:$0xff]  ;;  %v4429_v13 = vld [vmem:[%s4423_s0 + $0x8] sm:$0xff]  ;;  %v4432_v14 = vld [vmem:[%s4423_s0 + $0x10] sm:$0xff] }
  0x13   : > { %v4435_v15 = vld [vmem:[%s4423_s0 + $0x18] sm:$0xff]  ;;  %v4438_v16 = vld [vmem:[%s4423_s0 + $0x20] sm:$0xff]  ;;  %v4444_v18 = vld [vmem:[%s4423_s0 + $0x28] sm:$0xff] }
  0x14   : > { %v552_v7 = vsel %vm551_vm0, %v544_v5, 0.0  ;;  %v553_v8 = vsel %vm551_vm0, %v548_v6, 0.0  ;;  %v4447_v19 = vld [vmem:[%s4423_s0 + $0x30] sm:$0xff]  ;;  %v4450_v20 = vld [vmem:[%s4423_s0 + $0x38] sm:$0xff]  ;;  %v4453_v21 = vld [vmem:[%s4423_s0 + $0x40] sm:$0xff] }
  0x15   : > { %v554_v9 = vadd.f32 %v553_v8, %v552_v7  ;;  %v4456_v22 = vld [vmem:[%s4423_s0 + $0x48] sm:$0xff]  ;;  %v4459_v23 = vld [vmem:[%s4423_s0 + $0x50] sm:$0xff]  ;;  %v4469_v28 = vld [vmem:[%s4423_s0 + $0x58] sm:$0xff] }
  0x16   : > { %v4472_v29 = vld [vmem:[%s4423_s0 + $0x60] sm:$0xff]  ;;  %v4475_v30 = vld [vmem:[%s4423_s0 + $0x68] sm:$0xff]  ;;  %v4486_v35 = vld [vmem:[%s4423_s0 + $0x70] sm:$0xff] }
  0x17   : > { %555 = vadd.xlane.f32.xlu0 %v554_v9  ;;  %v4489_v36 = vld [vmem:[%s4423_s0 + $0x78] sm:$0xff]  ;;  %v4492_v37 = vld [vmem:[%s4423_s0 + $0x80] sm:$0xff]  ;;  %v4501_v42 = vld [vmem:[%s4423_s0 + $0x88] sm:$0xff] }
  0x18   : > { %v4504_v43 = vld [vmem:[%s4423_s0 + $0x90] sm:$0xff]  ;;  %v4507_v44 = vld [vmem:[%s4423_s0 + $0x98] sm:$0xff]  ;;  %v4518_v49 = vld [vmem:[%s4423_s0 + $0xa0] sm:$0xff] }
  0x19   : > { %v4521_v50 = vld [vmem:[%s4423_s0 + $0xa8] sm:$0xff]  ;;  %v4524_v51 = vld [vmem:[%s4423_s0 + $0xb0] sm:$0xff]  ;;  %v4532_v56 = vld [vmem:[%s4423_s0 + $0xb8] sm:$0xff] }
  0x1a   : > { %v4535_v57 = vld [vmem:[%s4423_s0 + $0xc0] sm:$0xff]  ;;  %v4538_v58 = vld [vmem:[%s4423_s0 + $0xc8] sm:$0xff]  ;;  %v4549_v63 = vld [vmem:[%s4423_s0 + $0xd0] sm:$0xff] }
  0x1b   : > { %v4552_v0 = vld [vmem:[%s4423_s0 + $0xd8] sm:$0xff]  ;;  %v4555_v1 = vld [vmem:[%s4423_s0 + $0xe0] sm:$0x3] }
  0xa4   : > { %v556_v10 = vpop.xlane.xlu0 %555 }
  0xa5   : > { %v558_v11 = vmul.f32 0.00390625, %v556_v10 }
  0xa7   : > { %v4441_v17 = vrot.slane %v558_v11, %v4411_v2 }
  0xa9   : > { %v565_v24 = vsub.f32 %v539_v4, %v4441_v17  ;;  %v656_v25 = vsub.f32 %v4426_v12, %v4441_v17  ;;  %v657_v26 = vsub.f32 %v4429_v13, %v4441_v17  ;;  %v658_v27 = vsub.f32 %v4432_v14, %v4441_v17  ;;  %v596_v13 = vld [vmem:[%s6063_s2 + $0x10] sm:$0xff] }
  0xaa   : > { %v659_v31 = vsub.f32 %v4435_v15, %v4441_v17  ;;  %v660_v32 = vsub.f32 %v4438_v16, %v4441_v17  ;;  %v661_v33 = vsub.f32 %v4444_v18, %v4441_v17  ;;  %v662_v34 = vsub.f32 %v4447_v19, %v4441_v17 }
  0xab   : > { %v566_v38 = vmul.f32 %v565_v24, %v565_v24  ;;  %v672_v59 = vsub.f32 %v4492_v37, %v4441_v17  ;;  %v673_v60 = vsub.f32 %v4501_v42, %v4441_v17  ;;  %v674_v61 = vsub.f32 %v4504_v43, %v4441_v17  ;;  %v598_v37 = vld [vmem:[%s6063_s2 + $0x20] sm:$0xff] }
  0xac   : > { %v675_v62 = vsub.f32 %v4507_v44, %v4441_v17  ;;  %v676_v5 = vsub.f32 %v4518_v49, %v4441_v17  ;;  %v677_v6 = vsub.f32 %v4521_v50, %v4441_v17  ;;  %v678_v8 = vsub.f32 %v4524_v51, %v4441_v17 }
  0xad   : > { %v571_v52 = vrot.slane %v566_v38, %v4411_v2  ;;  %v575_v53 = vrot.slane %v566_v38, %v547_v3  ;;  %v679_v9 = vsub.f32 %v4532_v56, %v4441_v17  ;;  %v680_v10 = vsub.f32 %v4535_v57, %v4441_v17  ;;  %v599_v56 = vld [vmem:[%s6063_s2 + $0x28] sm:$0xff] }
  0xae   : > { %v681_v11 = vsub.f32 %v4538_v58, %v4441_v17  ;;  %v682_v24 = vsub.f32 %v4549_v63, %v4441_v17  ;;  %v683_v38 = vsub.f32 %v4552_v0, %v4441_v17  ;;  %v752_v0 = vld [vmem:[%s6064_s3 + $0x28] sm:$0xff]  ;;  %v6080_v19 = vsub.f32 %v4450_v20, %v4441_v17 }
  0xaf   : > { %v578_v3 = vsel %vm551_vm0, %v571_v52, 0.0  ;;  %v579_v4 = vsel %vm551_vm0, %v575_v53, 0.0  ;;  %v684_v52 = vsub.f32 %v4555_v1, %v4441_v17  ;;  %v805_v53 = vld [vmem:[%s6065_s4] sm:$0xff]  ;;  %v6081_v20 = vsub.f32 %v4453_v21, %v4441_v17 }
  0xb0   : > { %v580_v7 = vadd.f32 %v579_v4, %v578_v3  ;;  %v806_v3 = vld [vmem:[%s6065_s4 + $0x8] sm:$0xff]  ;;  %v6082_v21 = vsub.f32 %v4456_v22, %v4441_v17  ;;  %v6083_v22 = vsub.f32 %v4459_v23, %v4441_v17  ;;  %v6084_v23 = vsub.f32 %v4469_v28, %v4441_v17 }
  0xb1   : > { %v4175_v4 = vpack.c.bf16 %v806_v3, %v805_v53  ;;  %v4314_v53 = vmov 0.0   ;;  %v6085_v28 = vsub.f32 %v4472_v29, %v4441_v17  ;;  %v6086_v29 = vsub.f32 %v4475_v30, %v4441_v17 }
  0xb2   : > { %581 = vadd.xlane.f32.xlu0 %v580_v7  ;;  %v808_v7 = vld [vmem:[%s6065_s4 + $0x18] sm:$0x7f]  ;;  %3837 = vmatprep.mubr.msk.f32.mxu0 %vm4313_vm4, %v4314_v53  ;;  %v6087_v30 = vsub.f32 %v4486_v35, %v4441_v17  ;;  %v6088_v35 = vsub.f32 %v4489_v36, %v4441_v17  ;;  %v610_v36 = vld [vmem:[%s6063_s2 + $0x80] sm:$0xff]  ;;  %vm2504_vm0 = vcmask 126976  }
  0xb3   : > { %4176 = vmatpush3.bf16.msra.mxu0 %v4175_v4  ;;  %v4178_v48 = vpack.c.bf16 %v808_v7, %v807_v54  ;;  %v762_v17 = vld [vmem:[%s6064_s3 + $0x78] sm:$0xff] }
  0xb4   : > { %4177 = vmatprep.subr.bf16.mxu0 %v4311_v55 }
  0xb7   : > { %4180 = vmatpush3.bf16.msk.msra.mxu0 %vm4179_vm3, %v4178_v48  ;;  %v594_v48 = vld [vmem:[%s6063_s2] sm:$0xff] }
  0xb8   : > { %4201 = vmatprep.subr.bf16.mxu0 %v4311_v55 }
 0x13f   : > { %v582_v3 = vpop.xlane.xlu0 %581 }
 0x140   : > { %v584_v47 = vmul.f32 0.003921569, %v582_v3 }
 0x142   : > { %4287 = vrsqrt.f32 %v584_v47  ;;  %vm587_vm5 = vcmp.eq.f32.partialorder %v584_v47, inf  ;;  %v590_v54 = vand.u32 2147483648, %v584_v47  ;;  %vm589_vm6 = vcmp.eq.f32.partialorder %v584_v47, 0.0 }
 0x14c   : > { %v4288_v46 = vpop.eup %4287 }
 0x14d   : > { %v586_v45 = vmul.f32 %v4288_v46, %v584_v47 }
 0x14f   : > { %v588_v4 = vsel %vm587_vm5, %v584_v47, %v586_v45 }
 0x150   : > { %v591_v7 = vsel %vm589_vm6, %v590_v54, %v588_v4  ;;  %v749_v54 = vld [vmem:[%s6064_s3 + $0x10] sm:$0xff]  ;;  %v597_v4 = vld [vmem:[%s6063_s2 + $0x18] sm:$0xff] }
 0x151   : > { %v592_v41 = vadd.f32 1e-06, %v591_v7 }
 0x153   : > { %4289 = vrcp.f32 %v592_v41  ;;  %v747_v41 = vld [vmem:[%s6064_s3] sm:$0xff] }
 0x15d   : > { %v4290_v40 = vpop.eup %4289 }
 0x15e   : > { %v4596_v39 = vrot.slane %v4290_v40, %v4411_v2  ;;  %v595_v2 = vld [vmem:[%s6063_s2 + $0x8] sm:$0xff] }
 0x160   : > { %v689_v46 = vmul.f32 %v4596_v39, %v656_v25  ;;  %v690_v45 = vmul.f32 %v4596_v39, %v657_v26  ;;  %v691_v12 = vmul.f32 %v4596_v39, %v658_v27  ;;  %v748_v26 = vld [vmem:[%s6064_s3 + $0x8] sm:$0xff]  ;;  %v692_v14 = vmul.f32 %v4596_v39, %v659_v31 }
 0x161   : > { %v693_v15 = vmul.f32 %v4596_v39, %v660_v32  ;;  %v4649_v31 = vmul.f32 %v4596_v39, %v672_v59  ;;  %v4667_v16 = vmul.f32 %v4596_v39, %v675_v62  ;;  %v750_v32 = vld [vmem:[%s6064_s3 + $0x18] sm:$0xff]  ;;  %v4679_v42 = vmul.f32 %v4596_v39, %v676_v5 }
 0x162   : > { %v718_v40 = vmul.f32 %v689_v46, %v594_v48  ;;  %v719_v47 = vmul.f32 %v690_v45, %v595_v2  ;;  %v720_v3 = vmul.f32 %v691_v12, %v596_v13  ;;  %v721_v48 = vmul.f32 %v692_v14, %v597_v4  ;;  %v756_v14 = vld [vmem:[%s6064_s3 + $0x48] sm:$0xff] }
 0x163   : > { %v4655_v46 = vmul.f32 %v4596_v39, %v673_v60  ;;  %v4661_v45 = vmul.f32 %v4596_v39, %v674_v61  ;;  %v4685_v43 = vmul.f32 %v4596_v39, %v677_v6  ;;  %v4691_v44 = vmul.f32 %v4596_v39, %v678_v8  ;;  %v751_v60 = vld [vmem:[%s6064_s3 + $0x20] sm:$0xff]  ;;  %v600_v6 = vld [vmem:[%s6063_s2 + $0x30] sm:$0xff] }
 0x164   : > { %v776_v25 = vadd.f32 %v747_v41, %v718_v40  ;;  %v777_v27 = vadd.f32 %v748_v26, %v719_v47  ;;  %v778_v7 = vadd.f32 %v749_v54, %v720_v3  ;;  %v4697_v49 = vmul.f32 %v4596_v39, %v679_v9  ;;  %v753_v9 = vld [vmem:[%s6064_s3 + $0x30] sm:$0xff]  ;;  %v602_v41 = vld [vmem:[%s6063_s2 + $0x40] sm:$0xff]  ;;  %v603_v47 = vld [vmem:[%s6063_s2 + $0x48] sm:$0xff] }
 0x165   : > { %v779_v50 = vadd.f32 %v750_v32, %v721_v48  ;;  %v722_v59 = vmul.f32 %v693_v15, %v598_v37  ;;  %v694_v51 = vmul.f32 %v4596_v39, %v661_v33  ;;  %v4717_v61 = vmul.f32 %v4596_v39, %v680_v10  ;;  %v601_v10 = vld [vmem:[%s6063_s2 + $0x38] sm:$0xff]  ;;  %v757_v48 = vld [vmem:[%s6064_s3 + $0x50] sm:$0xff] }
 0x166   : > { %3838 = vmatmul.mubr.msk.f32.vlgmr.msra.gmra.mrb[0].mxu0 %vm816_vm7, %v776_v25  ;;  %v4723_v18 = vmul.f32 %v4596_v39, %v681_v11  ;;  %v4729_v33 = vmul.f32 %v4596_v39, %v682_v24  ;;  %v4735_v57 = vmul.f32 %v4596_v39, %v683_v38  ;;  %v4743_v58 = vmul.f32 %v4596_v39, %v684_v52  ;;  %v754_v52 = vld [vmem:[%s6064_s3 + $0x38] sm:$0xff]  ;;  %v755_v25 = vld [vmem:[%s6064_s3 + $0x40] sm:$0xff] }
 0x167   : > { %3840 = vmatprep.mubr.msk.f32.mxu0 %vm4313_vm4, %v4314_v53  ;;  %v780_v62 = vadd.f32 %v751_v60, %v722_v59  ;;  %v723_v63 = vmul.f32 %v694_v51, %v599_v56  ;;  %v695_v5 = vmul.f32 %v4596_v39, %v662_v34  ;;  %v696_v34 = vmul.f32 %v4596_v39, %v6080_v19  ;;  %v605_v15 = vld [vmem:[%s6063_s2 + $0x58] sm:$0xff]  ;;  %v606_v51 = vld [vmem:[%s6063_s2 + $0x60] sm:$0xff]  ;;  %v608_v19 = vld [vmem:[%s6063_s2 + $0x70] sm:$0xff] }
 0x168   : > { %v697_v38 = vmul.f32 %v4596_v39, %v6081_v20  ;;  %v698_v12 = vmul.f32 %v4596_v39, %v6082_v21  ;;  %v699_v3 = vmul.f32 %v4596_v39, %v6083_v22  ;;  %v758_v59 = vld [vmem:[%s6064_s3 + $0x58] sm:$0xff] }
 0x169   : > { %v781_v1 = vadd.f32 %v752_v0, %v723_v63  ;;  %v724_v8 = vmul.f32 %v695_v5, %v600_v6  ;;  %v725_v24 = vmul.f32 %v696_v34, %v601_v10  ;;  %v759_v63 = vld [vmem:[%s6064_s3 + $0x60] sm:$0xff]  ;;  %v607_v5 = vld [vmem:[%s6063_s2 + $0x68] sm:$0xff]  ;;  %v704_v10 = vmul.f32 %v4596_v39, %v6088_v35  ;;  %v3546_v35 = vld [vmem:[%s6069_s8 + $0x18] sm:$0xff] }
 0x16a   : > { %3841 = vmatmul.mubr.msk.f32.gmra.mrb[2].mxu0 %vm816_vm7, %v777_v27  ;;  %v726_v40 = vmul.f32 %v697_v38, %v602_v41  ;;  %v727_v26 = vmul.f32 %v698_v12, %v603_v47  ;;  %v604_v27 = vld [vmem:[%s6063_s2 + $0x50] sm:$0xff]  ;;  %v763_v41 = vld [vmem:[%s6064_s3 + $0x80] sm:$0xff] }
 0x16b   : > { %3843 = vmatprep.mubr.msk.f32.mxu0 %vm4313_vm4, %v4314_v53  ;;  %v782_v11 = vadd.f32 %v753_v9, %v724_v8  ;;  %v783_v2 = vadd.f32 %v754_v52, %v725_v24  ;;  %v728_v4 = vmul.f32 %v699_v3, %v604_v27  ;;  %v760_v8 = vld [vmem:[%s6064_s3 + $0x68] sm:$0xff]  ;;  %v609_v24 = vld [vmem:[%s6063_s2 + $0x78] sm:$0xff]  ;;  %v734_v52 = vmul.f32 %v4649_v31, %v610_v36  ;;  %v612_v12 = vld [vmem:[%s6063_s2 + $0x90] sm:$0xff] }
 0x16c   : > { %v784_v13 = vadd.f32 %v755_v25, %v726_v40  ;;  %v785_v54 = vadd.f32 %v756_v14, %v727_v26  ;;  %v733_v38 = vmul.f32 %v704_v10, %v609_v24  ;;  %v764_v31 = vld [vmem:[%s6064_s3 + $0x88] sm:$0xff]  ;;  %v736_v47 = vmul.f32 %v4661_v45, %v612_v12  ;;  %v766_v45 = vld [vmem:[%s6064_s3 + $0x98] sm:$0xff]  ;;  %v614_v3 = vld [vmem:[%s6063_s2 + $0xa0] sm:$0xff] }
 0x16d   : > { %v786_v32 = vadd.f32 %v757_v48, %v728_v4  ;;  %v792_v40 = vadd.f32 %v763_v41, %v734_v52  ;;  %v738_v27 = vmul.f32 %v4679_v42, %v614_v3  ;;  %v768_v42 = vld [vmem:[%s6064_s3 + $0xa8] sm:$0xff] }
 0x16e   : > { %3844 = vmatmul.mubr.msk.f32.gmra.mrb[4].mxu0 %vm816_vm7, %v778_v7  ;;  %v700_v7 = vmul.f32 %v4596_v39, %v6084_v23 }
 0x16f   : > { %3846 = vmatprep.mubr.msk.f32.mxu0 %vm4313_vm4, %v4314_v53 }
 0x170   : > { %v729_v37 = vmul.f32 %v700_v7, %v605_v15  ;;  %v616_v7 = vld [vmem:[%s6063_s2 + $0xb0] sm:$0xff] }
 0x171   : > { %v740_v15 = vmul.f32 %v4691_v44, %v616_v7  ;;  %v770_v44 = vld [vmem:[%s6064_s3 + $0xb8] sm:$0xff] }
 0x172   : > { %3847 = vmatmul.mubr.msk.f32.gmra.mrb[6].mxu0 %vm816_vm7, %v779_v50  ;;  %v701_v50 = vmul.f32 %v4596_v39, %v6085_v28  ;;  %v787_v60 = vadd.f32 %v758_v59, %v729_v37 }
 0x173   : > { %3849 = vmatprep.mubr.msk.f32.mxu0 %vm4313_vm4, %v4314_v53 }
 0x174   : > { %v730_v56 = vmul.f32 %v701_v50, %v606_v51  ;;  %v618_v50 = vld [vmem:[%s6063_s2 + $0xc0] sm:$0xff] }
 0x175   : > { %v742_v51 = vmul.f32 %v4717_v61, %v618_v50  ;;  %v772_v61 = vld [vmem:[%s6064_s3 + $0xc8] sm:$0xff] }
 0x176   : > { %3850 = vmatmul.mubr.msk.f32.gmra.mrb[8].mxu0 %vm816_vm7, %v780_v62  ;;  %v702_v62 = vmul.f32 %v4596_v39, %v6086_v29  ;;  %v788_v0 = vadd.f32 %v759_v63, %v730_v56 }
 0x177   : > { %3852 = vmatprep.mubr.msk.f32.mxu0 %vm4313_vm4, %v4314_v53 }
 0x178   : > { %v731_v6 = vmul.f32 %v702_v62, %v607_v5  ;;  %v620_v62 = vld [vmem:[%s6063_s2 + $0xd0] sm:$0xff] }
 0x179   : > { %v744_v5 = vmul.f32 %v4729_v33, %v620_v62  ;;  %v774_v33 = vld [vmem:[%s6064_s3 + $0xd8] sm:$0xff] }
 0x17a   : > { %3853 = vmatmul.mubr.msk.f32.gmra.mrb[10].mxu0 %vm816_vm7, %v781_v1  ;;  %v703_v1 = vmul.f32 %v4596_v39, %v6087_v30  ;;  %v789_v34 = vadd.f32 %v760_v8, %v731_v6  ;;  %v791_v39 = vadd.f32 %v762_v17, %v733_v38 }
 0x17b   : > { %3855 = vmatprep.mubr.msk.f32.mxu0 %vm4313_vm4, %v4314_v53 }
 0x17c   : > { %v732_v9 = vmul.f32 %v703_v1, %v608_v19  ;;  %v622_v1 = vld [vmem:[%s6063_s2 + $0xe0] sm:$0x3] }
 0x17d   : > { %v746_v19 = vmul.f32 %v4743_v58, %v622_v1  ;;  %v3545_v58 = vld [vmem:[%s6069_s8 + $0x10] sm:$0xff] }
 0x17e   : > { %3856 = vmatmul.mubr.msk.f32.gmra.mrb[12].mxu0 %vm816_vm7, %v782_v11  ;;  %v761_v11 = vld [vmem:[%s6064_s3 + $0x70] sm:$0xff] }
 0x17f   : > { %3858 = vmatprep.mubr.msk.f32.mxu0 %vm4313_vm4, %v4314_v53  ;;  %v790_v20 = vadd.f32 %v761_v11, %v732_v9  ;;  %v5017_v9 = vld [vmem:[%s6066_s5] ss:$0 sm:$0xff]  ;;  %v4181_v11 = vpack.c.bf16 %v3546_v35, %v3545_v58 }
 0x181   : > { %4182 = vmatprep.subr.bf16.mxu1 %v4181_v11 }
 0x182   : > { %3859 = vmatmul.mubr.msk.f32.gmra.mrb[14].mxu0 %vm816_vm7, %v783_v2  ;;  %v611_v2 = vld [vmem:[%s6063_s2 + $0x88] sm:$0xff]  ;;  %4184 = vmatpush3.bf16.msra.mxu1 %v4181_v11 }
 0x183   : > { %3861 = vmatprep.mubr.msk.f32.mxu0 %vm4313_vm4, %v4314_v53  ;;  %v735_v21 = vmul.f32 %v4655_v46, %v611_v2  ;;  %v765_v46 = vld [vmem:[%s6064_s3 + $0x90] sm:$0xff] }
 0x184   : > { %v794_v26 = vadd.f32 %v765_v46, %v736_v47 }
 0x185   : > { %v793_v25 = vadd.f32 %v764_v31, %v735_v21 }
 0x186   : > { %3862 = vmatmul.mubr.msk.f32.gmra.mrb[16].mxu0 %vm816_vm7, %v784_v13  ;;  %v613_v13 = vld [vmem:[%s6063_s2 + $0x98] sm:$0xff] }
 0x187   : > { %3864 = vmatprep.mubr.msk.f32.mxu0 %vm4313_vm4, %v4314_v53  ;;  %v737_v22 = vmul.f32 %v4667_v16, %v613_v13  ;;  %v767_v16 = vld [vmem:[%s6064_s3 + $0xa0] sm:$0xff] }
 0x188   : > { %v796_v4 = vadd.f32 %v767_v16, %v738_v27 }
 0x189   : > { %v795_v14 = vadd.f32 %v766_v45, %v737_v22 }
 0x18a   : > { %3865 = vmatmul.mubr.msk.f32.gmra.mrb[18].mxu0 %vm816_vm7, %v785_v54  ;;  %v615_v54 = vld [vmem:[%s6063_s2 + $0xa8] sm:$0xff] }
 0x18b   : > { %3867 = vmatprep.mubr.msk.f32.mxu0 %vm4313_vm4, %v4314_v53  ;;  %v739_v23 = vmul.f32 %v4685_v43, %v615_v54  ;;  %v769_v43 = vld [vmem:[%s6064_s3 + $0xb0] sm:$0xff] }
 0x18c   : > { %v798_v37 = vadd.f32 %v769_v43, %v740_v15 }
 0x18d   : > { %v797_v48 = vadd.f32 %v768_v42, %v739_v23 }
 0x18e   : > { %3868 = vmatmul.mubr.msk.f32.gmra.mrb[20].mxu0 %vm816_vm7, %v786_v32  ;;  %v617_v32 = vld [vmem:[%s6063_s2 + $0xb8] sm:$0xff] }
 0x18f   : > { %3870 = vmatprep.mubr.msk.f32.mxu0 %vm4313_vm4, %v4314_v53  ;;  %v741_v28 = vmul.f32 %v4697_v49, %v617_v32  ;;  %v771_v49 = vld [vmem:[%s6064_s3 + $0xc0] sm:$0xff] }
 0x190   : > { %v800_v56 = vadd.f32 %v771_v49, %v742_v51 }
 0x191   : > { %v799_v59 = vadd.f32 %v770_v44, %v741_v28 }
 0x192   : > { %3871 = vmatmul.mubr.msk.f32.gmra.mrb[22].mxu0 %vm816_vm7, %v787_v60  ;;  %v619_v60 = vld [vmem:[%s6063_s2 + $0xc8] sm:$0xff] }
 0x193   : > { %3873 = vmatprep.mubr.msk.f32.mxu0 %vm4313_vm4, %v4314_v53  ;;  %v743_v29 = vmul.f32 %v4723_v18, %v619_v60  ;;  %v773_v18 = vld [vmem:[%s6064_s3 + $0xd0] sm:$0xff] }
 0x194   : > { %v802_v6 = vadd.f32 %v773_v18, %v744_v5 }
 0x195   : > { %v801_v63 = vadd.f32 %v772_v61, %v743_v29 }
 0x196   : > { %3874 = vmatmul.mubr.msk.f32.gmra.mrb[24].mxu0 %vm816_vm7, %v788_v0  ;;  %v621_v0 = vld [vmem:[%s6063_s2 + $0xd8] sm:$0xff] }
 0x197   : > { %3876 = vmatprep.mubr.msk.f32.mxu0 %vm4313_vm4, %v4314_v53  ;;  %v745_v30 = vmul.f32 %v4735_v57, %v621_v0  ;;  %v775_v57 = vld [vmem:[%s6064_s3 + $0xe0] sm:$0x3] }
 0x199   : > { %v803_v8 = vadd.f32 %v774_v33, %v745_v30 }
 0x19a   : > { %3877 = vmatmul.mubr.msk.f32.gmra.mrb[26].mxu0 %vm816_vm7, %v789_v34  ;;  %v804_v34 = vadd.f32 %v775_v57, %v746_v19 }
 0x19b   : > { %3879 = vmatprep.mubr.msk.f32.mxu0 %vm4313_vm4, %v4314_v53 }
 0x19e   : > { %3880 = vmatmul.mubr.msk.f32.gmra.mrb[28].mxu0 %vm816_vm7, %v790_v20 }
 0x19f   : > { %3882 = vmatprep.mubr.msk.f32.mxu0 %vm4313_vm4, %v4314_v53 }
 0x1a2   : > { %3883 = vmatmul.mubr.msk.f32.gmra.mrb[30].mxu0 %vm816_vm7, %v791_v39 }
 0x1a3   : > { %3885 = vmatprep.mubr.msk.f32.mxu0 %vm4313_vm4, %v4314_v53 }
 0x1a6   : > { %3886 = vmatmul.mubr.msk.f32.gmra.mrb[32].mxu0 %vm816_vm7, %v792_v40 }
 0x1a7   : > { %3888 = vmatprep.mubr.msk.f32.mxu0 %vm4313_vm4, %v4314_v53 }
 0x1aa   : > { %3889 = vmatmul.mubr.msk.f32.gmra.mrb[34].mxu0 %vm816_vm7, %v793_v25 }
 0x1ab   : > { %3891 = vmatprep.mubr.msk.f32.mxu0 %vm4313_vm4, %v4314_v53 }
 0x1ae   : > { %3892 = vmatmul.mubr.msk.f32.gmra.mrb[36].mxu0 %vm816_vm7, %v794_v26 }
 0x1af   : > { %3894 = vmatprep.mubr.msk.f32.mxu0 %vm4313_vm4, %v4314_v53 }
 0x1b2   : > { %3895 = vmatmul.mubr.msk.f32.gmra.mrb[38].mxu0 %vm816_vm7, %v795_v14 }
 0x1b3   : > { %3897 = vmatprep.mubr.msk.f32.mxu0 %vm4313_vm4, %v4314_v53 }
 0x1b6   : > { %3898 = vmatmul.mubr.msk.f32.gmra.mrb[40].mxu0 %vm816_vm7, %v796_v4 }
 0x1b7   : > { %3900 = vmatprep.mubr.msk.f32.mxu0 %vm4313_vm4, %v4314_v53 }
 0x1ba   : > { %3901 = vmatmul.mubr.msk.f32.gmra.mrb[42].mxu0 %vm816_vm7, %v797_v48 }
 0x1bb   : > { %3903 = vmatprep.mubr.msk.f32.mxu0 %vm4313_vm4, %v4314_v53 }
 0x1be   : > { %3904 = vmatmul.mubr.msk.f32.gmra.mrb[44].mxu0 %vm816_vm7, %v798_v37 }
 0x1bf   : > { %3906 = vmatprep.mubr.msk.f32.mxu0 %vm4313_vm4, %v4314_v53 }
 0x1c2   : > { %3907 = vmatmul.mubr.msk.f32.gmra.mrb[46].mxu0 %vm816_vm7, %v799_v59 }
 0x1c3   : > { %3909 = vmatprep.mubr.msk.f32.mxu0 %vm4313_vm4, %v4314_v53 }
 0x1c6   : > { %3910 = vmatmul.mubr.msk.f32.gmra.mrb[48].mxu0 %vm816_vm7, %v800_v56 }
 0x1c7   : > { %3912 = vmatprep.mubr.msk.f32.mxu0 %vm4313_vm4, %v4314_v53 }
 0x1ca   : > { %3913 = vmatmul.mubr.msk.f32.gmra.mrb[50].mxu0 %vm816_vm7, %v801_v63 }
 0x1cb   : > { %3915 = vmatprep.mubr.msk.f32.mxu0 %vm4313_vm4, %v4314_v53 }
 0x1ce   : > { %3916 = vmatmul.mubr.msk.f32.gmra.mrb[52].mxu0 %vm816_vm7, %v802_v6 }
 0x1cf   : > { %3918 = vmatprep.mubr.msk.f32.mxu0 %vm4313_vm4, %v4314_v53 }
 0x1d2   : > { %3919 = vmatmul.mubr.msk.f32.gmra.mrb[54].mxu0 %vm816_vm7, %v803_v8 }
 0x1d3   : > { %3921 = vmatprep.mubr.msk.f32.mxu0 %vm4313_vm4, %v4314_v53 }
 0x1d6   : > { %3922 = vmatmul.mubr.msk.f32.gmra.mrb[56].mxu0 %vm816_vm7, %v804_v34 }
 0x1d7   : > { %4053 = vmatprep.mubr.msk.f32.mxu0 %vm4313_vm4, %v4314_v53 }
 0x239   : > { %v974_v10 = vpop.f32.mrb[0].mxu0 }
 0x23a   : > { %v975_v24 = vadd.f32 %v5017_v9, %v974_v10  ;;  %v3839_v20 = vpop.f32.mrb[1].mxu0 }
 0x23c   : > { %v1118_v38 = vand.u32 2147483647, %v975_v24 }
 0x23d   : > { %v979_v17 = vpop.f32.mrb[2].mxu0 }
 0x23e   : > { %1148 = vst.msk [vmem:[#allocation2] sm:$0xff] %vm1147_vm8, %v1118_v38  ;;  %v980_v36 = vadd.f32 %v5017_v9, %v979_v17  ;;  %v3842_v39 = vpop.f32.mrb[3].mxu0 }
 0x240   : > { %v1119_v52 = vand.u32 2147483647, %v980_v36 }
 0x241   : > { %v984_v41 = vpop.f32.mrb[4].mxu0 }
 0x242   : > { %1149 = vst.msk [vmem:[#allocation2 + $0x8] sm:$0xff] %vm1147_vm8, %v1119_v52  ;;  %v985_v2 = vadd.f32 %v5017_v9, %v984_v41  ;;  %v3845_v40 = vpop.f32.mrb[5].mxu0 }
 0x244   : > { %v1120_v21 = vand.u32 2147483647, %v985_v2 }
 0x245   : > { %v989_v31 = vpop.f32.mrb[6].mxu0 }
 0x246   : > { %1150 = vst.msk [vmem:[#allocation2 + $0x10] sm:$0xff] %vm1147_vm8, %v1120_v21  ;;  %v990_v12 = vadd.f32 %v5017_v9, %v989_v31  ;;  %v3848_v25 = vpop.f32.mrb[7].mxu0 }
 0x248   : > { %v1121_v47 = vand.u32 2147483647, %v990_v12 }
 0x249   : > { %v994_v46 = vpop.f32.mrb[8].mxu0 }
 0x24a   : > { %1151 = vst.msk [vmem:[#allocation2 + $0x18] sm:$0xff] %vm1147_vm8, %v1121_v47  ;;  %v995_v13 = vadd.f32 %v5017_v9, %v994_v46  ;;  %v3851_v26 = vpop.f32.mrb[9].mxu0 }
 0x24c   : > { %v1122_v22 = vand.u32 2147483647, %v995_v13 }
 0x24d   : > { %v999_v45 = vpop.f32.mrb[10].mxu0 }
 0x24e   : > { %1152 = vst.msk [vmem:[#allocation2 + $0x20] sm:$0xff] %vm1147_vm8, %v1122_v22  ;;  %v1000_v3 = vadd.f32 %v5017_v9, %v999_v45  ;;  %v3854_v14 = vpop.f32.mrb[11].mxu0 }
 0x250   : > { %v1123_v27 = vand.u32 2147483647, %v1000_v3 }
 0x251   : > { %v1004_v16 = vpop.f32.mrb[12].mxu0 }
 0x252   : > { %1153 = vst.msk [vmem:[#allocation2 + $0x28] sm:$0xff] %vm1147_vm8, %v1123_v27  ;;  %v1005_v54 = vadd.f32 %v5017_v9, %v1004_v16  ;;  %v3857_v4 = vpop.f32.mrb[13].mxu0 }
 0x254   : > { %v1124_v23 = vand.u32 2147483647, %v1005_v54 }
 0x255   : > { %v1009_v42 = vpop.f32.mrb[14].mxu0 }
 0x256   : > { %1154 = vst.msk [vmem:[#allocation2 + $0x30] sm:$0xff] %vm1147_vm8, %v1124_v23  ;;  %v1010_v7 = vadd.f32 %v5017_v9, %v1009_v42  ;;  %v3860_v48 = vpop.f32.mrb[15].mxu0 }
 0x258   : > { %v1125_v15 = vand.u32 2147483647, %v1010_v7 }
 0x259   : > { %v1014_v43 = vpop.f32.mrb[16].mxu0 }
 0x25a   : > { %1155 = vst.msk [vmem:[#allocation2 + $0x38] sm:$0xff] %vm1147_vm8, %v1125_v15  ;;  %v1015_v32 = vadd.f32 %v5017_v9, %v1014_v43  ;;  %v3863_v37 = vpop.f32.mrb[17].mxu0  ;;  %v1180_v43 = vld [vmem:[#allocation2 + $0x10] ss:$2 sm:$0xff] }
 0x25c   : > { %v1126_v28 = vand.u32 2147483647, %v1015_v32  ;;  %v1210_v32 = vld [vmem:[#allocation2 + $0x11] ss:$2 sm:$0xff] }
 0x25d   : > { %v1019_v44 = vpop.f32.mrb[18].mxu0 }
 0x25e   : > { %1156 = vst.msk [vmem:[#allocation2 + $0x40] sm:$0xff] %vm1147_vm8, %v1126_v28  ;;  %v1020_v50 = vadd.f32 %v5017_v9, %v1019_v44  ;;  %v3866_v59 = vpop.f32.mrb[19].mxu0  ;;  %v1178_v44 = vld [vmem:[#allocation2] ss:$2 sm:$0xff] }
 0x25f   : > { %v1212_v59 = vld [vmem:[#allocation2 + $0x21] ss:$2 sm:$0xff] }
 0x260   : > { %v1127_v51 = vand.u32 2147483647, %v1020_v50  ;;  %v1182_v50 = vld [vmem:[#allocation2 + $0x20] ss:$2 sm:$0xff] }
 0x261   : > { %v1024_v49 = vpop.f32.mrb[20].mxu0 }
 0x262   : > { %1157 = vst.msk [vmem:[#allocation2 + $0x48] sm:$0xff] %vm1147_vm8, %v1127_v51  ;;  %v1025_v60 = vadd.f32 %v5017_v9, %v1024_v49  ;;  %v3869_v56 = vpop.f32.mrb[21].mxu0  ;;  %v1208_v51 = vld [vmem:[#allocation2 + $0x1] ss:$2 sm:$0xff] }
 0x263   : > { %v1184_v56 = vld [vmem:[#allocation2 + $0x30] ss:$2 sm:$0xff] }
 0x264   : > { %v1128_v29 = vand.u32 2147483647, %v1025_v60  ;;  %v5072_v60 = vmax.f32 %v1180_v43, %v1210_v32 }
 0x265   : > { %v1029_v61 = vpop.f32.mrb[22].mxu0 }
 0x266   : > { %1158 = vst.msk [vmem:[#allocation2 + $0x50] sm:$0xff] %vm1147_vm8, %v1128_v29  ;;  %v1030_v62 = vadd.f32 %v5017_v9, %v1029_v61  ;;  %v3872_v63 = vpop.f32.mrb[23].mxu0  ;;  %v1214_v29 = vld [vmem:[#allocation2 + $0x31] ss:$2 sm:$0xff] }
 0x268   : > { %v1129_v5 = vand.u32 2147483647, %v1030_v62 }
 0x269   : > { %v1034_v18 = vpop.f32.mrb[24].mxu0 }
 0x26a   : > { %1159 = vst.msk [vmem:[#allocation2 + $0x58] sm:$0xff] %vm1147_vm8, %v1129_v5  ;;  %v1035_v0 = vadd.f32 %v5017_v9, %v1034_v18  ;;  %v3875_v6 = vpop.f32.mrb[25].mxu0  ;;  %v5076_v5 = vmax.f32 %v1178_v44, %v1208_v51  ;;  %v5078_v18 = vmax.f32 %v1182_v50, %v1212_v59 }
 0x26b   : > { %v1216_v6 = vld [vmem:[#allocation2 + $0x41] ss:$2 sm:$0xff] }
 0x26c   : > { %v1130_v30 = vand.u32 2147483647, %v1035_v0  ;;  %v1186_v0 = vld [vmem:[#allocation2 + $0x40] ss:$2 sm:$0xff] }
 0x26d   : > { %v1039_v33 = vpop.f32.mrb[26].mxu0 }
 0x26e   : > { %1160 = vst.msk [vmem:[#allocation2 + $0x60] sm:$0xff] %vm1147_vm8, %v1130_v30  ;;  %v1040_v1 = vadd.f32 %v5017_v9, %v1039_v33  ;;  %v3878_v8 = vpop.f32.mrb[27].mxu0  ;;  %v5080_v30 = vmax.f32 %v1184_v56, %v1214_v29 }
 0x270   : > { %v1131_v19 = vand.u32 2147483647, %v1040_v1  ;;  %v1253_v1 = vsel %vm1147_vm8, %v5072_v60, 0.0 }
 0x271   : > { %v1044_v57 = vpop.f32.mrb[28].mxu0  ;;  %v1188_v8 = vld [vmem:[#allocation2 + $0x50] ss:$2 sm:$0xff] }
 0x272   : > { %1161 = vst.msk [vmem:[#allocation2 + $0x68] sm:$0xff] %vm1147_vm8, %v1131_v19  ;;  %v1045_v34 = vadd.f32 %v5017_v9, %v1044_v57  ;;  %v3881_v58 = vpop.f32.mrb[29].mxu0  ;;  %v1218_v19 = vld [vmem:[#allocation2 + $0x51] ss:$2 sm:$0xff] }
 0x274   : > { %v1132_v35 = vand.u32 2147483647, %v1045_v34  ;;  %v5084_v34 = vmax.f32 %v1186_v0, %v1216_v6 }
 0x275   : > { %v1049_v10 = vpop.f32.mrb[30].mxu0 }
 0x276   : > { %1162 = vst.msk [vmem:[#allocation2 + $0x70] sm:$0xff] %vm1147_vm8, %v1132_v35  ;;  %v1050_v11 = vadd.f32 %v5017_v9, %v1049_v10  ;;  %v3884_v24 = vpop.f32.mrb[31].mxu0  ;;  %v1252_v10 = vsel %vm1147_vm8, %v5076_v5, 0.0 }
 0x278   : > { %v1133_v20 = vand.u32 2147483647, %v1050_v11  ;;  %v1255_v11 = vsel %vm1147_vm8, %v5078_v18, 0.0 }
 0x279   : > { %v1054_v38 = vpop.f32.mrb[32].mxu0  ;;  %v1190_v24 = vld [vmem:[#allocation2 + $0x60] ss:$2 sm:$0xff] }
 0x27a   : > { %1163 = vst.msk [vmem:[#allocation2 + $0x78] sm:$0xff] %vm1147_vm8, %v1133_v20  ;;  %v1055_v17 = vadd.f32 %v5017_v9, %v1054_v38  ;;  %v3887_v36 = vpop.f32.mrb[33].mxu0  ;;  %v1220_v20 = vld [vmem:[#allocation2 + $0x61] ss:$2 sm:$0xff]  ;;  %v1254_v38 = vadd.f32 %v1253_v1, %v1252_v10 }
 0x27c   : > { %v1134_v39 = vand.u32 2147483647, %v1055_v17  ;;  %v5092_v17 = vmax.f32 %v1188_v8, %v1218_v19 }
 0x27d   : > { %v1059_v52 = vpop.f32.mrb[34].mxu0 }
 0x27e   : > { %1164 = vst.msk [vmem:[#allocation2 + $0x80] sm:$0xff] %vm1147_vm8, %v1134_v39  ;;  %v1060_v41 = vadd.f32 %v5017_v9, %v1059_v52  ;;  %v3890_v2 = vpop.f32.mrb[35].mxu0  ;;  %v1257_v39 = vsel %vm1147_vm8, %v5080_v30, 0.0 }
 0x280   : > { %v1135_v40 = vand.u32 2147483647, %v1060_v41 }
 0x281   : > { %v1064_v21 = vpop.f32.mrb[36].mxu0  ;;  %v1192_v52 = vld [vmem:[#allocation2 + $0x70] ss:$2 sm:$0xff]  ;;  %v1222_v41 = vld [vmem:[#allocation2 + $0x71] ss:$2 sm:$0xff] }
 0x282   : > { %1165 = vst.msk [vmem:[#allocation2 + $0x88] sm:$0xff] %vm1147_vm8, %v1135_v40  ;;  %v1065_v31 = vadd.f32 %v5017_v9, %v1064_v21  ;;  %v3893_v12 = vpop.f32.mrb[37].mxu0  ;;  %v1256_v40 = vadd.f32 %v1255_v11, %v1254_v38  ;;  %v5096_v21 = vmax.f32 %v1190_v24, %v1220_v20 }
 0x284   : > { %v1136_v25 = vand.u32 2147483647, %v1065_v31 }
 0x285   : > { %v1069_v47 = vpop.f32.mrb[38].mxu0 }
 0x286   : > { %1166 = vst.msk [vmem:[#allocation2 + $0x90] sm:$0xff] %vm1147_vm8, %v1136_v25  ;;  %v1070_v46 = vadd.f32 %v5017_v9, %v1069_v47  ;;  %v3896_v13 = vpop.f32.mrb[39].mxu0  ;;  %v1259_v25 = vsel %vm1147_vm8, %v5084_v34, 0.0 }
 0x287   : > { %v1258_v13 = vadd.f32 %v1257_v39, %v1256_v40 }
 0x288   : > { %v1137_v26 = vand.u32 2147483647, %v1070_v46 }
 0x289   : > { %v1074_v22 = vpop.f32.mrb[40].mxu0  ;;  %v1194_v47 = vld [vmem:[#allocation2 + $0x80] ss:$2 sm:$0xff]  ;;  %v1224_v46 = vld [vmem:[#allocation2 + $0x81] ss:$2 sm:$0xff] }
 0x28a   : > { %1167 = vst.msk [vmem:[#allocation2 + $0x98] sm:$0xff] %vm1147_vm8, %v1137_v26  ;;  %v1075_v45 = vadd.f32 %v5017_v9, %v1074_v22  ;;  %v3899_v3 = vpop.f32.mrb[41].mxu0  ;;  %v1261_v26 = vsel %vm1147_vm8, %v5092_v17, 0.0  ;;  %v5104_v22 = vmax.f32 %v1192_v52, %v1222_v41 }
 0x28b   : > { %v1471_v3 = vld [vmem:[%s6069_s8] sm:$0xff] }
 0x28c   : > { %v1138_v14 = vand.u32 2147483647, %v1075_v45 }
 0x28d   : > { %v1079_v27 = vpop.f32.mrb[42].mxu0 }
 0x28e   : > { %1168 = vst.msk [vmem:[#allocation2 + $0xa0] sm:$0xff] %vm1147_vm8, %v1138_v14  ;;  %v1080_v16 = vadd.f32 %v5017_v9, %v1079_v27  ;;  %v3902_v54 = vpop.f32.mrb[43].mxu0  ;;  %v1472_v14 = vld [vmem:[%s6069_s8 + $0x8] sm:$0xff] }
 0x290   : > { %v1139_v4 = vand.u32 2147483647, %v1080_v16 }
 0x291   : > { %v1084_v23 = vpop.f32.mrb[44].mxu0  ;;  %v1196_v27 = vld [vmem:[#allocation2 + $0x90] ss:$2 sm:$0xff]  ;;  %v1226_v16 = vld [vmem:[#allocation2 + $0x91] ss:$2 sm:$0xff] }
 0x292   : > { %1169 = vst.msk [vmem:[#allocation2 + $0xa8] sm:$0xff] %vm1147_vm8, %v1139_v4  ;;  %v1085_v42 = vadd.f32 %v5017_v9, %v1084_v23  ;;  %v3905_v7 = vpop.f32.mrb[45].mxu0  ;;  %v1260_v4 = vadd.f32 %v1259_v25, %v1258_v13  ;;  %v5112_v23 = vpack.c.bf16 %v1472_v14, %v1471_v3  ;;  %v5123_v44 = vmax.f32 %v1196_v27, %v1226_v16 }
 0x293   : > { %v5116_v7 = vmax.f32 %v1194_v47, %v1224_v46 }
 0x294   : > { %v1140_v48 = vand.u32 2147483647, %v1085_v42  ;;  %v1263_v42 = vsel %vm1147_vm8, %v5096_v21, 0.0  ;;  %4186 = vmatprep.subr.bf16.mxu1 %v5112_v23  ;;  %v1269_v1 = vsel %vm1147_vm8, %v5123_v44, 0.0 }
 0x295   : > { %v1089_v15 = vpop.f32.mrb[46].mxu0  ;;  %v1267_v29 = vsel %vm1147_vm8, %v5116_v7, 0.0 }
 0x296   : > { %1170 = vst.msk [vmem:[#allocation2 + $0xb0] sm:$0xff] %vm1147_vm8, %v1140_v48  ;;  %v1090_v37 = vadd.f32 %v5017_v9, %v1089_v15  ;;  %v3908_v28 = vpop.f32.mrb[47].mxu0 }
 0x297   : > { %v1265_v28 = vsel %vm1147_vm8, %v5104_v22, 0.0 }
 0x298   : > { %v1141_v49 = vand.u32 2147483647, %v1090_v37  ;;  %v1262_v37 = vadd.f32 %v1261_v26, %v1260_v4 }
 0x299   : > { %v1094_v61 = vpop.f32.mrb[48].mxu0  ;;  %v1198_v43 = vld [vmem:[#allocation2 + $0xa0] ss:$2 sm:$0xff]  ;;  %v1228_v32 = vld [vmem:[#allocation2 + $0xa1] ss:$2 sm:$0xff] }
 0x29a   : > { %1171 = vst.msk [vmem:[#allocation2 + $0xb8] sm:$0xff] %vm1147_vm8, %v1141_v49  ;;  %v1095_v62 = vadd.f32 %v5017_v9, %v1094_v61  ;;  %v3911_v63 = vpop.f32.mrb[49].mxu0  ;;  %v1264_v56 = vadd.f32 %v1263_v42, %v1262_v37  ;;  %v5127_v61 = vmax.f32 %v1198_v43, %v1228_v32 }
 0x29c   : > { %v1142_v33 = vand.u32 2147483647, %v1095_v62 }
 0x29d   : > { %v1099_v57 = vpop.f32.mrb[50].mxu0 }
 0x29e   : > { %1172 = vst.msk [vmem:[#allocation2 + $0xc0] sm:$0xff] %vm1147_vm8, %v1142_v33  ;;  %v1100_v58 = vadd.f32 %v5017_v9, %v1099_v57  ;;  %v3914_v35 = vpop.f32.mrb[51].mxu0  ;;  %v1266_v33 = vadd.f32 %v1265_v28, %v1264_v56 }
 0x2a0   : > { %v1143_v36 = vand.u32 2147483647, %v1100_v58  ;;  %v1268_v57 = vadd.f32 %v1267_v29, %v1266_v33  ;;  %v1271_v58 = vsel %vm1147_vm8, %v5127_v61, 0.0 }
 0x2a1   : > { %v1104_v2 = vpop.f32.mrb[52].mxu0  ;;  %v1200_v59 = vld [vmem:[#allocation2 + $0xb0] ss:$2 sm:$0xff]  ;;  %v1230_v51 = vld [vmem:[#allocation2 + $0xb1] ss:$2 sm:$0xff] }
 0x2a2   : > { %1173 = vst.msk [vmem:[#allocation2 + $0xc8] sm:$0xff] %vm1147_vm8, %v1143_v36  ;;  %v1105_v31 = vadd.f32 %v5017_v9, %v1104_v2  ;;  %v3917_v12 = vpop.f32.mrb[53].mxu0  ;;  %v5133_v8 = vmax.f32 %v1200_v59, %v1230_v51 }
 0x2a4   : > { %v1144_v45 = vand.u32 2147483647, %v1105_v31  ;;  %v1273_v10 = vsel %vm1147_vm8, %v5133_v8, 0.0 }
 0x2a5   : > { %v1109_v54 = vpop.f32.mrb[54].mxu0 }
 0x2a6   : > { %1174 = vst.msk [vmem:[#allocation2 + $0xd0] sm:$0xff] %vm1147_vm8, %v1144_v45  ;;  %v1110_v48 = vadd.f32 %v5017_v9, %v1109_v54  ;;  %v3920_v15 = vpop.f32.mrb[55].mxu0 }
 0x2a8   : > { %v1145_v50 = vand.u32 2147483647, %v1110_v48 }
 0x2a9   : > { %v1114_v49 = vpop.f32.mrb[56].mxu0  ;;  %v1202_v0 = vld [vmem:[#allocation2 + $0xc0] ss:$2 sm:$0xff]  ;;  %v1232_v6 = vld [vmem:[#allocation2 + $0xc1] ss:$2 sm:$0xff] }
 0x2aa   : > { %1175 = vst.msk [vmem:[#allocation2 + $0xd8] sm:$0xff] %vm1147_vm8, %v1145_v50  ;;  %v1115_v62 = vadd.f32 %v5017_v9, %v1114_v49  ;;  %v3923_v63 = vpop.f32.mrb[57].mxu0  ;;  %v5137_v35 = vmax.f32 %v1202_v0, %v1232_v6  ;;  %v1270_v9 = vadd.f32 %v1269_v1, %v1268_v57 }
 0x2ac   : > { %v1146_v19 = vand.u32 2147483647, %v1115_v62  ;;  %v1272_v20 = vadd.f32 %v1271_v58, %v1270_v9  ;;  %v1275_v38 = vsel %vm1147_vm8, %v5137_v35, 0.0 }
 0x2ae   : > { %1177 = vst.msk [vmem:[#allocation2 + $0xe0] sm:$0x3] %vm1176_vm9, %v1146_v19  ;;  %v1274_v39 = vadd.f32 %v1273_v10, %v1272_v20 }
 0x2b0   : > { %v1276_v40 = vadd.f32 %v1275_v38, %v1274_v39 }
 0x2b1   : > { %v1204_v11 = vld [vmem:[#allocation2 + $0xd0] ss:$2 sm:$0xff]  ;;  %v1234_v24 = vld [vmem:[#allocation2 + $0xd1] ss:$2 sm:$0xff] }
 0x2b2   : > { %v1250_v36 = vmax.f32 %v1204_v11, %v1234_v24 }
 0x2b4   : > { %v1277_v52 = vsel %vm1147_vm8, %v1250_v36, 0.0 }
 0x2b5   : > { %v1206_v41 = vld [vmem:[#allocation2 + $0xe0] ss:$2 sm:$0x1]  ;;  %v1236_v2 = vld [vmem:[#allocation2 + $0xe1] ss:$2 sm:$0x1]  ;;  %v1278_v12 = vadd.f32 %v1277_v52, %v1276_v40 }
 0x2b6   : > { %v1251_v31 = vmax.f32 %v1206_v41, %v1236_v2 }
 0x2b8   : > { %v1280_v25 = vsel %vm1279_vm10, %v1251_v31, 0.0 }
 0x2b9   : > { %v1281_v47 = vadd.f32 %v1280_v25, %v1278_v12 }
 0x2bb   : > { %v1282_v46 = vrot.slane %v1281_v47, 4 }
 0x2bd   : > { %v1283_v13 = vadd.f32 %v1282_v46, %v1281_v47 }
 0x2bf   : > { %v1284_v26 = vrot.slane %v1283_v13, 2 }
 0x2c1   : > { %v1285_v45 = vadd.f32 %v1284_v26, %v1283_v13 }
 0x2c3   : > { %v1286_v3 = vrot.slane %v1285_v45, 1 }
 0x2c5   : > { %v1287_v14 = vadd.f32 %v1286_v3, %v1285_v45 }
 0x2c7   : > { %v1289_v27 = vmul.f32 0.0088495575, %v1287_v14 }
 0x2c9   : > { %v5147_v16 = vsub.f32 %v5076_v5, %v1289_v27  ;;  %v5150_v54 = vsub.f32 %v5072_v60, %v1289_v27  ;;  %v5153_v4 = vsub.f32 %v5078_v18, %v1289_v27  ;;  %v5156_v42 = vsub.f32 %v5080_v30, %v1289_v27 }
 0x2ca   : > { %v5163_v43 = vsub.f32 %v5084_v34, %v1289_v27  ;;  %v5168_v60 = vsub.f32 %v5092_v17, %v1289_v27  ;;  %v5175_v28 = vsub.f32 %v5096_v21, %v1289_v27  ;;  %v5181_v17 = vsub.f32 %v5104_v22, %v1289_v27 }
 0x2cb   : > { %v1305_v48 = vmul.f32 %v5147_v16, %v5147_v16  ;;  %v1306_v15 = vmul.f32 %v5150_v54, %v5150_v54  ;;  %v1307_v5 = vmul.f32 %v5153_v4, %v5153_v4  ;;  %v1308_v18 = vmul.f32 %v5156_v42, %v5156_v42 }
 0x2cc   : > { %v1309_v34 = vmul.f32 %v5163_v43, %v5163_v43  ;;  %v1310_v51 = vmul.f32 %v5168_v60, %v5168_v60  ;;  %v5187_v29 = vsub.f32 %v5116_v7, %v1289_v27  ;;  %v1311_v21 = vmul.f32 %v5175_v28, %v5175_v28 }
 0x2cd   : > { %v1320_v30 = vsel %vm1147_vm8, %v1305_v48, 0.0  ;;  %v1321_v32 = vsel %vm1147_vm8, %v1306_v15, 0.0  ;;  %v1323_v50 = vsel %vm1147_vm8, %v1307_v5, 0.0  ;;  %v1325_v49 = vsel %vm1147_vm8, %v1308_v18, 0.0 }
 0x2ce   : > { %v1322_v37 = vadd.f32 %v1321_v32, %v1320_v30  ;;  %v1327_v62 = vsel %vm1147_vm8, %v1309_v34, 0.0  ;;  %v5193_v0 = vsub.f32 %v5123_v44, %v1289_v27  ;;  %v1312_v22 = vmul.f32 %v5181_v17, %v5181_v17 }
 0x2cf   : > { %v1329_v6 = vsel %vm1147_vm8, %v1310_v51, 0.0  ;;  %v5199_v1 = vsub.f32 %v5127_v61, %v1289_v27  ;;  %v1313_v7 = vmul.f32 %v5187_v29, %v5187_v29  ;;  %v1331_v19 = vsel %vm1147_vm8, %v1311_v21, 0.0 }
 0x2d0   : > { %v1324_v59 = vadd.f32 %v1323_v50, %v1322_v37  ;;  %v5205_v58 = vsub.f32 %v5133_v8, %v1289_v27  ;;  %v1314_v44 = vmul.f32 %v5193_v0, %v5193_v0  ;;  %v1333_v9 = vsel %vm1147_vm8, %v1312_v22, 0.0  ;;  %v1368_v22 = vld [vmem:[%s6067_s6 + $0x10] sm:$0xff] }
 0x2d1   : > { %v5211_v11 = vsub.f32 %v5137_v35, %v1289_v27  ;;  %v1315_v61 = vmul.f32 %v5199_v1, %v5199_v1  ;;  %v1335_v24 = vsel %vm1147_vm8, %v1313_v7, 0.0  ;;  %v5216_v38 = vsub.f32 %v1250_v36, %v1289_v27 }
 0x2d2   : > { %v1326_v56 = vadd.f32 %v1325_v49, %v1324_v59  ;;  %v1316_v8 = vmul.f32 %v5205_v58, %v5205_v58  ;;  %v1337_v39 = vsel %vm1147_vm8, %v1314_v44, 0.0  ;;  %v5221_v41 = vsub.f32 %v1251_v31, %v1289_v27  ;;  %v1366_v49 = vld [vmem:[%s6067_s6] sm:$0xff] }
 0x2d3   : > { %v1317_v35 = vmul.f32 %v5211_v11, %v5211_v11  ;;  %v1339_v2 = vsel %vm1147_vm8, %v1315_v61, 0.0  ;;  %v1318_v12 = vmul.f32 %v5216_v38, %v5216_v38  ;;  %v1415_v61 = vld [vmem:[%s6068_s7 + $0x20] sm:$0xff] }
 0x2d4   : > { %v1328_v63 = vadd.f32 %v1327_v62, %v1326_v56  ;;  %v1341_v36 = vsel %vm1147_vm8, %v1316_v8, 0.0  ;;  %v1319_v47 = vmul.f32 %v5221_v41, %v5221_v41  ;;  %v1367_v56 = vld [vmem:[%s6067_s6 + $0x8] sm:$0xff]  ;;  %v1411_v62 = vld [vmem:[%s6068_s7] sm:$0xff] }
 0x2d5   : > { %v1343_v46 = vsel %vm1147_vm8, %v1317_v35, 0.0  ;;  %v1345_v31 = vsel %vm1147_vm8, %v1318_v12, 0.0 }
 0x2d6   : > { %v1330_v33 = vadd.f32 %v1329_v6, %v1328_v63  ;;  %v1347_v45 = vsel %vm1279_vm10, %v1319_v47, 0.0  ;;  %v1412_v63 = vld [vmem:[%s6068_s7 + $0x8] sm:$0xff]  ;;  %v1369_v6 = vld [vmem:[%s6067_s6 + $0x18] sm:$0xff] }
 0x2d8   : > { %v1332_v57 = vadd.f32 %v1331_v19, %v1330_v33  ;;  %v1370_v33 = vld [vmem:[%s6067_s6 + $0x20] sm:$0xff] }
 0x2da   : > { %v1334_v10 = vadd.f32 %v1333_v9, %v1332_v57  ;;  %v1371_v9 = vld [vmem:[%s6067_s6 + $0x28] sm:$0xff] }
 0x2dc   : > { %v1336_v20 = vadd.f32 %v1335_v24, %v1334_v10  ;;  %v1372_v10 = vld [vmem:[%s6067_s6 + $0x30] sm:$0xff] }
 0x2de   : > { %v1338_v52 = vadd.f32 %v1337_v39, %v1336_v20 }
 0x2e0   : > { %v1340_v40 = vadd.f32 %v1339_v2, %v1338_v52 }
 0x2e2   : > { %v1342_v25 = vadd.f32 %v1341_v36, %v1340_v40  ;;  %v1417_v40 = vld [vmem:[%s6068_s7 + $0x30] sm:$0xff] }
 0x2e4   : > { %v1344_v13 = vadd.f32 %v1343_v46, %v1342_v25 }
 0x2e6   : > { %v1346_v26 = vadd.f32 %v1345_v31, %v1344_v13 }
 0x2e8   : > { %v1348_v3 = vadd.f32 %v1347_v45, %v1346_v26 }
 0x2ea   : > { %v1349_v14 = vrot.slane %v1348_v3, 4 }
 0x2ec   : > { %v1350_v27 = vadd.f32 %v1349_v14, %v1348_v3 }
 0x2ee   : > { %v1351_v48 = vrot.slane %v1350_v27, 2 }
 0x2f0   : > { %v1352_v15 = vadd.f32 %v1351_v48, %v1350_v27 }
 0x2f2   : > { %v1353_v5 = vrot.slane %v1352_v15, 1 }
 0x2f4   : > { %v1354_v18 = vadd.f32 %v1353_v5, %v1352_v15 }
 0x2f6   : > { %v1356_v30 = vmul.f32 0.008928572, %v1354_v18 }
 0x2f8   : > { %4291 = vrsqrt.f32 %v1356_v30  ;;  %vm1359_vm11 = vcmp.eq.f32.partialorder %v1356_v30, inf  ;;  %v1362_v34 = vand.u32 2147483648, %v1356_v30  ;;  %vm1361_vm12 = vcmp.eq.f32.partialorder %v1356_v30, 0.0 }
 0x302   : > { %v4292_v32 = vpop.eup %4291 }
 0x303   : > { %v1358_v37 = vmul.f32 %v4292_v32, %v1356_v30 }
 0x305   : > { %v1360_v50 = vsel %vm1359_vm11, %v1356_v30, %v1358_v37 }
 0x306   : > { %v1363_v59 = vsel %vm1361_vm12, %v1362_v34, %v1360_v50 }
 0x307   : > { %v1364_v51 = vadd.f32 1e-06, %v1363_v59 }
 0x309   : > { %4293 = vrcp.f32 %v1364_v51 }
 0x313   : > { %v5240_v21 = vpop.eup %4293 }
 0x314   : > { %v1381_v7 = vmul.f32 %v5240_v21, %v5147_v16  ;;  %v1382_v19 = vmul.f32 %v5240_v21, %v5150_v54  ;;  %v1383_v57 = vmul.f32 %v5240_v21, %v5153_v4  ;;  %v1384_v44 = vmul.f32 %v5240_v21, %v5156_v42  ;;  %v1373_v16 = vld [vmem:[%s6067_s6 + $0x38] sm:$0xff]  ;;  %v1413_v54 = vld [vmem:[%s6068_s7 + $0x10] sm:$0xff] }
 0x315   : > { %v1414_v4 = vld [vmem:[%s6068_s7 + $0x18] sm:$0xff]  ;;  %v1385_v42 = vmul.f32 %v5240_v21, %v5163_v43  ;;  %v1386_v24 = vmul.f32 %v5240_v21, %v5168_v60  ;;  %v1387_v20 = vmul.f32 %v5240_v21, %v5175_v28  ;;  %v1388_v8 = vmul.f32 %v5240_v21, %v5181_v17  ;;  %v1416_v43 = vld [vmem:[%s6068_s7 + $0x28] sm:$0xff] }
 0x316   : > { %v1396_v39 = vmul.f32 %v1381_v7, %v1366_v49  ;;  %v1397_v52 = vmul.f32 %v1382_v19, %v1367_v56  ;;  %v1398_v35 = vmul.f32 %v1383_v57, %v1368_v22  ;;  %v1399_v2 = vmul.f32 %v1384_v44, %v1369_v6  ;;  %v1418_v60 = vld [vmem:[%s6068_s7 + $0x38] sm:$0xff] }
 0x317   : > { %v1400_v28 = vmul.f32 %v1385_v42, %v1370_v33  ;;  %v1401_v12 = vmul.f32 %v1386_v24, %v1371_v9  ;;  %v1402_v36 = vmul.f32 %v1387_v20, %v1372_v10  ;;  %v1403_v17 = vmul.f32 %v1388_v8, %v1373_v16  ;;  %v1419_v9 = vld [vmem:[%s6068_s7 + $0x40] sm:$0xff]  ;;  %v1375_v10 = vld [vmem:[%s6067_s6 + $0x48] sm:$0xff]  ;;  %v1376_v20 = vld [vmem:[%s6067_s6 + $0x50] sm:$0xff] }
 0x318   : > { %v1426_v25 = vadd.f32 %v1411_v62, %v1396_v39  ;;  %v1427_v47 = vadd.f32 %v1412_v63, %v1397_v52  ;;  %v1428_v46 = vadd.f32 %v1413_v54, %v1398_v35  ;;  %v1429_v13 = vadd.f32 %v1414_v4, %v1399_v2  ;;  %v1374_v62 = vld [vmem:[%s6067_s6 + $0x40] sm:$0xff]  ;;  %v3576_v63 = vld [vmem:[%s6069_s8 + $0x28] sm:$0xff]  ;;  %v1377_v2 = vld [vmem:[%s6067_s6 + $0x58] sm:$0xff] }
 0x319   : > { %v1430_v31 = vadd.f32 %v1415_v61, %v1400_v28  ;;  %v1431_v26 = vadd.f32 %v1416_v43, %v1401_v12  ;;  %v1432_v45 = vadd.f32 %v1417_v40, %v1402_v36  ;;  %v1433_v3 = vadd.f32 %v1418_v60, %v1403_v17  ;;  %v1420_v24 = vld [vmem:[%s6068_s7 + $0x48] sm:$0xff]  ;;  %v1378_v43 = vld [vmem:[%s6067_s6 + $0x60] sm:$0xff] }
 0x31a   : > { %v1441_v14 = vmul.f32 0.2, %v1426_v25  ;;  %v1442_v27 = vmul.f32 0.2, %v1427_v47  ;;  %v1443_v48 = vmul.f32 0.2, %v1428_v46  ;;  %v1389_v30 = vmul.f32 %v5240_v21, %v5187_v29 }
 0x31b   : > { %v1444_v15 = vmul.f32 0.2, %v1429_v13  ;;  %v1445_v5 = vmul.f32 0.2, %v1430_v31  ;;  %v1446_v18 = vmul.f32 0.2, %v1431_v26  ;;  %v1390_v7 = vmul.f32 %v5240_v21, %v5193_v0 }
 0x31c   : > { %v5302_v32 = vmax.f32 %v1426_v25, %v1441_v14  ;;  %v5304_v37 = vmax.f32 %v1427_v47, %v1442_v27  ;;  %v5306_v34 = vmax.f32 %v1428_v46, %v1443_v48  ;;  %v1447_v50 = vmul.f32 0.2, %v1432_v45  ;;  %v3575_v29 = vld [vmem:[%s6069_s8 + $0x20] sm:$0xff]  ;;  %v1422_v47 = vld [vmem:[%s6068_s7 + $0x58] sm:$0xff] }
 0x31d   : > { %v5308_v59 = vmax.f32 %v1429_v13, %v1444_v15  ;;  %v5310_v51 = vmax.f32 %v1430_v31, %v1445_v5  ;;  %v5312_v49 = vmax.f32 %v1431_v26, %v1446_v18  ;;  %v1448_v56 = vmul.f32 0.2, %v1433_v3  ;;  %v1423_v46 = vld [vmem:[%s6068_s7 + $0x60] sm:$0xff] }
 0x31e   : > { %v1490_v22 = vrot.slane %v5302_v32, 1  ;;  %v1491_v6 = vrot.slane %v5304_v37, 1  ;;  %v1493_v33 = vrot.slane %v5306_v34, 1  ;;  %v5330_v44 = vmax.f32 %v1432_v45, %v1447_v50  ;;  %v1424_v45 = vld [vmem:[%s6068_s7 + $0x68] sm:$0xff] }
 0x31f   : > { %v1495_v19 = vrot.slane %v5308_v59, 1  ;;  %v1497_v57 = vrot.slane %v5310_v51, 1  ;;  %v1404_v4 = vmul.f32 %v1389_v30, %v1374_v62  ;;  %v5340_v0 = vpack.c.bf16 %v3576_v63, %v3575_v29 }
 0x320   : > { %v1492_v16 = vsel %vm904_vm1, %v1490_v22, %v1491_v6  ;;  %v1494_v54 = vsel %vm904_vm1, %v1491_v6, %v1493_v33  ;;  %v1499_v42 = vrot.slane %v5312_v49, 1  ;;  %v5344_v61 = vmax.f32 %v1433_v3, %v1448_v56 }
 0x321   : > { %3928 = vmatprep.mubr.msk.f32.mxu1 %vm1147_vm8, %v1492_v16  ;;  %v1496_v8 = vsel %vm904_vm1, %v1493_v33, %v1495_v19  ;;  %v1434_v39 = vadd.f32 %v1419_v9, %v1404_v4  ;;  %v1405_v52 = vmul.f32 %v1390_v7, %v1375_v10  ;;  %v1391_v35 = vmul.f32 %v5240_v21, %v5199_v1  ;;  %v1421_v1 = vld [vmem:[%s6068_s7 + $0x50] sm:$0xff] }
 0x322   : > { %3929 = vmatmul.mubr.msk.f32.vlgmr.msra.gmra.mrb[0].mxu1 %vm1147_vm8, %v1494_v54  ;;  %v1498_v40 = vsel %vm904_vm1, %v1495_v19, %v1497_v57  ;;  %v1501_v60 = vrot.slane %v5330_v44, 1  ;;  %v1392_v28 = vmul.f32 %v5240_v21, %v5205_v58  ;;  %v1393_v12 = vmul.f32 %v5240_v21, %v5211_v11 }
 0x323   : > { %4188 = vmatpush3.bf16.msra.mxu1 %v5112_v23  ;;  %3931 = vmatprep.mubr.msk.f32.mxu1 %vm1147_vm8, %v1496_v8  ;;  %v1379_v23 = vld [vmem:[%s6067_s6 + $0x68] sm:$0xff]  ;;  %v1449_v36 = vmul.f32 0.2, %v1434_v39  ;;  %v1435_v17 = vadd.f32 %v1420_v24, %v1405_v52  ;;  %v1406_v25 = vmul.f32 %v1391_v35, %v1376_v20  ;;  %v1394_v58 = vmul.f32 %v5240_v21, %v5216_v38  ;;  %v3591_v24 = vld [vmem:[%s6069_s8 + $0x30] sm:$0xff]  ;;  %v3592_v20 = vld [vmem:[%s6069_s8 + $0x38] sm:$0xff] }
 0x324   : > { %4190 = vmatprep.subr.bf16.mxu1 %v5340_v0  ;;  %v1500_v11 = vsel %vm904_vm1, %v1497_v57, %v1499_v42  ;;  %v1503_v13 = vrot.slane %v5344_v61, 1  ;;  %v1407_v31 = vmul.f32 %v1392_v28, %v1377_v2  ;;  %v1408_v26 = vmul.f32 %v1393_v12, %v1378_v43 }
 0x325   : > { %v5391_v3 = vmax.f32 %v1434_v39, %v1449_v36  ;;  %v1450_v14 = vmul.f32 0.2, %v1435_v17  ;;  %v1436_v27 = vadd.f32 %v1421_v1, %v1406_v25  ;;  %v1409_v48 = vmul.f32 %v1394_v58, %v1379_v23 }
 0x326   : > { %3932 = vmatmul.mubr.msk.f32.gmra.mrb[2].mxu1 %vm1147_vm8, %v1498_v40  ;;  %v1437_v38 = vadd.f32 %v1422_v47, %v1407_v31  ;;  %v1438_v15 = vadd.f32 %v1423_v46, %v1408_v26  ;;  %v1502_v50 = vsel %vm904_vm1, %v1499_v42, %v1501_v60  ;;  %v1504_v63 = vsel %vm904_vm1, %v1501_v60, %v1503_v13 }
 0x327   : > { %3934 = vmatprep.mubr.msk.f32.mxu1 %vm1147_vm8, %v1500_v11  ;;  %v5394_v5 = vmax.f32 %v1435_v17, %v1450_v14  ;;  %v1451_v18 = vmul.f32 0.2, %v1436_v27  ;;  %v1439_v30 = vadd.f32 %v1424_v45, %v1409_v48  ;;  %v1505_v56 = vrot.slane %v5391_v3, 1 }
 0x328   : > { %v1452_v62 = vmul.f32 0.2, %v1437_v38  ;;  %v1453_v29 = vmul.f32 0.2, %v1438_v15  ;;  %v2055_v39 = vrot.slane %v5302_v32, 3  ;;  %v2056_v35 = vrot.slane %v5304_v37, 3 }
 0x329   : > { %v1507_v22 = vrot.slane %v5394_v5, 1  ;;  %v5401_v6 = vmax.f32 %v1436_v27, %v1451_v18  ;;  %v1454_v33 = vmul.f32 0.2, %v1439_v30  ;;  %v1506_v9 = vsel %vm904_vm1, %v1503_v13, %v1505_v56 }
 0x32a   : > { %3935 = vmatmul.mubr.msk.f32.gmra.mrb[4].mxu1 %vm1147_vm8, %v1502_v50  ;;  %v5404_v7 = vmax.f32 %v1437_v38, %v1452_v62  ;;  %v5406_v19 = vmax.f32 %v1438_v15, %v1453_v29  ;;  %v2058_v2 = vrot.slane %v5306_v34, 3  ;;  %v5433_v60 = vpack.c.bf16 %v3592_v20, %v3591_v24 }
 0x32b   : > { %3937 = vmatprep.mubr.msk.f32.mxu1 %vm1147_vm8, %v1504_v63  ;;  %v5408_v57 = vmax.f32 %v1439_v30, %v1454_v33  ;;  %v1509_v10 = vrot.slane %v5401_v6, 1  ;;  %v1508_v16 = vsel %vm904_vm1, %v1505_v56, %v1507_v22  ;;  %v2060_v1 = vrot.slane %v5308_v59, 3 }
 0x32c   : > { %v1511_v54 = vrot.slane %v5404_v7, 1  ;;  %v1513_v4 = vrot.slane %v5406_v19, 1  ;;  %v5437_v28 = vsel %vm2054_vm13, %v2055_v39, %v2056_v35  ;;  %v5440_v12 = vsel %vm2054_vm13, %v2056_v35, %v2058_v2 }
 0x32d   : > { %v1515_v42 = vrot.slane %v5408_v57, 1  ;;  %v1510_v8 = vsel %vm904_vm1, %v1507_v22, %v1509_v10  ;;  %v2062_v23 = vrot.slane %v5310_v51, 3  ;;  %v2064_v36 = vrot.slane %v5312_v49, 3 }
 0x32e   : > { %3938 = vmatmul.mubr.msk.f32.gmra.mrb[6].mxu1 %vm1147_vm8, %v1506_v9  ;;  %v1512_v52 = vsel %vm904_vm1, %v1509_v10, %v1511_v54  ;;  %v1514_v43 = vsel %vm904_vm1, %v1511_v54, %v1513_v4  ;;  %v5445_v17 = vsel %vm2054_vm13, %v2058_v2, %v2060_v1  ;;  %v2066_v25 = vrot.slane %v5330_v44, 3 }
 0x32f   : > { %3940 = vmatprep.mubr.msk.f32.mxu1 %vm1147_vm8, %v1508_v16  ;;  %v1516_v40 = vsel %vm904_vm1, %v1513_v4, %v1515_v42  ;;  %v2068_v47 = vrot.slane %v5344_v61, 3  ;;  %v2070_v46 = vrot.slane %v5391_v3, 3  ;;  %v5452_v58 = vsel %vm2054_vm13, %v2060_v1, %v2062_v23 }
 0x330   : > { %v5455_v11 = vsel %vm2054_vm13, %v2062_v23, %v2064_v36  ;;  %v2072_v13 = vrot.slane %v5394_v5, 3  ;;  %v2074_v31 = vrot.slane %v5401_v6, 3  ;;  %v5461_v26 = vsel %vm2054_vm13, %v2064_v36, %v2066_v25  ;;  %v1380_v23 = vld [vmem:[%s6067_s6 + $0x70] sm:$0x1] }
 0x331   : > { %v5464_v45 = vsel %vm2054_vm13, %v2066_v25, %v2068_v47  ;;  %v5467_v14 = vsel %vm2054_vm13, %v2068_v47, %v2070_v46  ;;  %v2076_v27 = vrot.slane %v5404_v7, 3  ;;  %v2078_v15 = vrot.slane %v5406_v19, 3 }
 0x332   : > { %3941 = vmatmul.mubr.msk.f32.gmra.mrb[8].mxu1 %vm1147_vm8, %v1510_v8  ;;  %v5471_v48 = vsel %vm2054_vm13, %v2070_v46, %v2072_v13  ;;  %v5474_v38 = vsel %vm2054_vm13, %v2072_v13, %v2074_v31  ;;  %v2080_v18 = vrot.slane %v5408_v57, 3  ;;  %v2264_v50 = vrot.slane %v5302_v32, 4 }
 0x333   : > { %3943 = vmatprep.mubr.msk.f32.mxu1 %vm1147_vm8, %v1512_v52  ;;  %v5479_v30 = vsel %vm2054_vm13, %v2074_v31, %v2076_v27  ;;  %v2265_v56 = vrot.slane %v5304_v37, 4  ;;  %v2267_v62 = vrot.slane %v5306_v34, 4  ;;  %v5486_v29 = vsel %vm2054_vm13, %v2076_v27, %v2078_v15  ;;  %v1425_v31 = vld [vmem:[%s6068_s7 + $0x70] sm:$0x1] }
 0x334   : > { %v5491_v63 = vsel %vm2054_vm13, %v2078_v15, %v2080_v18  ;;  %v2269_v22 = vrot.slane %v5308_v59, 4  ;;  %v2271_v33 = vrot.slane %v5310_v51, 4  ;;  %v2273_v16 = vrot.slane %v5312_v49, 4 }
 0x335   : > { %v5498_v9 = vsel %vm2263_vm14, %v2264_v50, %v2265_v56  ;;  %v5501_v10 = vsel %vm2263_vm14, %v2265_v56, %v2267_v62  ;;  %v2275_v54 = vrot.slane %v5330_v44, 4  ;;  %v2277_v24 = vrot.slane %v5344_v61, 4 }
 0x336   : > { %3944 = vmatmul.mubr.msk.f32.gmra.mrb[10].mxu1 %vm1147_vm8, %v1514_v43  ;;  %v5506_v4 = vsel %vm2263_vm14, %v2267_v62, %v2269_v22  ;;  %v2279_v20 = vrot.slane %v5391_v3, 4  ;;  %v5514_v8 = vsel %vm2263_vm14, %v2271_v33, %v2273_v16  ;;  %v2281_v52 = vrot.slane %v5394_v5, 4 }
 0x337   : > { %3946 = vmatprep.mubr.msk.f32.mxu1 %vm1147_vm8, %v1516_v40  ;;  %v5517_v39 = vsel %vm2263_vm14, %v2273_v16, %v2275_v54  ;;  %v2283_v35 = vrot.slane %v5401_v6, 4  ;;  %v5524_v2 = vsel %vm2263_vm14, %v2275_v54, %v2277_v24  ;;  %v2285_v40 = vrot.slane %v5404_v7, 4  ;;  %v3607_v54 = vld [vmem:[%s6069_s8 + $0x40] sm:$0xff] }
 0x338   : > { %v5527_v43 = vsel %vm2263_vm14, %v2277_v24, %v2279_v20  ;;  %v2287_v1 = vrot.slane %v5406_v19, 4  ;;  %v5538_v36 = vsel %vm2263_vm14, %v2279_v20, %v2281_v52  ;;  %v2289_v47 = vrot.slane %v5408_v57, 4  ;;  %v3608_v24 = vld [vmem:[%s6069_s8 + $0x48] sm:$0xff] }
 0x339   : > { %v5541_v25 = vsel %vm2263_vm14, %v2281_v52, %v2283_v35  ;;  %v1395_v46 = vmul.f32 %v5240_v21, %v5221_v41  ;;  %v5548_v13 = vsel %vm2263_vm14, %v2283_v35, %v2285_v40  ;;  %v1850_v16 = vrot.slane %v5306_v34, 2 }
 0x33a   : > { %3947 = vmatmul.mubr.msk.f32.gmra.mrb[12].mxu1 %vm1147_vm8, %v1515_v42  ;;  %v5509_v42 = vsel %vm2263_vm14, %v2269_v22, %v2271_v33  ;;  %v5557_v27 = vsel %vm2263_vm14, %v2287_v1, %v2289_v47  ;;  %v1847_v22 = vrot.slane %v5302_v32, 2  ;;  %v1848_v33 = vrot.slane %v5304_v37, 2 }
 0x33b   : > { %3953 = vmatprep.mubr.msk.f32.mxu1 %vm1147_vm8, %v5302_v32  ;;  %v1410_v15 = vmul.f32 %v1395_v46, %v1380_v23  ;;  %v4197_v20 = vpack.c.bf16 %v3608_v24, %v3607_v54  ;;  %v1854_v52 = vrot.slane %v5310_v51, 2  ;;  %v1864_v46 = vrot.slane %v5394_v5, 2 }
 0x33c   : > { %v1849_v32 = vsel %vm1846_vm15, %v1847_v22, %v1848_v33 }
 0x33d   : > { %v1440_v41 = vadd.f32 %v1425_v31, %v1410_v15  ;;  %v1866_v31 = vrot.slane %v5401_v6, 2  ;;  %v1868_v15 = vrot.slane %v5404_v7, 2 }
 0x33e   : > { %3954 = vmatmul.mubr.msk.f32.vlgmr.msra.gmra.mrb[0].mxu1 %vm1147_vm8, %v5304_v37  ;;  %v1852_v37 = vrot.slane %v5308_v59, 2 }
 0x33f   : > { %4192 = vmatpush3.bf16.msra.mxu1 %v5340_v0  ;;  %3956 = vmatprep.mubr.msk.f32.mxu1 %vm1147_vm8, %v5306_v34  ;;  %v5551_v0 = vsel %vm2263_vm14, %v2285_v40, %v2287_v1  ;;  %v1455_v21 = vmul.f32 0.2, %v1440_v41  ;;  %v1851_v34 = vsel %vm1846_vm15, %v1848_v33, %v1850_v16  ;;  %v1856_v40 = vrot.slane %v5312_v49, 2 }
 0x340   : > { %4194 = vmatprep.subr.bf16.mxu1 %v5433_v60  ;;  %v1853_v35 = vsel %vm1846_vm15, %v1850_v16, %v1852_v37  ;;  %v1858_v1 = vrot.slane %v5330_v44, 2 }
 0x341   : > { %v1470_v50 = vmax.f32 %v1440_v41, %v1455_v21  ;;  %v1857_v23 = vsel %vm1846_vm15, %v1854_v52, %v1856_v40  ;;  %v1870_v41 = vrot.slane %v5406_v19, 2  ;;  %v1872_v21 = vrot.slane %v5408_v57, 2 }
 0x342   : > { %3957 = vmatmul.mubr.msk.f32.gmra.mrb[2].mxu1 %vm1147_vm8, %v5308_v59  ;;  %v1855_v59 = vsel %vm1846_vm15, %v1852_v37, %v1854_v52 }
 0x343   : > { %3959 = vmatprep.mubr.msk.f32.mxu1 %vm1147_vm8, %v5310_v51  ;;  %v2291_v56 = vrot.slane %v1470_v50, 4  ;;  %v1860_v51 = vrot.slane %v5344_v61, 2 }
 0x345   : > { %v5572_v62 = vsel %vm2263_vm14, %v2289_v47, %v2291_v56  ;;  %v1859_v47 = vsel %vm1846_vm15, %v1856_v40, %v1858_v1 }
 0x346   : > { %3960 = vmatmul.mubr.msk.f32.gmra.mrb[4].mxu1 %vm1147_vm8, %v5312_v49  ;;  %v1862_v49 = vrot.slane %v5391_v3, 2 }
 0x347   : > { %3962 = vmatprep.mubr.msk.f32.mxu1 %vm1147_vm8, %v5330_v44 }
 0x348   : > { %v1863_v44 = vsel %vm1846_vm15, %v1860_v51, %v1862_v49 }
 0x34a   : > { %3963 = vmatmul.mubr.msk.f32.gmra.mrb[6].mxu1 %vm1147_vm8, %v5344_v61  ;;  %v1865_v61 = vsel %vm1846_vm15, %v1862_v49, %v1864_v46 }
 0x34b   : > { %3965 = vmatprep.mubr.msk.f32.mxu1 %vm1147_vm8, %v5391_v3  ;;  %v1867_v3 = vsel %vm1846_vm15, %v1864_v46, %v1866_v31 }
 0x34e   : > { %3966 = vmatmul.mubr.msk.f32.gmra.mrb[8].mxu1 %vm1147_vm8, %v5394_v5  ;;  %v1869_v5 = vsel %vm1846_vm15, %v1866_v31, %v1868_v15 }
 0x34f   : > { %3968 = vmatprep.mubr.msk.f32.mxu1 %vm1147_vm8, %v5401_v6  ;;  %v1871_v6 = vsel %vm1846_vm15, %v1868_v15, %v1870_v41 }
 0x352   : > { %3969 = vmatmul.mubr.msk.f32.gmra.mrb[10].mxu1 %vm1147_vm8, %v5404_v7  ;;  %v1873_v7 = vsel %vm1846_vm15, %v1870_v41, %v1872_v21 }
 0x353   : > { %3971 = vmatprep.mubr.msk.f32.mxu1 %vm1147_vm8, %v5406_v19  ;;  %v3624_v19 = vld [vmem:[%s6073_s12 + $0x10] sm:$0xff] }
 0x356   : > { %3972 = vmatmul.mubr.msk.f32.gmra.mrb[12].mxu1 %vm1147_vm8, %v5408_v57  ;;  %v3625_v57 = vld [vmem:[%s6073_s12 + $0x18] sm:$0xff] }
 0x357   : > { %3978 = vmatprep.mubr.msk.f32.mxu1 %vm1147_vm8, %v1849_v32 }
 0x35a   : > { %3979 = vmatmul.mubr.msk.f32.vlgmr.msra.gmra.mrb[0].mxu1 %vm1147_vm8, %v1851_v34 }
 0x35b   : > { %4196 = vmatpush3.bf16.msra.mxu1 %v5433_v60  ;;  %3981 = vmatprep.mubr.msk.f32.mxu1 %vm1147_vm8, %v1853_v35  ;;  %v1861_v60 = vsel %vm1846_vm15, %v1858_v1, %v1860_v51 }
 0x35c   : > { %4198 = vmatprep.subr.bf16.mxu1 %v4197_v20 }
 0x35e   : > { %3982 = vmatmul.mubr.msk.f32.gmra.mrb[2].mxu1 %vm1147_vm8, %v1855_v59 }
 0x35f   : > { %3984 = vmatprep.mubr.msk.f32.mxu1 %vm1147_vm8, %v1857_v23 }
 0x362   : > { %3985 = vmatmul.mubr.msk.f32.gmra.mrb[4].mxu1 %vm1147_vm8, %v1859_v47 }
 0x363   : > { %3987 = vmatprep.mubr.msk.f32.mxu1 %vm1147_vm8, %v1861_v60 }
 0x366   : > { %3988 = vmatmul.mubr.msk.f32.gmra.mrb[6].mxu1 %vm1147_vm8, %v1863_v44 }
 0x367   : > { %3990 = vmatprep.mubr.msk.f32.mxu1 %vm1147_vm8, %v1865_v61 }
 0x36a   : > { %3991 = vmatmul.mubr.msk.f32.gmra.mrb[8].mxu1 %vm1147_vm8, %v1867_v3 }
 0x36b   : > { %3993 = vmatprep.mubr.msk.f32.mxu1 %vm1147_vm8, %v1869_v5 }
 0x36e   : > { %3994 = vmatmul.mubr.msk.f32.gmra.mrb[10].mxu1 %vm1147_vm8, %v1871_v6 }
 0x36f   : > { %3996 = vmatprep.mubr.msk.f32.mxu1 %vm1147_vm8, %v1873_v7 }
 0x372   : > { %3997 = vmatmul.mubr.msk.f32.gmra.mrb[12].mxu1 %vm1147_vm8, %v1872_v21 }
 0x373   : > { %4003 = vmatprep.mubr.msk.f32.mxu1 %vm1147_vm8, %v5437_v28  ;;  %v4202_v28 = vpack.c.bf16 %v3625_v57, %v3624_v19 }
 0x375   : > { %4203 = vmatpush3.bf16.msra.mxu0 %v4202_v28 }
 0x376   : > { %4004 = vmatmul.mubr.msk.f32.vlgmr.msra.gmra.mrb[0].mxu1 %vm1147_vm8, %v5440_v12  ;;  %4207 = vmatprep.subr.bf16.mxu0 %v4311_v55  ;;  %v3623_v12 = vld [vmem:[%s6070_s9] ss:$0 sm:$0xff] }
 0x377   : > { %4200 = vmatpush3.bf16.msra.mxu1 %v4197_v20  ;;  %4006 = vmatprep.mubr.msk.f32.mxu1 %vm1147_vm8, %v5445_v17 }
 0x378   : > { %4216 = vmatprep.subr.bf16.mxu1 %v4311_v55 }
 0x37a   : > { %4007 = vmatmul.mubr.msk.f32.gmra.mrb[2].mxu1 %vm1147_vm8, %v5452_v58 }
 0x37b   : > { %4009 = vmatprep.mubr.msk.f32.mxu1 %vm1147_vm8, %v5455_v11 }
 0x37e   : > { %4010 = vmatmul.mubr.msk.f32.gmra.mrb[4].mxu1 %vm1147_vm8, %v5461_v26 }
 0x37f   : > { %4012 = vmatprep.mubr.msk.f32.mxu1 %vm1147_vm8, %v5464_v45 }
 0x382   : > { %4013 = vmatmul.mubr.msk.f32.gmra.mrb[6].mxu1 %vm1147_vm8, %v5467_v14 }
 0x383   : > { %4015 = vmatprep.mubr.msk.f32.mxu1 %vm1147_vm8, %v5471_v48 }
 0x386   : > { %4016 = vmatmul.mubr.msk.f32.gmra.mrb[8].mxu1 %vm1147_vm8, %v5474_v38 }
 0x387   : > { %4018 = vmatprep.mubr.msk.f32.mxu1 %vm1147_vm8, %v5479_v30 }
 0x38a   : > { %4019 = vmatmul.mubr.msk.f32.gmra.mrb[10].mxu1 %vm1147_vm8, %v5486_v29 }
 0x38b   : > { %4021 = vmatprep.mubr.msk.f32.mxu1 %vm1147_vm8, %v5491_v63 }
 0x38e   : > { %4022 = vmatmul.mubr.msk.f32.gmra.mrb[12].mxu1 %vm1147_vm8, %v2080_v18 }
 0x38f   : > { %4028 = vmatprep.mubr.msk.f32.mxu1 %vm1147_vm8, %v5498_v9 }
 0x392   : > { %4029 = vmatmul.mubr.msk.f32.vlgmr.msra.gmra.mrb[0].mxu1 %vm1147_vm8, %v5501_v10 }
 0x393   : > { %4031 = vmatprep.mubr.msk.f32.mxu1 %vm1147_vm8, %v5506_v4  ;;  %4217 = vmatpush3.bf16.msra.mxu1 %v4202_v28 }
 0x394   : > { %4204 = vmatprep.subr.bf16.mxu1 %v4311_v55 }
 0x396   : > { %4032 = vmatmul.mubr.msk.f32.gmra.mrb[2].mxu1 %vm1147_vm8, %v5509_v42 }
 0x397   : > { %4034 = vmatprep.mubr.msk.f32.mxu1 %vm1147_vm8, %v5514_v8 }
 0x39a   : > { %4035 = vmatmul.mubr.msk.f32.gmra.mrb[4].mxu1 %vm1147_vm8, %v5517_v39 }
 0x39b   : > { %4037 = vmatprep.mubr.msk.f32.mxu1 %vm1147_vm8, %v5524_v2 }
 0x39e   : > { %4038 = vmatmul.mubr.msk.f32.gmra.mrb[6].mxu1 %vm1147_vm8, %v5527_v43 }
 0x39f   : > { %4040 = vmatprep.mubr.msk.f32.mxu1 %vm1147_vm8, %v5538_v36 }
 0x3a2   : > { %4041 = vmatmul.mubr.msk.f32.gmra.mrb[8].mxu1 %vm1147_vm8, %v5541_v25 }
 0x3a3   : > { %4043 = vmatprep.mubr.msk.f32.mxu1 %vm1147_vm8, %v5548_v13 }
 0x3a6   : > { %4044 = vmatmul.mubr.msk.f32.gmra.mrb[10].mxu1 %vm1147_vm8, %v5551_v0 }
 0x3a7   : > { %4046 = vmatprep.mubr.msk.f32.mxu1 %vm1147_vm8, %v5557_v27 }
 0x3aa   : > { %4047 = vmatmul.mubr.msk.f32.gmra.mrb[12].mxu1 %vm1147_vm8, %v5572_v62 }
 0x3ab   : > { %4071 = vmatprep.mubr.msk.f32.mxu1 %vm4313_vm4, %v4314_v53 }
 0x465   : > { %v4030_v17 = vpop.f32.mrb[0].mxu1 }
 0x466   : > { %v2478_v58 = vadd.f32 %v4030_v17, %v3623_v12  ;;  %v2387_v11 = vpop.f32.mrb[1].mxu1 }
 0x467   : > { %v2477_v26 = vadd.f32 %v3623_v12, %v2387_v11 }
 0x468   : > { %2492 = vst.msk [vmem:[#allocation3 + $0x8] sm:$0xff] %vm1147_vm8, %v2478_v58 }
 0x469   : > { %2491 = vst.msk [vmem:[#allocation3] sm:$0xff] %vm1147_vm8, %v2477_v26  ;;  %v4033_v45 = vpop.f32.mrb[2].mxu1 }
 0x46a   : > { %v2480_v14 = vadd.f32 %v4033_v45, %v3623_v12  ;;  %v2397_v48 = vpop.f32.mrb[3].mxu1 }
 0x46b   : > { %v2479_v38 = vadd.f32 %v3623_v12, %v2397_v48 }
 0x46c   : > { %2494 = vst.msk [vmem:[#allocation3 + $0x18] sm:$0xff] %vm1147_vm8, %v2480_v14 }
 0x46d   : > { %2493 = vst.msk [vmem:[#allocation3 + $0x10] sm:$0xff] %vm1147_vm8, %v2479_v38  ;;  %v4036_v18 = vpop.f32.mrb[4].mxu1 }
 0x46e   : > { %v2482_v30 = vadd.f32 %v4036_v18, %v3623_v12  ;;  %v2407_v29 = vpop.f32.mrb[5].mxu1 }
 0x46f   : > { %v2481_v63 = vadd.f32 %v3623_v12, %v2407_v29 }
 0x470   : > { %2496 = vst.msk [vmem:[#allocation3 + $0x28] sm:$0xff] %vm1147_vm8, %v2482_v30  ;;  %v2506_v13 = vld [vmem:[#allocation3] ss:$2 sm:$0xff]  ;;  %v2520_v0 = vld [vmem:[#allocation3 + $0x1] ss:$2 sm:$0xff] }
 0x471   : > { %2495 = vst.msk [vmem:[#allocation3 + $0x20] sm:$0xff] %vm1147_vm8, %v2481_v63  ;;  %v4039_v9 = vpop.f32.mrb[6].mxu1  ;;  %v2533_v32 = vmax.f32 %v2506_v13, %v2520_v0 }
 0x472   : > { %v2484_v10 = vadd.f32 %v4039_v9, %v3623_v12  ;;  %v2417_v4 = vpop.f32.mrb[7].mxu1 }
 0x473   : > { %v2483_v42 = vadd.f32 %v3623_v12, %v2417_v4  ;;  %v2540_v51 = vsel %vm1147_vm8, %v2533_v32, 0.0 }
 0x474   : > { %2498 = vst.msk [vmem:[#allocation3 + $0x38] sm:$0xff] %vm1147_vm8, %v2484_v10  ;;  %v2508_v36 = vld [vmem:[#allocation3 + $0x10] ss:$2 sm:$0xff]  ;;  %v2522_v25 = vld [vmem:[#allocation3 + $0x11] ss:$2 sm:$0xff] }
 0x475   : > { %2497 = vst.msk [vmem:[#allocation3 + $0x30] sm:$0xff] %vm1147_vm8, %v2483_v42  ;;  %v4042_v8 = vpop.f32.mrb[8].mxu1  ;;  %v2534_v33 = vmax.f32 %v2508_v36, %v2522_v25 }
 0x476   : > { %v2486_v39 = vadd.f32 %v4042_v8, %v3623_v12  ;;  %v2427_v2 = vpop.f32.mrb[9].mxu1 }
 0x477   : > { %v2485_v43 = vadd.f32 %v3623_v12, %v2427_v2  ;;  %v2541_v35 = vsel %vm1147_vm8, %v2534_v33, 0.0 }
 0x478   : > { %2500 = vst.msk [vmem:[#allocation3 + $0x48] sm:$0xff] %vm1147_vm8, %v2486_v39  ;;  %v2510_v50 = vld [vmem:[#allocation3 + $0x20] ss:$2 sm:$0xff]  ;;  %v2524_v56 = vld [vmem:[#allocation3 + $0x21] ss:$2 sm:$0xff]  ;;  %v2542_v60 = vadd.f32 %v2541_v35, %v2540_v51 }
 0x479   : > { %2499 = vst.msk [vmem:[#allocation3 + $0x40] sm:$0xff] %vm1147_vm8, %v2485_v43  ;;  %v4045_v27 = vpop.f32.mrb[10].mxu1  ;;  %v2535_v37 = vmax.f32 %v2510_v50, %v2524_v56 }
 0x47a   : > { %v2488_v62 = vadd.f32 %v4045_v27, %v3623_v12  ;;  %v2437_v22 = vpop.f32.mrb[11].mxu1 }
 0x47b   : > { %v2487_v16 = vadd.f32 %v3623_v12, %v2437_v22  ;;  %v2543_v47 = vsel %vm1147_vm8, %v2535_v37, 0.0 }
 0x47c   : > { %v2512_v54 = vld [vmem:[#allocation3 + $0x30] ss:$2 sm:$0xff]  ;;  %v2526_v24 = vld [vmem:[#allocation3 + $0x31] ss:$2 sm:$0xff]  ;;  %2502 = vst.msk [vmem:[#allocation3 + $0x58] sm:$0xff] %vm1147_vm8, %v2488_v62  ;;  %v2544_v44 = vadd.f32 %v2543_v47, %v2542_v60 }
 0x47d   : > { %2501 = vst.msk [vmem:[#allocation3 + $0x50] sm:$0xff] %vm1147_vm8, %v2487_v16  ;;  %v4048_v20 = vpop.f32.mrb[12].mxu1  ;;  %v2536_v40 = vmax.f32 %v2512_v54, %v2526_v24 }
 0x47e   : > { %v2490_v34 = vadd.f32 %v4048_v20, %v3623_v12  ;;  %v2447_v52 = vpop.f32.mrb[13].mxu1 }
 0x47f   : > { %v2489_v59 = vadd.f32 %v3623_v12, %v2447_v52  ;;  %v2545_v46 = vsel %vm1147_vm8, %v2536_v40, 0.0 }
 0x480   : > { %v2514_v1 = vld [vmem:[#allocation3 + $0x40] ss:$2 sm:$0xff]  ;;  %v2528_v23 = vld [vmem:[#allocation3 + $0x41] ss:$2 sm:$0xff]  ;;  %2505 = vst.msk [vmem:[#allocation3 + $0x68] sm:$0x1f] %vm2504_vm0, %v2490_v34  ;;  %v2546_v41 = vadd.f32 %v2545_v46, %v2544_v44 }
 0x481   : > { %v2537_v49 = vmax.f32 %v2514_v1, %v2528_v23  ;;  %2503 = vst.msk [vmem:[#allocation3 + $0x60] sm:$0xff] %vm1147_vm8, %v2489_v59  ;;  %v2612_v46 = vld [vmem:[%s6071_s10 + $0x30] sm:$0x3f] }
 0x483   : > { %v2547_v15 = vsel %vm1147_vm8, %v2537_v49, 0.0 }
 0x484   : > { %v2516_v31 = vld [vmem:[#allocation3 + $0x50] ss:$2 sm:$0xff]  ;;  %v2530_v61 = vld [vmem:[#allocation3 + $0x51] ss:$2 sm:$0xff]  ;;  %v2548_v21 = vadd.f32 %v2547_v15, %v2546_v41  ;;  %v2607_v15 = vld [vmem:[%s6071_s10 + $0x8] sm:$0xff] }
 0x485   : > { %v2538_v3 = vmax.f32 %v2516_v31, %v2530_v61  ;;  %v2633_v31 = vld [vmem:[%s6072_s11 + $0x30] sm:$0x3f]  ;;  %v2606_v61 = vld [vmem:[%s6071_s10] sm:$0xff] }
 0x487   : > { %v2549_v5 = vsel %vm1147_vm8, %v2538_v3, 0.0 }
 0x488   : > { %v2518_v6 = vld [vmem:[#allocation3 + $0x60] ss:$2 sm:$0x3f]  ;;  %v2532_v7 = vld [vmem:[#allocation3 + $0x61] ss:$2 sm:$0x3f]  ;;  %v2550_v57 = vadd.f32 %v2549_v5, %v2548_v21 }
 0x489   : > { %v2539_v19 = vmax.f32 %v2518_v6, %v2532_v7  ;;  %v2609_v7 = vld [vmem:[%s6071_s10 + $0x18] sm:$0xff] }
 0x48b   : > { %v2552_v28 = vsel %vm2551_vm2, %v2539_v19, 0.0 }
 0x48c   : > { %v2553_v12 = vadd.f32 %v2552_v28, %v2550_v57  ;;  %v2611_v57 = vld [vmem:[%s6071_s10 + $0x28] sm:$0xff]  ;;  %v2627_v28 = vld [vmem:[%s6072_s11] sm:$0xff] }
 0x48e   : > { %v2554_v17 = vrot.slane %v2553_v12, 4 }
 0x490   : > { %v2555_v58 = vadd.f32 %v2554_v17, %v2553_v12  ;;  %v2628_v12 = vld [vmem:[%s6072_s11 + $0x8] sm:$0xff]  ;;  %v2629_v17 = vld [vmem:[%s6072_s11 + $0x10] sm:$0xff] }
 0x492   : > { %v2556_v11 = vrot.slane %v2555_v58, 2 }
 0x494   : > { %v2557_v26 = vadd.f32 %v2556_v11, %v2555_v58 }
 0x496   : > { %v2558_v45 = vrot.slane %v2557_v26, 1 }
 0x498   : > { %v2559_v14 = vadd.f32 %v2558_v45, %v2557_v26 }
 0x49a   : > { %v2561_v48 = vmul.f32 0.018518519, %v2559_v14 }
 0x49c   : > { %v2562_v38 = vsub.f32 %v2533_v32, %v2561_v48  ;;  %v2563_v18 = vsub.f32 %v2534_v33, %v2561_v48  ;;  %v2564_v30 = vsub.f32 %v2535_v37, %v2561_v48  ;;  %v2565_v29 = vsub.f32 %v2536_v40, %v2561_v48 }
 0x49d   : > { %v2566_v63 = vsub.f32 %v2537_v49, %v2561_v48  ;;  %v2567_v42 = vsub.f32 %v2538_v3, %v2561_v48  ;;  %v2568_v36 = vsub.f32 %v2539_v19, %v2561_v48  ;;  %v2608_v3 = vld [vmem:[%s6071_s10 + $0x10] sm:$0xff]  ;;  %v2610_v19 = vld [vmem:[%s6071_s10 + $0x20] sm:$0xff] }
 0x49e   : > { %v2569_v9 = vmul.f32 %v2562_v38, %v2562_v38  ;;  %v2570_v10 = vmul.f32 %v2563_v18, %v2563_v18  ;;  %v2571_v4 = vmul.f32 %v2564_v30, %v2564_v30  ;;  %v2572_v8 = vmul.f32 %v2565_v29, %v2565_v29 }
 0x49f   : > { %v2573_v25 = vmul.f32 %v2566_v63, %v2566_v63  ;;  %v2574_v27 = vmul.f32 %v2567_v42, %v2567_v42  ;;  %v2575_v62 = vmul.f32 %v2568_v36, %v2568_v36 }
 0x4a0   : > { %v2576_v39 = vsel %vm1147_vm8, %v2569_v9, 0.0  ;;  %v2577_v2 = vsel %vm1147_vm8, %v2570_v10, 0.0  ;;  %v2579_v13 = vsel %vm1147_vm8, %v2571_v4, 0.0  ;;  %v2581_v50 = vsel %vm1147_vm8, %v2572_v8, 0.0  ;;  %v2632_v9 = vld [vmem:[%s6072_s11 + $0x28] sm:$0xff] }
 0x4a1   : > { %v2578_v43 = vadd.f32 %v2577_v2, %v2576_v39  ;;  %v2583_v22 = vsel %vm1147_vm8, %v2573_v25, 0.0  ;;  %v2585_v16 = vsel %vm1147_vm8, %v2574_v27, 0.0  ;;  %v2587_v24 = vsel %vm2551_vm2, %v2575_v62, 0.0  ;;  %v2655_v39 = vld [vmem:[%s6073_s12] sm:$0xff]  ;;  %v3641_v25 = vld [vmem:[%s6073_s12 + $0x28] sm:$0xff] }
 0x4a3   : > { %v2580_v0 = vadd.f32 %v2579_v13, %v2578_v43  ;;  %v2656_v43 = vld [vmem:[%s6073_s12 + $0x8] sm:$0xff] }
 0x4a5   : > { %v2582_v56 = vadd.f32 %v2581_v50, %v2580_v0 }
 0x4a7   : > { %v2584_v33 = vadd.f32 %v2583_v22, %v2582_v56 }
 0x4a9   : > { %v2586_v54 = vadd.f32 %v2585_v16, %v2584_v33 }
 0x4ab   : > { %v2588_v32 = vadd.f32 %v2587_v24, %v2586_v54 }
 0x4ad   : > { %v2589_v37 = vrot.slane %v2588_v32, 4 }
 0x4af   : > { %v2590_v20 = vadd.f32 %v2589_v37, %v2588_v32 }
 0x4b1   : > { %v2591_v34 = vrot.slane %v2590_v20, 2 }
 0x4b3   : > { %v2592_v52 = vadd.f32 %v2591_v34, %v2590_v20  ;;  %v4205_v20 = vpack.c.bf16 %v2656_v43, %v2655_v39 }
 0x4b5   : > { %v2593_v35 = vrot.slane %v2592_v52, 1 }
 0x4b7   : > { %v2594_v40 = vadd.f32 %v2593_v35, %v2592_v52 }
 0x4b9   : > { %v2596_v59 = vmul.f32 0.018867925, %v2594_v40 }
 0x4bb   : > { %4295 = vrsqrt.f32 %v2596_v59  ;;  %vm2599_vm3 = vcmp.eq.f32.partialorder %v2596_v59, inf  ;;  %v2602_v51 = vand.u32 2147483648, %v2596_v59  ;;  %vm2601_vm5 = vcmp.eq.f32.partialorder %v2596_v59, 0.0 }
 0x4c5   : > { %v4296_v1 = vpop.eup %4295 }
 0x4c6   : > { %v2598_v23 = vmul.f32 %v4296_v1, %v2596_v59 }
 0x4c8   : > { %v2600_v47 = vsel %vm2599_vm3, %v2596_v59, %v2598_v23 }
 0x4c9   : > { %v2603_v49 = vsel %vm2601_vm5, %v2602_v51, %v2600_v47  ;;  %v3649_v47 = vld [vmem:[%s6073_s12 + $0x30] sm:$0xff] }
 0x4ca   : > { %v2604_v60 = vadd.f32 1e-06, %v2603_v49  ;;  %v3650_v49 = vld [vmem:[%s6073_s12 + $0x38] sm:$0xff] }
 0x4cc   : > { %4297 = vrcp.f32 %v2604_v60 }
 0x4d6   : > { %v4298_v44 = vpop.eup %4297 }
 0x4d7   : > { %v2619_v41 = vmul.f32 %v4298_v44, %v2568_v36  ;;  %v2613_v5 = vmul.f32 %v4298_v44, %v2562_v38  ;;  %v2614_v21 = vmul.f32 %v4298_v44, %v2563_v18  ;;  %v2615_v6 = vmul.f32 %v4298_v44, %v2564_v30  ;;  %v2630_v18 = vld [vmem:[%s6072_s11 + $0x18] sm:$0xff]  ;;  %v2631_v30 = vld [vmem:[%s6072_s11 + $0x20] sm:$0xff] }
 0x4d8   : > { %v2616_v58 = vmul.f32 %v4298_v44, %v2565_v29  ;;  %v2617_v11 = vmul.f32 %v4298_v44, %v2566_v63  ;;  %v2618_v26 = vmul.f32 %v4298_v44, %v2567_v42  ;;  %v3640_v36 = vld [vmem:[%s6073_s12 + $0x20] sm:$0xff] }
 0x4d9   : > { %v2626_v45 = vmul.f32 %v2619_v41, %v2612_v46  ;;  %v2620_v14 = vmul.f32 %v2613_v5, %v2606_v61  ;;  %v2621_v48 = vmul.f32 %v2614_v21, %v2607_v15  ;;  %v2622_v38 = vmul.f32 %v2615_v6, %v2608_v3 }
 0x4da   : > { %v2623_v10 = vmul.f32 %v2616_v58, %v2609_v7  ;;  %v2624_v29 = vmul.f32 %v2617_v11, %v2610_v19  ;;  %v2625_v63 = vmul.f32 %v2618_v26, %v2611_v57  ;;  %v4208_v34 = vpack.c.bf16 %v3641_v25, %v3640_v36 }
 0x4db   : > { %v2640_v4 = vadd.f32 %v2633_v31, %v2626_v45  ;;  %v2634_v42 = vadd.f32 %v2627_v28, %v2620_v14  ;;  %v2635_v8 = vadd.f32 %v2628_v12, %v2621_v48  ;;  %v2636_v2 = vadd.f32 %v2629_v17, %v2622_v38  ;;  %v3658_v45 = vld [vmem:[%s6073_s12 + $0x40] sm:$0xff]  ;;  %v3659_v14 = vld [vmem:[%s6073_s12 + $0x48] sm:$0xff] }
 0x4dc   : > { %v2637_v13 = vadd.f32 %v2630_v18, %v2623_v10  ;;  %v2638_v0 = vadd.f32 %v2631_v30, %v2624_v29  ;;  %v2639_v27 = vadd.f32 %v2632_v9, %v2625_v63  ;;  %v4211_v15 = vpack.c.bf16 %v3650_v49, %v3649_v47 }
 0x4dd   : > { %v2647_v50 = vmul.f32 0.2, %v2640_v4  ;;  %v2641_v56 = vmul.f32 0.2, %v2634_v42  ;;  %v2642_v62 = vmul.f32 0.2, %v2635_v8  ;;  %v4214_v30 = vpack.c.bf16 %v3659_v14, %v3658_v45 }
 0x4de   : > { %v2643_v22 = vmul.f32 0.2, %v2636_v2  ;;  %v2644_v33 = vmul.f32 0.2, %v2637_v13  ;;  %v2645_v16 = vmul.f32 0.2, %v2638_v0 }
 0x4df   : > { %v5784_v54 = vmax.f32 %v2640_v4, %v2647_v50  ;;  %v5786_v24 = vmax.f32 %v2634_v42, %v2641_v56  ;;  %v5788_v32 = vmax.f32 %v2635_v8, %v2642_v62  ;;  %v2646_v37 = vmul.f32 0.2, %v2639_v27 }
 0x4e0   : > { %v5790_v52 = vmax.f32 %v2636_v2, %v2643_v22  ;;  %v5792_v35 = vmax.f32 %v2638_v0, %v2645_v16  ;;  %v5809_v44 = vmax.f32 %v2637_v13, %v2644_v33 }
 0x4e1   : > { %v2678_v40 = vrot.slane %v5784_v54, 1  ;;  %v2667_v59 = vrot.slane %v5786_v24, 1  ;;  %v2668_v1 = vrot.slane %v5788_v32, 1  ;;  %v5797_v23 = vmax.f32 %v2639_v27, %v2646_v37 }
 0x4e2   : > { %v2674_v51 = vrot.slane %v5792_v35, 1  ;;  %v2670_v46 = vrot.slane %v5790_v52, 1  ;;  %v2918_v3 = vrot.slane %v5792_v35, 2  ;;  %v2672_v5 = vrot.slane %v5809_v44, 1 }
 0x4e3   : > { %4072 = vmatmul.mubr.msk.f32.vlgmr.msra.gmra.mrb[14].mxu1 %vm1147_vm8, %v2678_v40  ;;  %v2669_v60 = vsel %vm904_vm1, %v2667_v59, %v2668_v1  ;;  %v2676_v31 = vrot.slane %v5797_v23, 1  ;;  %v2920_v21 = vrot.slane %v5797_v23, 2  ;;  %v3055_v6 = vrot.slane %v5792_v35, 3 }
 0x4e4   : > { %4054 = vmatmul.mubr.msk.f32.vlgmr.msra.gmra.mrb[58].mxu0 %vm1147_vm8, %v2669_v60  ;;  %4206 = vmatpush3.bf16.msra.mxu1 %v4205_v20  ;;  %v2671_v41 = vsel %vm904_vm1, %v2668_v1, %v2670_v46  ;;  %v2673_v19 = vsel %vm904_vm1, %v2670_v46, %v2672_v5  ;;  %v3192_v28 = vrot.slane %v5792_v35, 4  ;;  %v3194_v12 = vrot.slane %v5797_v23, 4 }
 0x4e5   : > { %4209 = vmatpush3.bf16.msra.mxu0 %v4208_v34  ;;  %4078 = vmatprep.mubr.msk.f32.mxu1 %vm4313_vm4, %v4314_v53  ;;  %v2677_v61 = vsel %vm904_vm1, %v2674_v51, %v2676_v31  ;;  %v5837_v7 = vsel %vm1846_vm15, %v2918_v3, %v2920_v21  ;;  %v3196_v17 = vrot.slane %v5784_v54, 4  ;;  %v2675_v26 = vsel %vm904_vm1, %v2672_v5, %v2674_v51 }
 0x4e6   : > { %4056 = vmatprep.mubr.msk.f32.mxu0 %vm4313_vm4, %v4314_v53  ;;  %4210 = vmatprep.subr.bf16.mxu1 %v4311_v55  ;;  %v5861_v58 = vsel %vm2263_vm14, %v3192_v28, %v3194_v12  ;;  %v2679_v48 = vsel %vm904_vm1, %v2676_v31, %v2678_v40  ;;  %v2911_v38 = vrot.slane %v5786_v24, 2  ;;  %v2912_v18 = vrot.slane %v5788_v32, 2 }
 0x4e7   : > { %4079 = vmatmul.mubr.msk.f32.vlgmr.msra.gmra.mrb[16].mxu1 %vm1147_vm8, %v5786_v24  ;;  %4213 = vmatprep.subr.bf16.mxu0 %v4311_v55  ;;  %v3057_v55 = vrot.slane %v5797_v23, 3  ;;  %v5866_v11 = vsel %vm2263_vm14, %v3194_v12, %v3196_v17  ;;  %v2914_v10 = vrot.slane %v5790_v52, 2  ;;  %v3048_v29 = vrot.slane %v5786_v24, 3 }
 0x4e8   : > { %4057 = vmatmul.mubr.msk.f32.gmra.mrb[60].mxu0 %vm1147_vm8, %v2671_v41  ;;  %4081 = vmatprep.mubr.msk.f32.mxu1 %vm4313_vm4, %v4314_v53  ;;  %v2913_v9 = vsel %vm1846_vm15, %v2911_v38, %v2912_v18  ;;  %v3049_v63 = vrot.slane %v5788_v32, 3  ;;  %v2916_v42 = vrot.slane %v5809_v44, 2  ;;  %v3051_v39 = vrot.slane %v5790_v52, 3 }
 0x4e9   : > { %4059 = vmatprep.mubr.msk.f32.mxu0 %vm4313_vm4, %v4314_v53  ;;  %4212 = vmatpush3.bf16.msra.mxu1 %v4211_v15  ;;  %v5848_v57 = vsel %vm2054_vm13, %v3055_v6, %v3057_v55  ;;  %v2915_v4 = vsel %vm1846_vm15, %v2912_v18, %v2914_v10  ;;  %v3053_v36 = vrot.slane %v5809_v44, 3  ;;  %v2922_v0 = vrot.slane %v5784_v54, 2 }
 0x4ea   : > { %v3050_v8 = vsel %vm2054_vm13, %v3048_v29, %v3049_v63  ;;  %v2917_v2 = vsel %vm1846_vm15, %v2914_v10, %v2916_v42  ;;  %v3052_v43 = vsel %vm2054_vm13, %v3049_v63, %v3051_v39  ;;  %v2919_v25 = vsel %vm1846_vm15, %v2916_v42, %v2918_v3 }
 0x4eb   : > { %4082 = vmatmul.mubr.msk.f32.gmra.mrb[18].mxu1 %vm1147_vm8, %v5788_v32  ;;  %v3054_v13 = vsel %vm2054_vm13, %v3051_v39, %v3053_v36  ;;  %v3056_v27 = vsel %vm2054_vm13, %v3053_v36, %v3055_v6  ;;  %v2923_v50 = vsel %vm1846_vm15, %v2920_v21, %v2922_v0  ;;  %v3059_v56 = vrot.slane %v5784_v54, 3 }
 0x4ec   : > { %4060 = vmatmul.mubr.msk.f32.gmra.mrb[62].mxu0 %vm1147_vm8, %v2673_v19  ;;  %4084 = vmatprep.mubr.msk.f32.mxu1 %vm4313_vm4, %v4314_v53  ;;  %v3185_v62 = vrot.slane %v5786_v24, 4  ;;  %v3186_v22 = vrot.slane %v5788_v32, 4  ;;  %v3188_v24 = vrot.slane %v5790_v52, 4  ;;  %v3190_v37 = vrot.slane %v5809_v44, 4 }
 0x4ed   : > { %4062 = vmatprep.mubr.msk.f32.mxu0 %vm4313_vm4, %v4314_v53  ;;  %v3060_v33 = vsel %vm2054_vm13, %v3057_v55, %v3059_v56 }
 0x4ee   : > { %v3187_v16 = vsel %vm2263_vm14, %v3185_v62, %v3186_v22  ;;  %v3189_v32 = vsel %vm2263_vm14, %v3186_v22, %v3188_v24  ;;  %v3191_v20 = vsel %vm2263_vm14, %v3188_v24, %v3190_v37  ;;  %v3193_v34 = vsel %vm2263_vm14, %v3190_v37, %v3192_v28 }
 0x4ef   : > { %4085 = vmatmul.mubr.msk.f32.gmra.mrb[20].mxu1 %vm1147_vm8, %v5790_v52 }
 0x4f0   : > { %4063 = vmatmul.mubr.msk.f32.gmra.mrb[64].mxu0 %vm1147_vm8, %v2675_v26  ;;  %4087 = vmatprep.mubr.msk.f32.mxu1 %vm4313_vm4, %v4314_v53 }
 0x4f1   : > { %4065 = vmatprep.mubr.msk.f32.mxu0 %vm4313_vm4, %v4314_v53 }
 0x4f3   : > { %4088 = vmatmul.mubr.msk.f32.gmra.mrb[22].mxu1 %vm1147_vm8, %v5809_v44 }
 0x4f4   : > { %4066 = vmatmul.mubr.msk.f32.gmra.mrb[66].mxu0 %vm1147_vm8, %v2677_v61  ;;  %4090 = vmatprep.mubr.msk.f32.mxu1 %vm4313_vm4, %v4314_v53 }
 0x4f5   : > { %4068 = vmatprep.mubr.msk.f32.mxu0 %vm4313_vm4, %v4314_v53 }
 0x4f7   : > { %4091 = vmatmul.mubr.msk.f32.gmra.mrb[24].mxu1 %vm1147_vm8, %v5792_v35 }
 0x4f8   : > { %4069 = vmatmul.mubr.msk.f32.gmra.mrb[68].mxu0 %vm1147_vm8, %v2679_v48  ;;  %4093 = vmatprep.mubr.msk.f32.mxu1 %vm4313_vm4, %v4314_v53 }
 0x4f9   : > { %4103 = vmatprep.mubr.msk.f32.mxu0 %vm4313_vm4, %v4314_v53 }
 0x4fb   : > { %4094 = vmatmul.mubr.msk.f32.gmra.mrb[26].mxu1 %vm1147_vm8, %v5797_v23 }
 0x4fc   : > { %4104 = vmatmul.mubr.msk.f32.vlgmr.msra.gmra.mrb[70].mxu0 %vm1147_vm8, %v2913_v9  ;;  %4096 = vmatprep.mubr.msk.f32.mxu1 %vm4313_vm4, %v4314_v53 }
 0x4fd   : > { %4215 = vmatpush3.bf16.msra.mxu0 %v4214_v30  ;;  %4106 = vmatprep.mubr.msk.f32.mxu0 %vm4313_vm4, %v4314_v53 }
 0x4ff   : > { %4097 = vmatmul.mubr.msk.f32.gmra.mrb[28].mxu1 %vm1147_vm8, %v5784_v54 }
 0x500   : > { %4107 = vmatmul.mubr.msk.f32.gmra.mrb[72].mxu0 %vm1147_vm8, %v2915_v4  ;;  %4128 = vmatprep.mubr.msk.f32.mxu1 %vm4313_vm4, %v4314_v53 }
 0x501   : > { %4109 = vmatprep.mubr.msk.f32.mxu0 %vm4313_vm4, %v4314_v53 }
 0x503   : > { %4129 = vmatmul.mubr.msk.f32.vlgmr.msra.gmra.mrb[30].mxu1 %vm1147_vm8, %v3050_v8 }
 0x504   : > { %4110 = vmatmul.mubr.msk.f32.gmra.mrb[74].mxu0 %vm1147_vm8, %v2917_v2  ;;  %4131 = vmatprep.mubr.msk.f32.mxu1 %vm4313_vm4, %v4314_v53 }
 0x505   : > { %4112 = vmatprep.mubr.msk.f32.mxu0 %vm4313_vm4, %v4314_v53 }
 0x507   : > { %4132 = vmatmul.mubr.msk.f32.gmra.mrb[32].mxu1 %vm1147_vm8, %v3052_v43 }
 0x508   : > { %4113 = vmatmul.mubr.msk.f32.gmra.mrb[76].mxu0 %vm1147_vm8, %v2919_v25  ;;  %4134 = vmatprep.mubr.msk.f32.mxu1 %vm4313_vm4, %v4314_v53 }
 0x509   : > { %4115 = vmatprep.mubr.msk.f32.mxu0 %vm4313_vm4, %v4314_v53 }
 0x50b   : > { %4135 = vmatmul.mubr.msk.f32.gmra.mrb[34].mxu1 %vm1147_vm8, %v3054_v13 }
 0x50c   : > { %4116 = vmatmul.mubr.msk.f32.gmra.mrb[78].mxu0 %vm1147_vm8, %v5837_v7  ;;  %4137 = vmatprep.mubr.msk.f32.mxu1 %vm4313_vm4, %v4314_v53 }
 0x50d   : > { %4118 = vmatprep.mubr.msk.f32.mxu0 %vm4313_vm4, %v4314_v53 }
 0x50f   : > { %4138 = vmatmul.mubr.msk.f32.gmra.mrb[36].mxu1 %vm1147_vm8, %v3056_v27 }
 0x510   : > { %4119 = vmatmul.mubr.msk.f32.gmra.mrb[80].mxu0 %vm1147_vm8, %v2923_v50  ;;  %4140 = vmatprep.mubr.msk.f32.mxu1 %vm4313_vm4, %v4314_v53 }
 0x511   : > { %4121 = vmatprep.mubr.msk.f32.mxu0 %vm4313_vm4, %v4314_v53 }
 0x513   : > { %4141 = vmatmul.mubr.msk.f32.gmra.mrb[38].mxu1 %vm1147_vm8, %v5848_v57 }
 0x514   : > { %4122 = vmatmul.mubr.msk.f32.gmra.mrb[82].mxu0 %vm1147_vm8, %v2922_v0  ;;  %4143 = vmatprep.mubr.msk.f32.mxu1 %vm4313_vm4, %v4314_v53 }
 0x515   : > { %4153 = vmatprep.mubr.msk.f32.mxu0 %vm4313_vm4, %v4314_v53 }
 0x517   : > { %4144 = vmatmul.mubr.msk.f32.gmra.mrb[40].mxu1 %vm1147_vm8, %v3060_v33 }
 0x518   : > { %4154 = vmatmul.mubr.msk.f32.vlgmr.msra.gmra.mrb[84].mxu0 %vm1147_vm8, %v3187_v16  ;;  %4146 = vmatprep.mubr.msk.f32.mxu1 %vm4313_vm4, %v4314_v53 }
 0x519   : > { %4156 = vmatprep.mubr.msk.f32.mxu0 %vm4313_vm4, %v4314_v53 }
 0x51b   : > { %4147 = vmatmul.mubr.msk.f32.gmra.mrb[42].mxu1 %vm1147_vm8, %v3059_v56 }
 0x51c   : > { %4157 = vmatmul.mubr.msk.f32.gmra.mrb[86].mxu0 %vm1147_vm8, %v3189_v32 }
 0x51d   : > { %4159 = vmatprep.mubr.msk.f32.mxu0 %vm4313_vm4, %v4314_v53 }
 0x520   : > { %4160 = vmatmul.mubr.msk.f32.gmra.mrb[88].mxu0 %vm1147_vm8, %v3191_v20 }
 0x521   : > { %4162 = vmatprep.mubr.msk.f32.mxu0 %vm4313_vm4, %v4314_v53 }
 0x524   : > { %4163 = vmatmul.mubr.msk.f32.gmra.mrb[90].mxu0 %vm1147_vm8, %v3193_v34 }
 0x525   : > { %4165 = vmatprep.mubr.msk.f32.mxu0 %vm4313_vm4, %v4314_v53 }
 0x528   : > { %4166 = vmatmul.mubr.msk.f32.gmra.mrb[92].mxu0 %vm1147_vm8, %v5861_v58 }
 0x529   : > { %4168 = vmatprep.mubr.msk.f32.mxu0 %vm4313_vm4, %v4314_v53 }
 0x52c   : > { %4169 = vmatmul.mubr.msk.f32.gmra.mrb[94].mxu0 %vm1147_vm8, %v5866_v11 }
 0x52d   : > { %4171 = vmatprep.mubr.msk.f32.mxu0 %vm4313_vm4, %v4314_v53 }
 0x530   : > { %4172 = vmatmul.mubr.msk.f32.gmra.mrb[96].mxu0 %vm1147_vm8, %v3196_v17 }
 0x5b6   : > { %v2790_v52 = vpop.f32.mrb[14].mxu1 }
 0x5b7   : > { %v2760_v35 = vpop.f32.mrb[58].mxu0  ;;  %v4073_v40 = vpop.f32.mrb[15].mxu1 }
 0x5b8   : > { %v4055_v59 = vpop.f32.mrb[59].mxu0 }
 0x5ba   : > { %v2874_v1 = vpop.f32.mrb[16].mxu1 }
 0x5bb   : > { %v2875_v23 = vadd.f32 %v2874_v1, %v2760_v35  ;;  %v2765_v51 = vpop.f32.mrb[60].mxu0  ;;  %v4080_v47 = vpop.f32.mrb[17].mxu1 }
 0x5bc   : > { %v4058_v49 = vpop.f32.mrb[61].mxu0 }
 0x5be   : > { %v2879_v60 = vpop.f32.mrb[18].mxu1 }
 0x5bf   : > { %v2880_v46 = vadd.f32 %v2879_v60, %v2765_v51  ;;  %v2770_v44 = vpop.f32.mrb[62].mxu0  ;;  %v4083_v31 = vpop.f32.mrb[19].mxu1 }
 0x5c0   : > { %v4061_v61 = vpop.f32.mrb[63].mxu0 }
 0x5c2   : > { %v2884_v15 = vpop.f32.mrb[20].mxu1 }
 0x5c3   : > { %v2885_v53 = vadd.f32 %v2884_v15, %v2770_v44  ;;  %v2775_v3 = vpop.f32.mrb[64].mxu0  ;;  %v4086_v54 = vpop.f32.mrb[21].mxu1  ;;  %v3667_v44 = vld [vmem:[%s6074_s13] ss:$0 sm:$0xff] }
 0x5c4   : > { %v4064_v41 = vpop.f32.mrb[65].mxu0 }
 0x5c6   : > { %v2889_v5 = vpop.f32.mrb[22].mxu1 }
 0x5c7   : > { %v2890_v21 = vadd.f32 %v2889_v5, %v2775_v3  ;;  %v2780_v6 = vpop.f32.mrb[66].mxu0  ;;  %v4089_v7 = vpop.f32.mrb[23].mxu1 }
 0x5c8   : > { %v4067_v55 = vpop.f32.mrb[67].mxu0 }
 0x5ca   : > { %v2894_v19 = vpop.f32.mrb[24].mxu1 }
 0x5cb   : > { %v2895_v57 = vadd.f32 %v2894_v19, %v2780_v6  ;;  %v2785_v28 = vpop.f32.mrb[68].mxu0  ;;  %v4092_v12 = vpop.f32.mrb[25].mxu1 }
 0x5cc   : > { %v4070_v17 = vpop.f32.mrb[69].mxu0 }
 0x5ce   : > { %v2899_v58 = vpop.f32.mrb[26].mxu1 }
 0x5cf   : > { %v2900_v11 = vadd.f32 %v2899_v58, %v2785_v28  ;;  %v4095_v26 = vpop.f32.mrb[27].mxu1  ;;  %v3004_v45 = vpop.f32.mrb[70].mxu0 }
 0x5d0   : > { %v3038_v14 = vadd.f32 %v3004_v45, %v2875_v23  ;;  %v4105_v48 = vpop.f32.mrb[71].mxu0 }
 0x5d2   : > { %v2904_v38 = vpop.f32.mrb[28].mxu1 }
 0x5d3   : > { %v2905_v18 = vadd.f32 %v2904_v38, %v2790_v52  ;;  %v4098_v30 = vpop.f32.mrb[29].mxu1  ;;  %v3009_v9 = vpop.f32.mrb[72].mxu0 }
 0x5d4   : > { %v3039_v10 = vadd.f32 %v3009_v9, %v2880_v46  ;;  %v4108_v29 = vpop.f32.mrb[73].mxu0 }
 0x5d6   : > { %v3141_v63 = vpop.f32.mrb[30].mxu1 }
 0x5d7   : > { %v3175_v4 = vadd.f32 %v3141_v63, %v3038_v14  ;;  %v3014_v42 = vpop.f32.mrb[74].mxu0  ;;  %v4130_v8 = vpop.f32.mrb[31].mxu1 }
 0x5d8   : > { %v3040_v39 = vadd.f32 %v3014_v42, %v2885_v53  ;;  %v4111_v2 = vpop.f32.mrb[75].mxu0 }
 0x5da   : > { %v3146_v43 = vpop.f32.mrb[32].mxu1 }
 0x5db   : > { %v3176_v36 = vadd.f32 %v3146_v43, %v3039_v10  ;;  %v3019_v25 = vpop.f32.mrb[76].mxu0  ;;  %v4133_v13 = vpop.f32.mrb[33].mxu1 }
 0x5dc   : > { %v3041_v0 = vadd.f32 %v3019_v25, %v2890_v21  ;;  %v4114_v27 = vpop.f32.mrb[77].mxu0 }
 0x5de   : > { %v3151_v50 = vpop.f32.mrb[34].mxu1 }
 0x5df   : > { %v3177_v56 = vadd.f32 %v3151_v50, %v3040_v39  ;;  %v3024_v62 = vpop.f32.mrb[78].mxu0  ;;  %v4136_v22 = vpop.f32.mrb[35].mxu1 }
 0x5e0   : > { %v3042_v33 = vadd.f32 %v3024_v62, %v2895_v57  ;;  %v4117_v16 = vpop.f32.mrb[79].mxu0 }
 0x5e2   : > { %v3156_v24 = vpop.f32.mrb[36].mxu1 }
 0x5e3   : > { %v3178_v32 = vadd.f32 %v3156_v24, %v3041_v0  ;;  %v3029_v37 = vpop.f32.mrb[80].mxu0  ;;  %v4139_v20 = vpop.f32.mrb[37].mxu1 }
 0x5e4   : > { %v3043_v34 = vadd.f32 %v3029_v37, %v2900_v11  ;;  %v4120_v52 = vpop.f32.mrb[81].mxu0 }
 0x5e6   : > { %v3161_v35 = vpop.f32.mrb[38].mxu1 }
 0x5e7   : > { %v3179_v40 = vadd.f32 %v3161_v35, %v3042_v33  ;;  %v3034_v59 = vpop.f32.mrb[82].mxu0  ;;  %v4142_v1 = vpop.f32.mrb[39].mxu1 }
 0x5e8   : > { %v3044_v23 = vadd.f32 %v3034_v59, %v2905_v18  ;;  %v4123_v51 = vpop.f32.mrb[83].mxu0 }
 0x5ea   : > { %v3166_v47 = vpop.f32.mrb[40].mxu1 }
 0x5eb   : > { %v3180_v49 = vadd.f32 %v3166_v47, %v3043_v34  ;;  %v4145_v60 = vpop.f32.mrb[41].mxu1  ;;  %v3278_v46 = vpop.f32.mrb[84].mxu0 }
 0x5ec   : > { %v3312_v31 = vadd.f32 %v3278_v46, %v3175_v4  ;;  %v4155_v61 = vpop.f32.mrb[85].mxu0 }
 0x5ee   : > { %v3326_v15 = vadd.f32 %v3667_v44, %v3312_v31  ;;  %v3171_v53 = vpop.f32.mrb[42].mxu1 }
 0x5ef   : > { %v3181_v3 = vadd.f32 %v3171_v53, %v3044_v23  ;;  %v4148_v54 = vpop.f32.mrb[43].mxu1  ;;  %v3283_v41 = vpop.f32.mrb[86].mxu0 }
 0x5f0   : > { %3333 = vst.msk [vmem:[#allocation4] sm:$0xff] %vm1147_vm8, %v3326_v15  ;;  %v3313_v5 = vadd.f32 %v3283_v41, %v3176_v36  ;;  %v4158_v21 = vpop.f32.mrb[87].mxu0 }
 0x5f2   : > { %v3327_v6 = vadd.f32 %v3667_v44, %v3313_v5 }
 0x5f3   : > { %v3288_v7 = vpop.f32.mrb[88].mxu0 }
 0x5f4   : > { %3334 = vst.msk [vmem:[#allocation4 + $0x8] sm:$0xff] %vm1147_vm8, %v3327_v6  ;;  %v3314_v55 = vadd.f32 %v3288_v7, %v3177_v56  ;;  %v4161_v19 = vpop.f32.mrb[89].mxu0 }
 0x5f6   : > { %v3328_v57 = vadd.f32 %v3667_v44, %v3314_v55 }
 0x5f7   : > { %v3293_v28 = vpop.f32.mrb[90].mxu0 }
 0x5f8   : > { %3335 = vst.msk [vmem:[#allocation4 + $0x10] sm:$0xff] %vm1147_vm8, %v3328_v57  ;;  %v3315_v12 = vadd.f32 %v3293_v28, %v3178_v32  ;;  %v4164_v17 = vpop.f32.mrb[91].mxu0 }
 0x5fa   : > { %v3329_v58 = vadd.f32 %v3667_v44, %v3315_v12 }
 0x5fb   : > { %v3298_v11 = vpop.f32.mrb[92].mxu0  ;;  %v3340_v8 = vld [vmem:[#allocation4] ss:$2 sm:$0xff]  ;;  %v3348_v39 = vld [vmem:[#allocation4 + $0x1] ss:$2 sm:$0xff] }
 0x5fc   : > { %3336 = vst.msk [vmem:[#allocation4 + $0x18] sm:$0xff] %vm1147_vm8, %v3329_v58  ;;  %v3316_v26 = vadd.f32 %v3298_v11, %v3179_v40  ;;  %v4167_v45 = vpop.f32.mrb[93].mxu0  ;;  %v3355_v43 = vmax.f32 %v3340_v8, %v3348_v39  ;;  %v3421_v8 = vld [vmem:[%s6076_s15 + $0x18] sm:$0x1] }
 0x5fd   : > { %v3406_v45 = vld [vmem:[%s6075_s14] sm:$0xff] }
 0x5fe   : > { %v3330_v14 = vadd.f32 %v3667_v44, %v3316_v26  ;;  %v3359_v27 = vsel %vm1147_vm8, %v3355_v43, 0.0 }
 0x5ff   : > { %v3303_v48 = vpop.f32.mrb[94].mxu0 }
 0x600   : > { %3337 = vst.msk [vmem:[#allocation4 + $0x20] sm:$0xff] %vm1147_vm8, %v3330_v14  ;;  %v3317_v38 = vadd.f32 %v3303_v48, %v3180_v49  ;;  %v4170_v18 = vpop.f32.mrb[95].mxu0  ;;  %v3407_v48 = vld [vmem:[%s6075_s14 + $0x8] sm:$0xff] }
 0x601   : > { %v3409_v18 = vld [vmem:[%s6075_s14 + $0x18] sm:$0x1] }
 0x602   : > { %v3331_v30 = vadd.f32 %v3667_v44, %v3317_v38  ;;  %v3408_v38 = vld [vmem:[%s6075_s14 + $0x10] sm:$0xff] }
 0x603   : > { %v3308_v9 = vpop.f32.mrb[96].mxu0  ;;  %v3342_v63 = vld [vmem:[#allocation4 + $0x10] ss:$2 sm:$0xff]  ;;  %v3350_v4 = vld [vmem:[#allocation4 + $0x11] ss:$2 sm:$0xff] }
 0x604   : > { %3338 = vst.msk [vmem:[#allocation4 + $0x28] sm:$0xff] %vm1147_vm8, %v3331_v30  ;;  %v3318_v10 = vadd.f32 %v3308_v9, %v3181_v3  ;;  %v4173_v29 = vpop.f32.mrb[97].mxu0  ;;  %v3356_v2 = vmax.f32 %v3342_v63, %v3350_v4  ;;  %v3418_v63 = vld [vmem:[%s6076_s15] sm:$0xff]  ;;  %v3419_v4 = vld [vmem:[%s6076_s15 + $0x8] sm:$0xff] }
 0x606   : > { %v3332_v42 = vadd.f32 %v3667_v44, %v3318_v10  ;;  %v3360_v13 = vsel %vm1147_vm8, %v3356_v2, 0.0 }
 0x607   : > { %v3361_v56 = vadd.f32 %v3360_v13, %v3359_v27 }
 0x608   : > { %3339 = vst.msk [vmem:[#allocation4 + $0x30] sm:$0x3] %vm1176_vm9, %v3332_v42  ;;  %v3420_v42 = vld [vmem:[%s6076_s15 + $0x10] sm:$0xff] }
 0x60b   : > { %v3344_v36 = vld [vmem:[#allocation4 + $0x20] ss:$2 sm:$0xff]  ;;  %v3352_v25 = vld [vmem:[#allocation4 + $0x21] ss:$2 sm:$0xff] }
 0x60c   : > { %v3357_v0 = vmax.f32 %v3344_v36, %v3352_v25 }
 0x60e   : > { %v3362_v50 = vsel %vm1147_vm8, %v3357_v0, 0.0 }
 0x60f   : > { %v3346_v62 = vld [vmem:[#allocation4 + $0x30] ss:$2 sm:$0x1]  ;;  %v3354_v22 = vld [vmem:[#allocation4 + $0x31] ss:$2 sm:$0x1]  ;;  %v3363_v16 = vadd.f32 %v3362_v50, %v3361_v56 }
 0x610   : > { %v3358_v33 = vmax.f32 %v3346_v62, %v3354_v22 }
 0x612   : > { %v3364_v24 = vsel %vm1279_vm10, %v3358_v33, 0.0 }
 0x613   : > { %v3365_v32 = vadd.f32 %v3364_v24, %v3363_v16 }
 0x615   : > { %v3366_v37 = vrot.slane %v3365_v32, 4 }
 0x617   : > { %v3367_v20 = vadd.f32 %v3366_v37, %v3365_v32 }
 0x619   : > { %v3368_v34 = vrot.slane %v3367_v20, 2 }
 0x61b   : > { %v3369_v52 = vadd.f32 %v3368_v34, %v3367_v20 }
 0x61d   : > { %v3370_v35 = vrot.slane %v3369_v52, 1 }
 0x61f   : > { %v3371_v40 = vadd.f32 %v3370_v35, %v3369_v52 }
 0x621   : > { %v3373_v59 = vmul.f32 0.04, %v3371_v40 }
 0x623   : > { %v3374_v1 = vsub.f32 %v3355_v43, %v3373_v59  ;;  %v3375_v23 = vsub.f32 %v3356_v2, %v3373_v59  ;;  %v3376_v51 = vsub.f32 %v3357_v0, %v3373_v59  ;;  %v3377_v47 = vsub.f32 %v3358_v33, %v3373_v59 }
 0x625   : > { %v3378_v49 = vmul.f32 %v3374_v1, %v3374_v1  ;;  %v3379_v60 = vmul.f32 %v3375_v23, %v3375_v23  ;;  %v3380_v46 = vmul.f32 %v3376_v51, %v3376_v51  ;;  %v3381_v44 = vmul.f32 %v3377_v47, %v3377_v47 }
 0x627   : > { %v3382_v31 = vsel %vm1147_vm8, %v3378_v49, 0.0  ;;  %v3383_v61 = vsel %vm1147_vm8, %v3379_v60, 0.0  ;;  %v3385_v53 = vsel %vm1147_vm8, %v3380_v46, 0.0  ;;  %v3387_v54 = vsel %vm1279_vm10, %v3381_v44, 0.0 }
 0x628   : > { %v3384_v15 = vadd.f32 %v3383_v61, %v3382_v31 }
 0x62a   : > { %v3386_v3 = vadd.f32 %v3385_v53, %v3384_v15 }
 0x62c   : > { %v3388_v41 = vadd.f32 %v3387_v54, %v3386_v3 }
 0x62e   : > { %v3389_v5 = vrot.slane %v3388_v41, 4 }
 0x630   : > { %v3390_v21 = vadd.f32 %v3389_v5, %v3388_v41 }
 0x632   : > { %v3391_v6 = vrot.slane %v3390_v21, 2 }
 0x634   : > { %v3392_v7 = vadd.f32 %v3391_v6, %v3390_v21 }
 0x636   : > { %v3393_v55 = vrot.slane %v3392_v7, 1 }
 0x638   : > { %v3394_v19 = vadd.f32 %v3393_v55, %v3392_v7 }
 0x63a   : > { %v3396_v57 = vmul.f32 0.041666668, %v3394_v19 }
 0x63c   : > { %4299 = vrsqrt.f32 %v3396_v57  ;;  %vm3399_vm1 = vcmp.eq.f32.partialorder %v3396_v57, inf  ;;  %v3402_v17 = vand.u32 2147483648, %v3396_v57  ;;  %vm3401_vm4 = vcmp.eq.f32.partialorder %v3396_v57, 0.0 }
 0x646   : > { %v4300_v28 = vpop.eup %4299 }
 0x647   : > { %v3398_v12 = vmul.f32 %v4300_v28, %v3396_v57 }
 0x649   : > { %v3400_v58 = vsel %vm3399_vm1, %v3396_v57, %v3398_v12 }
 0x64a   : > { %v3403_v11 = vsel %vm3401_vm4, %v3402_v17, %v3400_v58 }
 0x64b   : > { %v3404_v26 = vadd.f32 1e-06, %v3403_v11 }
 0x64d   : > { %4301 = vrcp.f32 %v3404_v26 }
 0x657   : > { %v4302_v14 = vpop.eup %4301 }
 0x658   : > { %v3410_v30 = vmul.f32 %v4302_v14, %v3374_v1  ;;  %v3411_v9 = vmul.f32 %v4302_v14, %v3375_v23  ;;  %v3412_v10 = vmul.f32 %v4302_v14, %v3376_v51  ;;  %v3413_v29 = vmul.f32 %v4302_v14, %v3377_v47 }
 0x65a   : > { %v3414_v39 = vmul.f32 %v3410_v30, %v3406_v45  ;;  %v3415_v2 = vmul.f32 %v3411_v9, %v3407_v48  ;;  %v3416_v43 = vmul.f32 %v3412_v10, %v3408_v38  ;;  %v3417_v36 = vmul.f32 %v3413_v29, %v3409_v18 }
 0x65c   : > { %v3422_v25 = vadd.f32 %v3418_v63, %v3414_v39  ;;  %v3423_v13 = vadd.f32 %v3419_v4, %v3415_v2  ;;  %v3424_v0 = vadd.f32 %v3420_v42, %v3416_v43  ;;  %v3425_v27 = vadd.f32 %v3421_v8, %v3417_v36 }
 0x65e   : > { %v3426_v50 = vmul.f32 0.2, %v3422_v25  ;;  %v3427_v56 = vmul.f32 0.2, %v3423_v13  ;;  %v3428_v62 = vmul.f32 0.2, %v3424_v0 }
 0x65f   : > { %v3429_v22 = vmul.f32 0.2, %v3425_v27 }
 0x660   : > { %v3430_v33 = vmax.f32 %v3422_v25, %v3426_v50  ;;  %v3431_v16 = vmax.f32 %v3423_v13, %v3427_v56  ;;  %v3432_v24 = vmax.f32 %v3424_v0, %v3428_v62 }
 0x661   : > { %v3433_v32 = vmax.f32 %v3425_v27, %v3429_v22 }
 0x662   : > { %3434 = vst.msk [vmem:[%s538_s23] sm:$0xff] %vm1147_vm8, %v3430_v33  ;;  %3435 = vst.msk [vmem:[%s538_s23 + $0x8] sm:$0xff] %vm1147_vm8, %v3431_v16 }
 0x663   : > { %3436 = vst.msk [vmem:[%s538_s23 + $0x10] sm:$0xff] %vm1147_vm8, %v3432_v24 }
 0x664   : > { %3437 = vst.msk [vmem:[%s538_s23 + $0x18] sm:$0x1] %vm1279_vm10, %v3433_v32 }
 0x665 PF: > { %s26_s21 = sadd.s32 1, %s4309_s21  }
 0x666   : > { %p23_p4 = scmp.ge.s32.totalorder %s26_s21, 4  }
 0x668   :  { %25 = sbr.rel (!%p23_p4) target bundleno = 2 (0x2), region = 174 }

</bundles_post_ra>
